<compile_context>
chip_gen: v6e
topology: v6e:2x2x1
jax: 0.10.0
libtpu: 0.0.40
codegen_flags: <defaults>
</compile_context>

<pallas_src>
import math

import jax
import jax.numpy as jnp
from jax import lax
from jax.experimental import pallas as pl
from jax.experimental.pallas import tpu as pltpu

BN_EPS = 1e-5
LANE = 128
# bf16 operands for all matmuls and for activation storage between kernels.
# Accumulators / BN statistics / scale+shift remain f32.
MATMUL_DTYPE = jnp.bfloat16


def _round_up(x, m):
    return (x + m - 1) // m * m


def _vmem_limit_bytes():
    # Generation-aware VMEM budget: stay well under v7x's 64 MiB physical VMEM,
    # use most of v5e/v6e's 128 MiB.
    kind = ""
    try:
        kind = jax.devices()[0].device_kind.lower()
    except Exception:
        pass
    if "v7" in kind:
        return 48 * 1024 * 1024
    return 100 * 1024 * 1024


def _cparams(*sems):
    return pltpu.CompilerParams(dimension_semantics=sems,
                                vmem_limit_bytes=_vmem_limit_bytes())


# ----------------------------- Pallas kernels ------------------------------


def _maxpool_pad_kernel(x_ref, o_ref):
    # x_ref: (1, 2, H, W, C)                one pre-pool depth pair (clamped at
    #                                       the depth borders; ignored there)
    # o_ref: (1, 1, H//2+2, W//2+2, Cpad)   pooled plane written into conv1's
    #                                       spatially padded, lane-padded bf16
    #                                       input buffer (zero halo in-kernel).
    j = pl.program_id(1)
    nd = pl.num_programs(1)
    c = x_ref.shape[4]
    hh = o_ref.shape[2] - 2
    wh = o_ref.shape[3] - 2
    # Zero halo + zero lane padding; depth-halo planes (j==0, j==nd-1) stay 0.
    o_ref[...] = jnp.zeros_like(o_ref)

    @pl.when((j > 0) & (j < nd - 1))
    def _():
        x = x_ref[0]                              # (2, H, W, C)
        m = jnp.maximum(x[0], x[1])               # depth pair       (H, W, C)
        m = m.reshape(hh, 2, wh, 2, c)
        m = jnp.max(m, axis=3)                    # width pair
        m = jnp.max(m, axis=1)                    # height pair      (hh, wh, C)
        o_ref[0, 0, 1:hh + 1, 1:wh + 1, :c] = m.astype(o_ref.dtype)


def _conv_stats_kernel(x0_ref, x1_ref, x2_ref, w_ref, y_ref, ssum_ref, ssq_ref):
    # x{0,1,2}_ref: (1, 1, H+2, W+2, Cp)  depth planes d, d+1, d+2 of the
    #                                     spatially padded bf16 input
    # w_ref       : (3, 9*Cp, Coutp)      per-kd K-folded weights (VMEM resident)
    # y_ref       : (1, 1, H*W, Coutp)    pre-BN conv output (bf16)
    # ssum/ssq    : (1, 1, 1, Coutp)      per-(n,d) partial BN statistics (f32)
    hp2 = x0_ref.shape[2]
    wp2 = x0_ref.shape[3]
    cp = x0_ref.shape[4]
    h = hp2 - 2
    w = wp2 - 2
    coutp = y_ref.shape[3]

    acc = jnp.zeros((h * w, coutp), jnp.float32)
    planes = (x0_ref, x1_ref, x2_ref)
    for kd in range(3):
        plane = planes[kd][0, 0]                  # (H+2, W+2, Cp)
        cols = []
        for kh in range(3):
            for kw in range(3):
                cols.append(plane[kh:kh + h, kw:kw + w, :].reshape(h * w, cp))
        lhs = jnp.concatenate(cols, axis=1)       # in-VMEM im2col (H*W, 9*Cp)
        acc = acc + jnp.dot(lhs, w_ref[kd], preferred_element_type=jnp.float32)

    y_ref[0, 0] = acc.astype(y_ref.dtype)
    # BN statistics from the f32 accumulator (bf16 y rounding does not affect
    # them).  NOTE: E[y^2]-E[y]^2 in f32 is adequate here; keep stats in f32.
    ssum_ref[0, 0] = jnp.sum(acc, axis=0, keepdims=True)
    ssq_ref[0, 0] = jnp.sum(acc * acc, axis=0, keepdims=True)


def _bn_relu_pad_kernel(y_ref, scale_ref, shift_ref, o_ref):
    # Fused BN+ReLU that writes straight into the NEXT conv's padded input:
    # y_ref: (1, 1, H*W, Cp) bf16 ; scale/shift: (1, Cp) f32
    # o_ref: (1, 1, H+2, W+2, Cp) bf16 with zero halo.
    j = pl.program_id(1)
    nd = pl.num_programs(1)
    hp2 = o_ref.shape[2]
    wp2 = o_ref.shape[3]
    cp = o_ref.shape[4]
    h = hp2 - 2
    w = wp2 - 2
    o_ref[...] = jnp.zeros_like(o_ref)

    @pl.when((j > 0) & (j < nd - 1))
    def _():
        y = y_ref[0, 0].astype(jnp.float32)                       # (H*W, Cp)
        a = jnp.maximum(y * scale_ref[...] + shift_ref[...], 0.0)
        o_ref[0, 0, 1:h + 1, 1:w + 1, :] = a.reshape(h, w, cp).astype(o_ref.dtype)


def _bn_relu_kernel(y_ref, scale_ref, shift_ref, o_ref):
    # Final-block BN+ReLU: y_ref (tm, Cp) bf16 -> o_ref (tm, Cp) f32.
    y = y_ref[...].astype(jnp.float32)
    o_ref[...] = jnp.maximum(y * scale_ref[...] + shift_ref[...],
                             0.0).astype(o_ref.dtype)


# ----------------------------- wrappers (glue) ------------------------------


def maxpool_into_padded(x, cp):
    # x: (N, D, H, W, C) f32, even D/H/W  ->  (N, D/2+2, H/2+2, W/2+2, cp) bf16
    # i.e. the pooled activation already spatially halo-padded and lane-padded
    # for the first conv.
    n, d, h, w, c = x.shape
    dh, hh, wh = d // 2, h // 2, w // 2
    return pl.pallas_call(
        _maxpool_pad_kernel,
        grid=(n, dh + 2),
        in_specs=[pl.BlockSpec(
            (1, 2, h, w, c),
            lambda i, j: (i, jnp.clip(j - 1, 0, dh - 1), 0, 0, 0))],
        out_specs=pl.BlockSpec((1, 1, hh + 2, wh + 2, cp),
                               lambda i, j: (i, j, 0, 0, 0)),
        out_shape=jax.ShapeDtypeStruct((n, dh + 2, hh + 2, wh + 2, cp),
                                       MATMUL_DTYPE),
        compiler_params=_cparams("parallel", "parallel"),
    )(x)


def conv3d_stats(xp, w):
    # xp: (n, d+2, h+2, w+2, cp) bf16, spatially pre-padded, channel-padded.
    # w : (cout, cin_true, 3, 3, 3) PyTorch layout (f32).
    # Conv bias is dropped: it cancels exactly under training-mode BatchNorm.
    n, dp2, hp2, wp2, cp = xp.shape
    d, h, wsp = dp2 - 2, hp2 - 2, wp2 - 2
    hw = h * wsp
    cout, cin_true = w.shape[0], w.shape[1]
    assert cin_true <= cp, (cin_true, cp)
    cout_p = _round_up(cout, LANE)

    # (cout,cin,kd,kh,kw) -> (kd,kh,kw,cin,cout); pad TRUE cin up to the
    # activation's padded channel width (this was the previous NaN bug), pad
    # cout to a lane multiple, then fold (kh,kw,cin) into K per kd.
    wm = jnp.transpose(w, (2, 3, 4, 1, 0))
    wm = jnp.pad(wm, ((0, 0), (0, 0), (0, 0),
                      (0, cp - cin_true), (0, cout_p - cout)))
    wm = wm.reshape(3, 9 * cp, cout_p).astype(MATMUL_DTYPE)

    plane = (1, 1, hp2, wp2, cp)
    # TODO(synk): rolling 3-plane window (pl.ANY + make_async_copy) would cut
    # the 3x redundant plane DMA below; TODO(synk): H-band tiling for large H*W.
    y, ssum, ssq = pl.pallas_call(
        _conv_stats_kernel,
        grid=(n, d),
        in_specs=[
            pl.BlockSpec(plane, lambda i, j: (i, j, 0, 0, 0)),
            pl.BlockSpec(plane, lambda i, j: (i, j + 1, 0, 0, 0)),
            pl.BlockSpec(plane, lambda i, j: (i, j + 2, 0, 0, 0)),
            pl.BlockSpec((3, 9 * cp, cout_p), lambda i, j: (0, 0, 0)),
        ],
        out_specs=(
            pl.BlockSpec((1, 1, hw, cout_p), lambda i, j: (i, j, 0, 0)),
            pl.BlockSpec((1, 1, 1, cout_p), lambda i, j: (i, j, 0, 0)),
            pl.BlockSpec((1, 1, 1, cout_p), lambda i, j: (i, j, 0, 0)),
        ),
        out_shape=(
            jax.ShapeDtypeStruct((n, d, hw, cout_p), MATMUL_DTYPE),
            jax.ShapeDtypeStruct((n, d, 1, cout_p), jnp.float32),
            jax.ShapeDtypeStruct((n, d, 1, cout_p), jnp.float32),
        ),
        compiler_params=_cparams("parallel", "parallel"),
    )(xp, xp, xp, wm)
    return y, ssum, ssq, (n, d, h, wsp, cout_p)


def bn_scale_shift(ssum, ssq, gamma, beta, count, cout_p):
    # Finalize exact training-mode BatchNorm3d statistics (biased variance) and
    # fold them into  out = max(scale*y + shift, 0).  Tiny XLA reduction.
    mean = jnp.sum(ssum, axis=(0, 1, 2)) / count
    msq = jnp.sum(ssq, axis=(0, 1, 2)) / count
    var = jnp.maximum(msq - mean * mean, 0.0)
    gamma_p = jnp.pad(gamma, (0, cout_p - gamma.shape[0]))
    beta_p = jnp.pad(beta, (0, cout_p - beta.shape[0]))
    scale = (gamma_p * lax.rsqrt(var + BN_EPS)).astype(jnp.float32)
    shift = (beta_p - scale * mean).astype(jnp.float32)
    # Padded channels: gamma=beta=0 -> scale=shift=0 -> activations stay 0.
    return scale.reshape(1, cout_p), shift.reshape(1, cout_p)


def bn_relu_into_padded(y, scale, shift, h, w):
    # y: (n, d, h*w, cp) bf16  ->  (n, d+2, h+2, w+2, cp) bf16 with zero halo,
    # i.e. directly the padded input buffer of the next conv block.
    n, d, hw, cp = y.shape
    return pl.pallas_call(
        _bn_relu_pad_kernel,
        grid=(n, d + 2),
        in_specs=[
            pl.BlockSpec((1, 1, hw, cp),
                         lambda i, j: (i, jnp.clip(j - 1, 0, d - 1), 0, 0)),
            pl.BlockSpec((1, cp), lambda i, j: (0, 0)),
            pl.BlockSpec((1, cp), lambda i, j: (0, 0)),
        ],
        out_specs=pl.BlockSpec((1, 1, h + 2, w + 2, cp),
                               lambda i, j: (i, j, 0, 0, 0)),
        out_shape=jax.ShapeDtypeStruct((n, d + 2, h + 2, w + 2, cp),
                                       MATMUL_DTYPE),
        compiler_params=_cparams("parallel", "parallel"),
    )(y, scale, shift)


def bn_relu_rows(y2d, scale, shift):
    # Final-block BN+ReLU: (M, Cp) bf16 -> (M, Cp) f32, large lane-dense tiles.
    m, cp = y2d.shape
    tm = m if m <= 2048 else 2048
    return pl.pallas_call(
        _bn_relu_kernel,
        grid=(pl.cdiv(m, tm),),
        in_specs=[pl.BlockSpec((tm, cp), lambda i: (i, 0)),
                  pl.BlockSpec((1, cp), lambda i: (0, 0)),
                  pl.BlockSpec((1, cp), lambda i: (0, 0))],
        out_specs=pl.BlockSpec((tm, cp), lambda i: (i, 0)),
        out_shape=jax.ShapeDtypeStruct((m, cp), jnp.float32),
        compiler_params=_cparams("parallel"),
    )(y2d, scale, shift)


def down_conv_forward(x_ncdhw, params):
    # x_ncdhw: (N, C, D, H, W)  ->  (N, Cout, D//2, H//2, W//2)
    x = jnp.transpose(x_ncdhw, (0, 2, 3, 4, 1))          # NCDHW -> NDHWC
    cin = x.shape[-1]
    cp0 = _round_up(cin, LANE)
    # TODO(synk): maxpool input still carries only `cin` live lanes; could be
    # fused into conv1's input pipeline to avoid the low-lane-utilization pass.
    xp = maxpool_into_padded(x, cp0)                     # padded bf16 buffer

    # ---- block 1: conv + BN stats, then fused BN+ReLU into conv2's buffer ----
    y1, s1, q1, (n, d, h, w, c1p) = conv3d_stats(xp, params["w1"])
    count = float(n * d * h * w)
    scale1, shift1 = bn_scale_shift(s1, q1, params["g1"], params["beta1"],
                                    count, c1p)
    a1 = bn_relu_into_padded(y1, scale1, shift1, h, w)

    # ---- block 2: conv + BN stats, plain BN+ReLU (final output) ----
    y2, s2, q2, (_, _, _, _, c2p) = conv3d_stats(a1, params["w2"])
    scale2, shift2 = bn_scale_shift(s2, q2, params["g2"], params["beta2"],
                                    count, c2p)
    out = bn_relu_rows(y2.reshape(n * d * h * w, c2p), scale2, shift2)

    cout = params["w2"].shape[0]
    out = out.reshape(n, d, h, w, c2p)[..., :cout]       # drop lane padding
    return jnp.transpose(out, (0, 4, 1, 2, 3))           # NDHWC -> NCDHW


# ------------------------------- parameters ---------------------------------


def init_params(key, in_channels, out_channels):
    mid = out_channels // 2 if in_channels < out_channels else in_channels // 2
    k1, k2, k3, k4 = jax.random.split(key, 4)

    def conv_init(kw, kb, cin, cout):
        bound = 1.0 / math.sqrt(cin * 27)
        w = jax.random.uniform(kw, (cout, cin, 3, 3, 3), jnp.float32, -bound, bound)
        b = jax.random.uniform(kb, (cout,), jnp.float32, -bound, bound)
        return w, b

    w1, b1 = conv_init(k1, k2, in_channels, mid)
    w2, b2 = conv_init(k3, k4, mid, out_channels)
    # Conv biases kept for parameter parity with the PyTorch module but are
    # mathematically dead under train-mode BatchNorm (dropped in the kernels).
    return dict(
        w1=w1, b1=b1, g1=jnp.ones((mid,), jnp.float32),
        beta1=jnp.zeros((mid,), jnp.float32),
        w2=w2, b2=b2, g2=jnp.ones((out_channels,), jnp.float32),
        beta2=jnp.zeros((out_channels,), jnp.float32),
    )


# --------------------- precision-matched pure-JAX reference ------------------


def _reference(x_ncdhw, params):
    # Matches the kernels' matmul precision: conv operands cast to MATMUL_DTYPE,
    # accumulation / BatchNorm in f32 (as in the Pallas path).
    x = jnp.transpose(x_ncdhw, (0, 2, 3, 4, 1))
    n, d, h, w, c = x.shape
    x = x.reshape(n, d // 2, 2, h // 2, 2, w // 2, 2, c).max(axis=(2, 4, 6))

    def block(x, wt, b, g, be):
        wdhwio = jnp.transpose(wt, (2, 3, 4, 1, 0)).astype(MATMUL_DTYPE)
        y = lax.conv_general_dilated(
            x.astype(MATMUL_DTYPE), wdhwio, window_strides=(1, 1, 1),
            padding="SAME",
            dimension_numbers=("NDHWC", "DHWIO", "NDHWC"),
            preferred_element_type=jnp.float32) + b
        mean = y.mean(axis=(0, 1, 2, 3), keepdims=True)
        var = ((y - mean) ** 2).mean(axis=(0, 1, 2, 3), keepdims=True)
        y = (y - mean) / jnp.sqrt(var + BN_EPS)
        return jnp.maximum(g * y + be, 0.0)

    x = block(x, params["w1"], params["b1"], params["g1"], params["beta1"])
    x = block(x, params["w2"], params["b2"], params["g2"], params["beta2"])
    return jnp.transpose(x, (0, 4, 1, 2, 3))


# ---------------------------------- main -------------------------------------


if __name__ == "__main__":
    key = jax.random.PRNGKey(0)
    kx, kp = jax.random.split(key)

    N, C_IN, C_OUT, S = 2, 4, 16, 8            # small shapes; spatial must be even
    x = jax.random.normal(kx, (N, C_IN, S, S, S), jnp.float32)   # NCDHW like PyTorch
    params = init_params(kp, C_IN, C_OUT)

    fwd = jax.jit(down_conv_forward)
    out = jax.block_until_ready(fwd(x, params))
    assert out.shape == (N, C_OUT, S // 2, S // 2, S // 2), out.shape

    ref = jax.block_until_ready(_reference(x, params))
    max_err = float(jnp.max(jnp.abs(out - ref)))
    # Tolerance reflects bf16 matmul operands + bf16 activation storage vs. the
    # f32-normalization reference; a wrong conv/BN would be off by O(1).
    assert jnp.allclose(out, ref, atol=3e-2, rtol=3e-2), f"max abs err {max_err}"

    print("KERNEL_OK")
</pallas_src>

<mosaic_0001>
module attributes {stable_mosaic.version = 11 : i64} {
  func.func @_maxpool_pad_kernel(%arg0: i32, %arg1: i32, %arg2: memref<1x2x8x8x4xf32, #tpu.memory_space<vmem>>, %arg3: memref<1x1x6x6x128xbf16, #tpu.memory_space<vmem>>) attributes {dimension_semantics = [#tpu.dimension_semantics<parallel>, #tpu.dimension_semantics<parallel>], iteration_bounds = array<i64: 2, 6>, scalar_prefetch = 0 : i64, scratch_operands = 0 : i64, tpu.core_type = #tpu.core_type<tc>, window_params = [{transform_indices = @transform_0, window_bounds = array<i64: 1, 2, 8, 8, 4>}, {transform_indices = @transform_1, window_bounds = array<i64: 1, 1, 6, 6, 128>}]} {
    %cst = arith.constant 0.000000e+00 : bf16
    %0 = vector.broadcast %cst : bf16 to vector<1x1x6x6x128xbf16>
    %c0 = arith.constant 0 : index
    %c0_0 = arith.constant 0 : index
    %c0_1 = arith.constant 0 : index
    %c0_2 = arith.constant 0 : index
    %c0_3 = arith.constant 0 : index
    %1 = vector.load %arg3[%c0, %c0_0, %c0_1, %c0_2, %c0_3] : memref<1x1x6x6x128xbf16, #tpu.memory_space<vmem>>, vector<1x1x6x6x128xbf16>
    tpu.vector_store %arg3[%c0, %c0_0, %c0_1, %c0_2, %c0_3], %0 {strides = array<i32>} : memref<1x1x6x6x128xbf16, #tpu.memory_space<vmem>>, vector<1x1x6x6x128xbf16>,
    %c0_i32 = arith.constant 0 : i32
    %2 = arith.cmpi sgt, %arg1, %c0_i32 : i32
    %c5_i32 = arith.constant 5 : i32
    %3 = arith.cmpi slt, %arg1, %c5_i32 : i32
    %4 = arith.andi %2, %3 : i1
    %5 = arith.extui %4 : i1 to i32
    %c0_i32_4 = arith.constant 0 : i32
    %6 = arith.cmpi ne, %5, %c0_i32_4 : i32
    scf.if %6 {
      %c0_5 = arith.constant 0 : index
      %c0_6 = arith.constant 0 : index
      %c0_7 = arith.constant 0 : index
      %c0_8 = arith.constant 0 : index
      %c0_9 = arith.constant 0 : index
      %7 = vector.load %arg2[%c0_5, %c0_6, %c0_7, %c0_8, %c0_9] : memref<1x2x8x8x4xf32, #tpu.memory_space<vmem>>, vector<1x2x8x8x4xf32>
      %8 = vector.shape_cast %7 : vector<1x2x8x8x4xf32> to vector<2x8x8x4xf32>
      %9 = vector.extract_strided_slice %8 {offsets = [0, 0, 0, 0], sizes = [1, 8, 8, 4], strides = [1, 1, 1, 1]} : vector<2x8x8x4xf32> to vector<1x8x8x4xf32>
      %10 = vector.shape_cast %9 : vector<1x8x8x4xf32> to vector<8x8x4xf32>
      %11 = vector.extract_strided_slice %8 {offsets = [1, 0, 0, 0], sizes = [1, 8, 8, 4], strides = [1, 1, 1, 1]} : vector<2x8x8x4xf32> to vector<1x8x8x4xf32>
      %12 = vector.shape_cast %11 : vector<1x8x8x4xf32> to vector<8x8x4xf32>
      %13 = arith.maximumf %10, %12 : vector<8x8x4xf32>
      %14 = vector.shape_cast %13 : vector<8x8x4xf32> to vector<4x2x4x2x4xf32>
      %cst_10 = arith.constant dense<0xFF800000> : vector<4x2x4x4xf32>
      %15 = vector.multi_reduction <maximumf>, %14, %cst_10 [3] : vector<4x2x4x2x4xf32> to vector<4x2x4x4xf32>
      %cst_11 = arith.constant dense<0xFF800000> : vector<4x4x4xf32>
      %16 = vector.multi_reduction <maximumf>, %15, %cst_11 [1] : vector<4x2x4x4xf32> to vector<4x4x4xf32>
      %17 = arith.truncf %16 : vector<4x4x4xf32> to vector<4x4x4xbf16>
      %c0_12 = arith.constant 0 : index
      %c0_13 = arith.constant 0 : index
      %c1 = arith.constant 1 : index
      %c1_14 = arith.constant 1 : index
      %c0_15 = arith.constant 0 : index
      %18 = vector.load %arg3[%c0_12, %c0_13, %c1, %c1_14, %c0_15] : memref<1x1x6x6x128xbf16, #tpu.memory_space<vmem>>, vector<1x1x4x4x4xbf16>
      %19 = vector.shape_cast %18 : vector<1x1x4x4x4xbf16> to vector<4x4x4xbf16>
      %20 = vector.shape_cast %17 : vector<4x4x4xbf16> to vector<1x1x4x4x4xbf16>
      tpu.vector_store %arg3[%c0_12, %c0_13, %c1, %c1_14, %c0_15], %20 {strides = array<i32>} : memref<1x1x6x6x128xbf16, #tpu.memory_space<vmem>>, vector<1x1x4x4x4xbf16>,
    } else {
    }
    return
  }
  func.func @transform_0(%arg0: i32, %arg1: i32) -> (i32, i32, i32, i32, i32) {
    %c1_i32 = arith.constant 1 : i32
    %0 = arith.subi %arg1, %c1_i32 : i32
    %c0_i32 = arith.constant 0 : i32
    %c3_i32 = arith.constant 3 : i32
    %1 = arith.maxsi %c0_i32, %0 : i32
    %2 = arith.minsi %c3_i32, %1 : i32
    %c0_i32_0 = arith.constant 0 : i32
    %c0_i32_1 = arith.constant 0 : i32
    %c0_i32_2 = arith.constant 0 : i32
    %c0_i32_3 = arith.constant 0 : i32
    return %arg0, %2, %c0_i32_0, %c0_i32_1, %c0_i32_2 : i32, i32, i32, i32, i32
  }
  func.func @transform_1(%arg0: i32, %arg1: i32) -> (i32, i32, i32, i32, i32) {
    %c0_i32 = arith.constant 0 : i32
    %c0_i32_0 = arith.constant 0 : i32
    %c0_i32_1 = arith.constant 0 : i32
    %c0_i32_2 = arith.constant 0 : i32
    return %arg0, %arg1, %c0_i32, %c0_i32_0, %c0_i32_1 : i32, i32, i32, i32, i32
  }
}

module attributes {stable_mosaic.version = 11 : i64} {
  func.func @_conv_stats_kernel(%arg0: i32, %arg1: i32, %arg2: memref<1x1x6x6x128xbf16, #tpu.memory_space<vmem>>, %arg3: memref<1x1x6x6x128xbf16, #tpu.memory_space<vmem>>, %arg4: memref<1x1x6x6x128xbf16, #tpu.memory_space<vmem>>, %arg5: memref<3x1152x128xbf16, #tpu.memory_space<vmem>>, %arg6: memref<1x1x16x128xbf16, #tpu.memory_space<vmem>>, %arg7: memref<1x1x1x128xf32, #tpu.memory_space<vmem>>, %arg8: memref<1x1x1x128xf32, #tpu.memory_space<vmem>>) attributes {dimension_semantics = [#tpu.dimension_semantics<parallel>, #tpu.dimension_semantics<parallel>], iteration_bounds = array<i64: 2, 4>, scalar_prefetch = 0 : i64, scratch_operands = 0 : i64, tpu.core_type = #tpu.core_type<tc>, window_params = [{transform_indices = @transform_0, window_bounds = array<i64: 1, 1, 6, 6, 128>}, {transform_indices = @transform_1, window_bounds = array<i64: 1, 1, 6, 6, 128>}, {transform_indices = @transform_2, window_bounds = array<i64: 1, 1, 6, 6, 128>}, {pipeline_mode = #tpu.pipeline_mode<synchronous>, transform_indices = @transform_3, window_bounds = array<i64: 3, 1152, 128>}, {transform_indices = @transform_4, window_bounds = array<i64: 1, 1, 16, 128>}, {transform_indices = @transform_5, window_bounds = array<i64: 1, 1, 1, 128>}, {transform_indices = @transform_6, window_bounds = array<i64: 1, 1, 1, 128>}]} {
    %cst = arith.constant 0.000000e+00 : f32
    %0 = vector.broadcast %cst : f32 to vector<16x128xf32>
    %c0 = arith.constant 0 : index
    %c0_0 = arith.constant 0 : index
    %c0_1 = arith.constant 0 : index
    %c0_2 = arith.constant 0 : index
    %c0_3 = arith.constant 0 : index
    %1 = vector.load %arg2[%c0, %c0_0, %c0_1, %c0_2, %c0_3] : memref<1x1x6x6x128xbf16, #tpu.memory_space<vmem>>, vector<1x1x6x6x128xbf16>
    %2 = vector.shape_cast %1 : vector<1x1x6x6x128xbf16> to vector<6x6x128xbf16>
    %3 = vector.extract_strided_slice %2 {offsets = [0, 0, 0], sizes = [4, 4, 128], strides = [1, 1, 1]} : vector<6x6x128xbf16> to vector<4x4x128xbf16>
    %4 = vector.shape_cast %3 : vector<4x4x128xbf16> to vector<16x128xbf16>
    %5 = vector.extract_strided_slice %2 {offsets = [0, 1, 0], sizes = [4, 4, 128], strides = [1, 1, 1]} : vector<6x6x128xbf16> to vector<4x4x128xbf16>
    %6 = vector.shape_cast %5 : vector<4x4x128xbf16> to vector<16x128xbf16>
    %7 = vector.extract_strided_slice %2 {offsets = [0, 2, 0], sizes = [4, 4, 128], strides = [1, 1, 1]} : vector<6x6x128xbf16> to vector<4x4x128xbf16>
    %8 = vector.shape_cast %7 : vector<4x4x128xbf16> to vector<16x128xbf16>
    %9 = vector.extract_strided_slice %2 {offsets = [1, 0, 0], sizes = [4, 4, 128], strides = [1, 1, 1]} : vector<6x6x128xbf16> to vector<4x4x128xbf16>
    %10 = vector.shape_cast %9 : vector<4x4x128xbf16> to vector<16x128xbf16>
    %11 = vector.extract_strided_slice %2 {offsets = [1, 1, 0], sizes = [4, 4, 128], strides = [1, 1, 1]} : vector<6x6x128xbf16> to vector<4x4x128xbf16>
    %12 = vector.shape_cast %11 : vector<4x4x128xbf16> to vector<16x128xbf16>
    %13 = vector.extract_strided_slice %2 {offsets = [1, 2, 0], sizes = [4, 4, 128], strides = [1, 1, 1]} : vector<6x6x128xbf16> to vector<4x4x128xbf16>
    %14 = vector.shape_cast %13 : vector<4x4x128xbf16> to vector<16x128xbf16>
    %15 = vector.extract_strided_slice %2 {offsets = [2, 0, 0], sizes = [4, 4, 128], strides = [1, 1, 1]} : vector<6x6x128xbf16> to vector<4x4x128xbf16>
    %16 = vector.shape_cast %15 : vector<4x4x128xbf16> to vector<16x128xbf16>
    %17 = vector.extract_strided_slice %2 {offsets = [2, 1, 0], sizes = [4, 4, 128], strides = [1, 1, 1]} : vector<6x6x128xbf16> to vector<4x4x128xbf16>
    %18 = vector.shape_cast %17 : vector<4x4x128xbf16> to vector<16x128xbf16>
    %19 = vector.extract_strided_slice %2 {offsets = [2, 2, 0], sizes = [4, 4, 128], strides = [1, 1, 1]} : vector<6x6x128xbf16> to vector<4x4x128xbf16>
    %20 = vector.shape_cast %19 : vector<4x4x128xbf16> to vector<16x128xbf16>
    %21 = tpu.concatenate %4, %6, %8, %10, %12, %14, %16, %18, %20 in 1 : vector<16x128xbf16>, vector<16x128xbf16>, vector<16x128xbf16>, vector<16x128xbf16>, vector<16x128xbf16>, vector<16x128xbf16>, vector<16x128xbf16>, vector<16x128xbf16>, vector<16x128xbf16> -> vector<16x1152xbf16>
    %c0_4 = arith.constant 0 : index
    %c0_5 = arith.constant 0 : index
    %c0_6 = arith.constant 0 : index
    %22 = vector.load %arg5[%c0_4, %c0_5, %c0_6] : memref<3x1152x128xbf16, #tpu.memory_space<vmem>>, vector<1x1152x128xbf16>
    %23 = vector.shape_cast %22 : vector<1x1152x128xbf16> to vector<1152x128xbf16>
    %cst_7 = arith.constant dense<0.000000e+00> : vector<16x128xf32>
    %24 = tpu.matmul %21, %23, %cst_7 {dimension_numbers = #tpu.dot_dimension_numbers<[1], [0], [0], [1], [0, 0, 1, 1], [], []>} : vector<16x1152xbf16>, vector<1152x128xbf16>, vector<16x128xf32> -> vector<16x128xf32>
    %25 = arith.addf %0, %24 : vector<16x128xf32>
    %c0_8 = arith.constant 0 : index
    %c0_9 = arith.constant 0 : index
    %c0_10 = arith.constant 0 : index
    %c0_11 = arith.constant 0 : index
    %c0_12 = arith.constant 0 : index
    %26 = vector.load %arg3[%c0_8, %c0_9, %c0_10, %c0_11, %c0_12] : memref<1x1x6x6x128xbf16, #tpu.memory_space<vmem>>, vector<1x1x6x6x128xbf16>
    %27 = vector.shape_cast %26 : vector<1x1x6x6x128xbf16> to vector<6x6x128xbf16>
    %28 = vector.extract_strided_slice %27 {offsets = [0, 0, 0], sizes = [4, 4, 128], strides = [1, 1, 1]} : vector<6x6x128xbf16> to vector<4x4x128xbf16>
    %29 = vector.shape_cast %28 : vector<4x4x128xbf16> to vector<16x128xbf16>
    %30 = vector.extract_strided_slice %27 {offsets = [0, 1, 0], sizes = [4, 4, 128], strides = [1, 1, 1]} : vector<6x6x128xbf16> to vector<4x4x128xbf16>
    %31 = vector.shape_cast %30 : vector<4x4x128xbf16> to vector<16x128xbf16>
    %32 = vector.extract_strided_slice %27 {offsets = [0, 2, 0], sizes = [4, 4, 128], strides = [1, 1, 1]} : vector<6x6x128xbf16> to vector<4x4x128xbf16>
    %33 = vector.shape_cast %32 : vector<4x4x128xbf16> to vector<16x128xbf16>
    %34 = vector.extract_strided_slice %27 {offsets = [1, 0, 0], sizes = [4, 4, 128], strides = [1, 1, 1]} : vector<6x6x128xbf16> to vector<4x4x128xbf16>
    %35 = vector.shape_cast %34 : vector<4x4x128xbf16> to vector<16x128xbf16>
    %36 = vector.extract_strided_slice %27 {offsets = [1, 1, 0], sizes = [4, 4, 128], strides = [1, 1, 1]} : vector<6x6x128xbf16> to vector<4x4x128xbf16>
    %37 = vector.shape_cast %36 : vector<4x4x128xbf16> to vector<16x128xbf16>
    %38 = vector.extract_strided_slice %27 {offsets = [1, 2, 0], sizes = [4, 4, 128], strides = [1, 1, 1]} : vector<6x6x128xbf16> to vector<4x4x128xbf16>
    %39 = vector.shape_cast %38 : vector<4x4x128xbf16> to vector<16x128xbf16>
    %40 = vector.extract_strided_slice %27 {offsets = [2, 0, 0], sizes = [4, 4, 128], strides = [1, 1, 1]} : vector<6x6x128xbf16> to vector<4x4x128xbf16>
    %41 = vector.shape_cast %40 : vector<4x4x128xbf16> to vector<16x128xbf16>
    %42 = vector.extract_strided_slice %27 {offsets = [2, 1, 0], sizes = [4, 4, 128], strides = [1, 1, 1]} : vector<6x6x128xbf16> to vector<4x4x128xbf16>
    %43 = vector.shape_cast %42 : vector<4x4x128xbf16> to vector<16x128xbf16>
    %44 = vector.extract_strided_slice %27 {offsets = [2, 2, 0], sizes = [4, 4, 128], strides = [1, 1, 1]} : vector<6x6x128xbf16> to vector<4x4x128xbf16>
    %45 = vector.shape_cast %44 : vector<4x4x128xbf16> to vector<16x128xbf16>
    %46 = tpu.concatenate %29, %31, %33, %35, %37, %39, %41, %43, %45 in 1 : vector<16x128xbf16>, vector<16x128xbf16>, vector<16x128xbf16>, vector<16x128xbf16>, vector<16x128xbf16>, vector<16x128xbf16>, vector<16x128xbf16>, vector<16x128xbf16>, vector<16x128xbf16> -> vector<16x1152xbf16>
    %c1 = arith.constant 1 : index
    %c0_13 = arith.constant 0 : index
    %c0_14 = arith.constant 0 : index
    %47 = vector.load %arg5[%c1, %c0_13, %c0_14] : memref<3x1152x128xbf16, #tpu.memory_space<vmem>>, vector<1x1152x128xbf16>
    %48 = vector.shape_cast %47 : vector<1x1152x128xbf16> to vector<1152x128xbf16>
    %cst_15 = arith.constant dense<0.000000e+00> : vector<16x128xf32>
    %49 = tpu.matmul %46, %48, %cst_15 {dimension_numbers = #tpu.dot_dimension_numbers<[1], [0], [0], [1], [0, 0, 1, 1], [], []>} : vector<16x1152xbf16>, vector<1152x128xbf16>, vector<16x128xf32> -> vector<16x128xf32>
    %50 = arith.addf %25, %49 : vector<16x128xf32>
    %c0_16 = arith.constant 0 : index
    %c0_17 = arith.constant 0 : index
    %c0_18 = arith.constant 0 : index
    %c0_19 = arith.constant 0 : index
    %c0_20 = arith.constant 0 : index
    %51 = vector.load %arg4[%c0_16, %c0_17, %c0_18, %c0_19, %c0_20] : memref<1x1x6x6x128xbf16, #tpu.memory_space<vmem>>, vector<1x1x6x6x128xbf16>
    %52 = vector.shape_cast %51 : vector<1x1x6x6x128xbf16> to vector<6x6x128xbf16>
    %53 = vector.extract_strided_slice %52 {offsets = [0, 0, 0], sizes = [4, 4, 128], strides = [1, 1, 1]} : vector<6x6x128xbf16> to vector<4x4x128xbf16>
    %54 = vector.shape_cast %53 : vector<4x4x128xbf16> to vector<16x128xbf16>
    %55 = vector.extract_strided_slice %52 {offsets = [0, 1, 0], sizes = [4, 4, 128], strides = [1, 1, 1]} : vector<6x6x128xbf16> to vector<4x4x128xbf16>
    %56 = vector.shape_cast %55 : vector<4x4x128xbf16> to vector<16x128xbf16>
    %57 = vector.extract_strided_slice %52 {offsets = [0, 2, 0], sizes = [4, 4, 128], strides = [1, 1, 1]} : vector<6x6x128xbf16> to vector<4x4x128xbf16>
    %58 = vector.shape_cast %57 : vector<4x4x128xbf16> to vector<16x128xbf16>
    %59 = vector.extract_strided_slice %52 {offsets = [1, 0, 0], sizes = [4, 4, 128], strides = [1, 1, 1]} : vector<6x6x128xbf16> to vector<4x4x128xbf16>
    %60 = vector.shape_cast %59 : vector<4x4x128xbf16> to vector<16x128xbf16>
    %61 = vector.extract_strided_slice %52 {offsets = [1, 1, 0], sizes = [4, 4, 128], strides = [1, 1, 1]} : vector<6x6x128xbf16> to vector<4x4x128xbf16>
    %62 = vector.shape_cast %61 : vector<4x4x128xbf16> to vector<16x128xbf16>
    %63 = vector.extract_strided_slice %52 {offsets = [1, 2, 0], sizes = [4, 4, 128], strides = [1, 1, 1]} : vector<6x6x128xbf16> to vector<4x4x128xbf16>
    %64 = vector.shape_cast %63 : vector<4x4x128xbf16> to vector<16x128xbf16>
    %65 = vector.extract_strided_slice %52 {offsets = [2, 0, 0], sizes = [4, 4, 128], strides = [1, 1, 1]} : vector<6x6x128xbf16> to vector<4x4x128xbf16>
    %66 = vector.shape_cast %65 : vector<4x4x128xbf16> to vector<16x128xbf16>
    %67 = vector.extract_strided_slice %52 {offsets = [2, 1, 0], sizes = [4, 4, 128], strides = [1, 1, 1]} : vector<6x6x128xbf16> to vector<4x4x128xbf16>
    %68 = vector.shape_cast %67 : vector<4x4x128xbf16> to vector<16x128xbf16>
    %69 = vector.extract_strided_slice %52 {offsets = [2, 2, 0], sizes = [4, 4, 128], strides = [1, 1, 1]} : vector<6x6x128xbf16> to vector<4x4x128xbf16>
    %70 = vector.shape_cast %69 : vector<4x4x128xbf16> to vector<16x128xbf16>
    %71 = tpu.concatenate %54, %56, %58, %60, %62, %64, %66, %68, %70 in 1 : vector<16x128xbf16>, vector<16x128xbf16>, vector<16x128xbf16>, vector<16x128xbf16>, vector<16x128xbf16>, vector<16x128xbf16>, vector<16x128xbf16>, vector<16x128xbf16>, vector<16x128xbf16> -> vector<16x1152xbf16>
    %c2 = arith.constant 2 : index
    %c0_21 = arith.constant 0 : index
    %c0_22 = arith.constant 0 : index
    %72 = vector.load %arg5[%c2, %c0_21, %c0_22] : memref<3x1152x128xbf16, #tpu.memory_space<vmem>>, vector<1x1152x128xbf16>
    %73 = vector.shape_cast %72 : vector<1x1152x128xbf16> to vector<1152x128xbf16>
    %cst_23 = arith.constant dense<0.000000e+00> : vector<16x128xf32>
    %74 = tpu.matmul %71, %73, %cst_23 {dimension_numbers = #tpu.dot_dimension_numbers<[1], [0], [0], [1], [0, 0, 1, 1], [], []>} : vector<16x1152xbf16>, vector<1152x128xbf16>, vector<16x128xf32> -> vector<16x128xf32>
    %75 = arith.addf %50, %74 : vector<16x128xf32>
    %76 = arith.truncf %75 : vector<16x128xf32> to vector<16x128xbf16>
    %c0_24 = arith.constant 0 : index
    %c0_25 = arith.constant 0 : index
    %c0_26 = arith.constant 0 : index
    %c0_27 = arith.constant 0 : index
    %77 = vector.load %arg6[%c0_24, %c0_25, %c0_26, %c0_27] : memref<1x1x16x128xbf16, #tpu.memory_space<vmem>>, vector<1x1x16x128xbf16>
    %78 = vector.shape_cast %77 : vector<1x1x16x128xbf16> to vector<16x128xbf16>
    %79 = vector.shape_cast %76 : vector<16x128xbf16> to vector<1x1x16x128xbf16>
    tpu.vector_store %arg6[%c0_24, %c0_25, %c0_26, %c0_27], %79 {strides = array<i32>} : memref<1x1x16x128xbf16, #tpu.memory_space<vmem>>, vector<1x1x16x128xbf16>,
    %cst_28 = arith.constant dense<0.000000e+00> : vector<128xf32>
    %80 = vector.multi_reduction <add>, %75, %cst_28 [0] : vector<16x128xf32> to vector<128xf32>
    %81 = vector.shape_cast %80 : vector<128xf32> to vector<1x128xf32>
    %c0_29 = arith.constant 0 : index
    %c0_30 = arith.constant 0 : index
    %c0_31 = arith.constant 0 : index
    %c0_32 = arith.constant 0 : index
    %82 = vector.load %arg7[%c0_29, %c0_30, %c0_31, %c0_32] : memref<1x1x1x128xf32, #tpu.memory_space<vmem>>, vector<1x1x1x128xf32>
    %83 = vector.shape_cast %82 : vector<1x1x1x128xf32> to vector<1x128xf32>
    %84 = vector.shape_cast %81 : vector<1x128xf32> to vector<1x1x1x128xf32>
    tpu.vector_store %arg7[%c0_29, %c0_30, %c0_31, %c0_32], %84 {strides = array<i32>} : memref<1x1x1x128xf32, #tpu.memory_space<vmem>>, vector<1x1x1x128xf32>,
    %85 = arith.mulf %75, %75 : vector<16x128xf32>
    %cst_33 = arith.constant dense<0.000000e+00> : vector<128xf32>
    %86 = vector.multi_reduction <add>, %85, %cst_33 [0] : vector<16x128xf32> to vector<128xf32>
    %87 = vector.shape_cast %86 : vector<128xf32> to vector<1x128xf32>
    %c0_34 = arith.constant 0 : index
    %c0_35 = arith.constant 0 : index
    %c0_36 = arith.constant 0 : index
    %c0_37 = arith.constant 0 : index
    %88 = vector.load %arg8[%c0_34, %c0_35, %c0_36, %c0_37] : memref<1x1x1x128xf32, #tpu.memory_space<vmem>>, vector<1x1x1x128xf32>
    %89 = vector.shape_cast %88 : vector<1x1x1x128xf32> to vector<1x128xf32>
    %90 = vector.shape_cast %87 : vector<1x128xf32> to vector<1x1x1x128xf32>
    tpu.vector_store %arg8[%c0_34, %c0_35, %c0_36, %c0_37], %90 {strides = array<i32>} : memref<1x1x1x128xf32, #tpu.memory_space<vmem>>, vector<1x1x1x128xf32>,
    return
  }
  func.func @transform_0(%arg0: i32, %arg1: i32) -> (i32, i32, i32, i32, i32) {
    %c0_i32 = arith.constant 0 : i32
    %c0_i32_0 = arith.constant 0 : i32
    %c0_i32_1 = arith.constant 0 : i32
    %c0_i32_2 = arith.constant 0 : i32
    return %arg0, %arg1, %c0_i32, %c0_i32_0, %c0_i32_1 : i32, i32, i32, i32, i32
  }
  func.func @transform_1(%arg0: i32, %arg1: i32) -> (i32, i32, i32, i32, i32) {
    %c1_i32 = arith.constant 1 : i32
    %0 = arith.addi %arg1, %c1_i32 : i32
    %c0_i32 = arith.constant 0 : i32
    %c0_i32_0 = arith.constant 0 : i32
    %c0_i32_1 = arith.constant 0 : i32
    %c0_i32_2 = arith.constant 0 : i32
    return %arg0, %0, %c0_i32, %c0_i32_0, %c0_i32_1 : i32, i32, i32, i32, i32
  }
  func.func @transform_2(%arg0: i32, %arg1: i32) -> (i32, i32, i32, i32, i32) {
    %c2_i32 = arith.constant 2 : i32
    %0 = arith.addi %arg1, %c2_i32 : i32
    %c0_i32 = arith.constant 0 : i32
    %c0_i32_0 = arith.constant 0 : i32
    %c0_i32_1 = arith.constant 0 : i32
    %c0_i32_2 = arith.constant 0 : i32
    return %arg0, %0, %c0_i32, %c0_i32_0, %c0_i32_1 : i32, i32, i32, i32, i32
  }
  func.func @transform_3(%arg0: i32, %arg1: i32) -> (i32, i32, i32) {
    %c0_i32 = arith.constant 0 : i32
    %c0_i32_0 = arith.constant 0 : i32
    %c0_i32_1 = arith.constant 0 : i32
    %c0_i32_2 = arith.constant 0 : i32
    return %c0_i32, %c0_i32_0, %c0_i32_1 : i32, i32, i32
  }
  func.func @transform_4(%arg0: i32, %arg1: i32) -> (i32, i32, i32, i32) {
    %c0_i32 = arith.constant 0 : i32
    %c0_i32_0 = arith.constant 0 : i32
    %c0_i32_1 = arith.constant 0 : i32
    return %arg0, %arg1, %c0_i32, %c0_i32_0 : i32, i32, i32, i32
  }
  func.func @transform_5(%arg0: i32, %arg1: i32) -> (i32, i32, i32, i32) {
    %c0_i32 = arith.constant 0 : i32
    %c0_i32_0 = arith.constant 0 : i32
    %c0_i32_1 = arith.constant 0 : i32
    return %arg0, %arg1, %c0_i32, %c0_i32_0 : i32, i32, i32, i32
  }
  func.func @transform_6(%arg0: i32, %arg1: i32) -> (i32, i32, i32, i32) {
    %c0_i32 = arith.constant 0 : i32
    %c0_i32_0 = arith.constant 0 : i32
    %c0_i32_1 = arith.constant 0 : i32
    return %arg0, %arg1, %c0_i32, %c0_i32_0 : i32, i32, i32, i32
  }
}

module attributes {stable_mosaic.version = 11 : i64} {
  func.func @_bn_relu_pad_kernel(%arg0: i32, %arg1: i32, %arg2: memref<1x1x16x128xbf16, #tpu.memory_space<vmem>>, %arg3: memref<1x128xf32, #tpu.memory_space<vmem>>, %arg4: memref<1x128xf32, #tpu.memory_space<vmem>>, %arg5: memref<1x1x6x6x128xbf16, #tpu.memory_space<vmem>>) attributes {dimension_semantics = [#tpu.dimension_semantics<parallel>, #tpu.dimension_semantics<parallel>], iteration_bounds = array<i64: 2, 6>, scalar_prefetch = 0 : i64, scratch_operands = 0 : i64, tpu.core_type = #tpu.core_type<tc>, window_params = [{transform_indices = @transform_0, window_bounds = array<i64: 1, 1, 16, 128>}, {pipeline_mode = #tpu.pipeline_mode<synchronous>, transform_indices = @transform_1, window_bounds = array<i64: 1, 128>}, {pipeline_mode = #tpu.pipeline_mode<synchronous>, transform_indices = @transform_2, window_bounds = array<i64: 1, 128>}, {transform_indices = @transform_3, window_bounds = array<i64: 1, 1, 6, 6, 128>}]} {
    %cst = arith.constant 0.000000e+00 : bf16
    %0 = vector.broadcast %cst : bf16 to vector<1x1x6x6x128xbf16>
    %c0 = arith.constant 0 : index
    %c0_0 = arith.constant 0 : index
    %c0_1 = arith.constant 0 : index
    %c0_2 = arith.constant 0 : index
    %c0_3 = arith.constant 0 : index
    %1 = vector.load %arg5[%c0, %c0_0, %c0_1, %c0_2, %c0_3] : memref<1x1x6x6x128xbf16, #tpu.memory_space<vmem>>, vector<1x1x6x6x128xbf16>
    tpu.vector_store %arg5[%c0, %c0_0, %c0_1, %c0_2, %c0_3], %0 {strides = array<i32>} : memref<1x1x6x6x128xbf16, #tpu.memory_space<vmem>>, vector<1x1x6x6x128xbf16>,
    %c0_i32 = arith.constant 0 : i32
    %2 = arith.cmpi sgt, %arg1, %c0_i32 : i32
    %c5_i32 = arith.constant 5 : i32
    %3 = arith.cmpi slt, %arg1, %c5_i32 : i32
    %4 = arith.andi %2, %3 : i1
    %5 = arith.extui %4 : i1 to i32
    %c0_i32_4 = arith.constant 0 : i32
    %6 = arith.cmpi ne, %5, %c0_i32_4 : i32
    scf.if %6 {
      %c0_5 = arith.constant 0 : index
      %c0_6 = arith.constant 0 : index
      %c0_7 = arith.constant 0 : index
      %c0_8 = arith.constant 0 : index
      %7 = vector.load %arg2[%c0_5, %c0_6, %c0_7, %c0_8] : memref<1x1x16x128xbf16, #tpu.memory_space<vmem>>, vector<1x1x16x128xbf16>
      %8 = vector.shape_cast %7 : vector<1x1x16x128xbf16> to vector<16x128xbf16>
      %9 = arith.extf %8 : vector<16x128xbf16> to vector<16x128xf32>
      %c0_9 = arith.constant 0 : index
      %c0_10 = arith.constant 0 : index
      %10 = vector.load %arg3[%c0_9, %c0_10] : memref<1x128xf32, #tpu.memory_space<vmem>>, vector<1x128xf32>
      %11 = vector.broadcast %10 : vector<1x128xf32> to vector<16x128xf32>
      %12 = arith.mulf %9, %11 : vector<16x128xf32>
      %c0_11 = arith.constant 0 : index
      %c0_12 = arith.constant 0 : index
      %13 = vector.load %arg4[%c0_11, %c0_12] : memref<1x128xf32, #tpu.memory_space<vmem>>, vector<1x128xf32>
      %14 = vector.broadcast %13 : vector<1x128xf32> to vector<16x128xf32>
      %15 = arith.addf %12, %14 : vector<16x128xf32>
      %cst_13 = arith.constant 0.000000e+00 : f32
      %16 = vector.broadcast %cst_13 : f32 to vector<16x128xf32>
      %17 = arith.maximumf %15, %16 : vector<16x128xf32>
      %18 = vector.shape_cast %17 : vector<16x128xf32> to vector<4x4x128xf32>
      %19 = arith.truncf %18 : vector<4x4x128xf32> to vector<4x4x128xbf16>
      %c0_14 = arith.constant 0 : index
      %c0_15 = arith.constant 0 : index
      %c1 = arith.constant 1 : index
      %c1_16 = arith.constant 1 : index
      %c0_17 = arith.constant 0 : index
      %20 = vector.load %arg5[%c0_14, %c0_15, %c1, %c1_16, %c0_17] : memref<1x1x6x6x128xbf16, #tpu.memory_space<vmem>>, vector<1x1x4x4x128xbf16>
      %21 = vector.shape_cast %20 : vector<1x1x4x4x128xbf16> to vector<4x4x128xbf16>
      %22 = vector.shape_cast %19 : vector<4x4x128xbf16> to vector<1x1x4x4x128xbf16>
      tpu.vector_store %arg5[%c0_14, %c0_15, %c1, %c1_16, %c0_17], %22 {strides = array<i32>} : memref<1x1x6x6x128xbf16, #tpu.memory_space<vmem>>, vector<1x1x4x4x128xbf16>,
    } else {
    }
    return
  }
  func.func @transform_0(%arg0: i32, %arg1: i32) -> (i32, i32, i32, i32) {
    %c1_i32 = arith.constant 1 : i32
    %0 = arith.subi %arg1, %c1_i32 : i32
    %c0_i32 = arith.constant 0 : i32
    %c3_i32 = arith.constant 3 : i32
    %1 = arith.maxsi %c0_i32, %0 : i32
    %2 = arith.minsi %c3_i32, %1 : i32
    %c0_i32_0 = arith.constant 0 : i32
    %c0_i32_1 = arith.constant 0 : i32
    %c0_i32_2 = arith.constant 0 : i32
    return %arg0, %2, %c0_i32_0, %c0_i32_1 : i32, i32, i32, i32
  }
  func.func @transform_1(%arg0: i32, %arg1: i32) -> (i32, i32) {
    %c0_i32 = arith.constant 0 : i32
    %c0_i32_0 = arith.constant 0 : i32
    %c0_i32_1 = arith.constant 0 : i32
    return %c0_i32, %c0_i32_0 : i32, i32
  }
  func.func @transform_2(%arg0: i32, %arg1: i32) -> (i32, i32) {
    %c0_i32 = arith.constant 0 : i32
    %c0_i32_0 = arith.constant 0 : i32
    %c0_i32_1 = arith.constant 0 : i32
    return %c0_i32, %c0_i32_0 : i32, i32
  }
  func.func @transform_3(%arg0: i32, %arg1: i32) -> (i32, i32, i32, i32, i32) {
    %c0_i32 = arith.constant 0 : i32
    %c0_i32_0 = arith.constant 0 : i32
    %c0_i32_1 = arith.constant 0 : i32
    %c0_i32_2 = arith.constant 0 : i32
    return %arg0, %arg1, %c0_i32, %c0_i32_0, %c0_i32_1 : i32, i32, i32, i32, i32
  }
}

module attributes {stable_mosaic.version = 11 : i64} {
  func.func @_bn_relu_kernel(%arg0: i32, %arg1: memref<128x128xbf16, #tpu.memory_space<vmem>>, %arg2: memref<1x128xf32, #tpu.memory_space<vmem>>, %arg3: memref<1x128xf32, #tpu.memory_space<vmem>>, %arg4: memref<128x128xf32, #tpu.memory_space<vmem>>) attributes {dimension_semantics = [#tpu.dimension_semantics<parallel>], iteration_bounds = array<i64: 1>, scalar_prefetch = 0 : i64, scratch_operands = 0 : i64, tpu.core_type = #tpu.core_type<tc>, window_params = [{transform_indices = @transform_0, window_bounds = array<i64: 128, 128>}, {pipeline_mode = #tpu.pipeline_mode<synchronous>, transform_indices = @transform_1, window_bounds = array<i64: 1, 128>}, {pipeline_mode = #tpu.pipeline_mode<synchronous>, transform_indices = @transform_2, window_bounds = array<i64: 1, 128>}, {transform_indices = @transform_3, window_bounds = array<i64: 128, 128>}]} {
    %c0 = arith.constant 0 : index
    %c0_0 = arith.constant 0 : index
    %0 = vector.load %arg1[%c0, %c0_0] : memref<128x128xbf16, #tpu.memory_space<vmem>>, vector<128x128xbf16>
    %1 = arith.extf %0 : vector<128x128xbf16> to vector<128x128xf32>
    %c0_1 = arith.constant 0 : index
    %c0_2 = arith.constant 0 : index
    %2 = vector.load %arg2[%c0_1, %c0_2] : memref<1x128xf32, #tpu.memory_space<vmem>>, vector<1x128xf32>
    %3 = vector.broadcast %2 : vector<1x128xf32> to vector<128x128xf32>
    %4 = arith.mulf %1, %3 : vector<128x128xf32>
    %c0_3 = arith.constant 0 : index
    %c0_4 = arith.constant 0 : index
    %5 = vector.load %arg3[%c0_3, %c0_4] : memref<1x128xf32, #tpu.memory_space<vmem>>, vector<1x128xf32>
    %6 = vector.broadcast %5 : vector<1x128xf32> to vector<128x128xf32>
    %7 = arith.addf %4, %6 : vector<128x128xf32>
    %cst = arith.constant 0.000000e+00 : f32
    %8 = vector.broadcast %cst : f32 to vector<128x128xf32>
    %9 = arith.maximumf %7, %8 : vector<128x128xf32>
    %c0_5 = arith.constant 0 : index
    %c0_6 = arith.constant 0 : index
    %10 = vector.load %arg4[%c0_5, %c0_6] : memref<128x128xf32, #tpu.memory_space<vmem>>, vector<128x128xf32>
    tpu.vector_store %arg4[%c0_5, %c0_6], %9 {strides = array<i32>} : memref<128x128xf32, #tpu.memory_space<vmem>>, vector<128x128xf32>,
    return
  }
  func.func @transform_0(%arg0: i32) -> (i32, i32) {
    %c0_i32 = arith.constant 0 : i32
    %c0_i32_0 = arith.constant 0 : i32
    return %arg0, %c0_i32 : i32, i32
  }
  func.func @transform_1(%arg0: i32) -> (i32, i32) {
    %c0_i32 = arith.constant 0 : i32
    %c0_i32_0 = arith.constant 0 : i32
    %c0_i32_1 = arith.constant 0 : i32
    return %c0_i32, %c0_i32_0 : i32, i32
  }
  func.func @transform_2(%arg0: i32) -> (i32, i32) {
    %c0_i32 = arith.constant 0 : i32
    %c0_i32_0 = arith.constant 0 : i32
    %c0_i32_1 = arith.constant 0 : i32
    return %c0_i32, %c0_i32_0 : i32, i32
  }
  func.func @transform_3(%arg0: i32) -> (i32, i32) {
    %c0_i32 = arith.constant 0 : i32
    %c0_i32_0 = arith.constant 0 : i32
    return %arg0, %c0_i32 : i32, i32
  }
}

</mosaic_0001>

<bundles_post_ra>
// kernel: down_conv_forward.5
= control target key start
LH: loop header
LB: loop body
LE: loop exit
PB: predicated region body
PF: predicated region fallthrough
CT: control target
= control target key end

     0   :  { %s1066_s6 = smov 0   ;;  %s1068_s7 = smov 0   ;;  %s1415_s0 = inlined_call_operand.vmem [shape: f32[2,8,8,8,4], index: 0, kind: input, shape index: {}]   ;;  %s1416_s1 = inlined_call_operand.vmem [shape: bf16[2,6,6,6,128], index: 1, kind: output, shape index: {}]  }
   0x1   :  { %s1070_s8 = smov 0   ;;  %s1072_s9 = smov 0  }
   0x2   :  { %s1074_s10 = smov 0  }
   0x3 LB: > { %s20_s11 = sadd.s32 1, %s1044_s8  ;;  %s23_s12 = sadd.s32 1, %s1048_s9  ;;  %s1052_s10 = sphi %s1074_s10, %s11_s10   ;;  %s1048_s9 = sphi %s1072_s9, %s1423_s9   ;;  %s1044_s8 = sphi %s1070_s8, %s1422_s8   ;;  %s1040_s7 = sphi %s1068_s7, %s1421_s7   ;;  %s1036_s6 = sphi %s1066_s6, %s1420_s6  }
   0x4   : > { %p21_p0 = scmp.ge.s32.totalorder %s20_s11, 6  ;;  %p910_p1 = scmp.ge.s32.totalorder %s1052_s10, 1 }
   0x5   : > { %p129_p2 = scmp.lt.s32.totalorder %s1052_s10, 13 }
   0x6   : > { %s1425_s11 = smov (%p21_p0, %s20_s11), 0  ;;  %s1427_s12 = smov (!%p21_p0, %s23_s12), %s1048_s9 }
   0x7   : > { %p130_p3 = pnand %p910_p1, %p129_p2  ;;  %p25_p4 = scmp.ge.s32.totalorder %s1427_s12, 2 }
   0x8   : > { %s911_s13 = sadd.s32 (!%p130_p3), 4294967295, %s1036_s6  ;;  %p169_p5 = scmp.lt.s32.totalorder (!%p130_p3), %s1040_s7, 1 }
   0x9   : > { %s1429_s12 = smov (%p25_p4, %s1427_s12), 0  ;;  %133 = sbr.rel (%p130_p3) target bundleno = 128 (0x80), region = 24 }
   0xa   : > { %p164_p6 = scmp.gt.s32.totalorder (!%p130_p3), %s911_s13, 0  ;;  %p912_p7 = scmp.lt.s32.totalorder (!%p130_p3), %s911_s13, 3 }
   0xb   : > { %p186_p8 = scmp.lt.s32.totalorder (!%p130_p3), %s1036_s6, 5  ;;  %p200_p10 = scmp.gt.s32.totalorder (!%p130_p3), %s1036_s6, 0 }
   0xd   : > { %p1102_p11 = pnand (!%p130_p3), %p200_p10, %p186_p8 }
   0xe   : > { %s1431_s7 = smov (!%p169_p5, %s1040_s7), 1  ;;  %s1433_s13 = smov (!%p164_p6, %s911_s13), 0  ;;  %v1054_v0 = vmov 0  }
   0xf   : > { %s1435_s13 = smov (!%p912_p7, %s1433_s13), 3  ;;  %s971_s16 = smul.u32 36, %s1431_s7 }
  0x10   : > { %s187_s14 = scalar_select %p186_p8, %s1036_s6, 5 }
  0x11   : > { %s917_s15 = sshll.u32 %s1435_s13, 1  ;;  %s919_s18 = sshll.u32 %s1431_s7, 6 }
  0x12   : > { %p171_p9 = scmp.lt.s32.totalorder %s917_s15, 7  ;;  %s970_s17 = smul.u32 6, %s187_s14 }
  0x14   : > { %s1437_s15 = smov (!%p171_p9, %s917_s15), 7  ;;  %s190_s19 = sadd.s32 %s971_s16, %s970_s17 }
  0x15   : > { %s918_s21 = sshll.u32 %s1437_s15, 3  ;;  %s921_s22 = sshll.u32 %s190_s19, 2 }
  0x16   : > { %s175_s23 = sadd.s32 %s919_s18, %s918_s21  ;;  %s1109_s26 = scalar_lea.vmem %s1416_s1, %s921_s22 }
  0x17   : > { %s920_s27 = sshll.u32 %s175_s23, 3  ;;  %194 = vst [vmem:[%s1109_s26] sm:$0x7] %v1054_v0  ;;  %195 = vst [vmem:[%s1109_s26 + $0x4] sm:$0x7] %v1054_v0  ;;  %205 = sbr.rel (%p1102_p11) target bundleno = 128 (0x80), region = 28 }
  0x18   : > { %196 = vst [vmem:[%s1109_s26 + $0x8] sm:$0x7] %v1054_v0  ;;  %197 = vst [vmem:[%s1109_s26 + $0xc] sm:$0x7] %v1054_v0  ;;  %s177_s30 = scalar_lea.vmem %s1415_s0, %s920_s27 }
  0x19   : > { %198 = vst [vmem:[%s1109_s26 + $0x10] sm:$0x7] %v1054_v0  ;;  %199 = vst [vmem:[%s1109_s26 + $0x14] sm:$0x7] %v1054_v0 }
  0x1c   : > { %v206_v1 = vld [vmem:[%s177_s30] sm:$0xff]  ;;  %v207_v2 = vld [vmem:[%s177_s30 + $0x8] sm:$0xff]  ;;  %v208_v3 = vld [vmem:[%s177_s30 + $0x10] sm:$0xff]  ;;  %v242_v4 = vlaneseq  ;;  %v1055_v8 = vmov 1983009808   ;;  %vm406_vm0 = vcmask 25600  }
  0x1d   : > { %v209_v5 = vld [vmem:[%s177_s30 + $0x18] sm:$0xff]  ;;  %v210_v6 = vld [vmem:[%s177_s30 + $0x20] sm:$0xff]  ;;  %v211_v7 = vld [vmem:[%s177_s30 + $0x28] sm:$0xff]  ;;  %v240_v9 = vunpack.c.l.s4 %v1055_v8  ;;  %vm631_vm1 = vcmask 31744   ;;  %vm760_vm2 = vcmask 1042434   ;;  %vm762_vm3 = vcmask 1043459  }
  0x1e   : > { %v212_v10 = vld [vmem:[%s177_s30 + $0x30] sm:$0xff]  ;;  %v213_v11 = vld [vmem:[%s177_s30 + $0x38] sm:$0xff]  ;;  %v214_v12 = vld [vmem:[%s177_s30 + $0x40] sm:$0xff]  ;;  %v243_v13 = vshrl.u32 %v242_v4, 7  ;;  %vm784_vm4 = vcmask 26624   ;;  %vm764_vm6 = vcmask 1044484  }
  0x1f   : > { %v215_v14 = vld [vmem:[%s177_s30 + $0x48] sm:$0xff]  ;;  %v216_v15 = vld [vmem:[%s177_s30 + $0x50] sm:$0xff]  ;;  %v217_v16 = vld [vmem:[%s177_s30 + $0x58] sm:$0xff]  ;;  %v222_v17 = vmax.f32 %v206_v1, %v214_v12  ;;  %v241_v18 = vunpack.c.0.s8 %v240_v9  ;;  %vm785_vm5 = vsmask.f32 2306 }
  0x20   : > { %v218_v19 = vld [vmem:[%s177_s30 + $0x60] sm:$0xff]  ;;  %v219_v20 = vld [vmem:[%s177_s30 + $0x68] sm:$0xff]  ;;  %v220_v21 = vld [vmem:[%s177_s30 + $0x70] sm:$0xff]  ;;  %v223_v22 = vmax.f32 %v207_v2, %v215_v14  ;;  %v224_v23 = vmax.f32 %v208_v3, %v216_v15  ;;  %v225_v24 = vmax.f32 %v209_v5, %v217_v16 }
  0x21   : > { %v221_v25 = vld [vmem:[%s177_s30 + $0x78] sm:$0xff]  ;;  %v226_v26 = vmax.f32 %v210_v6, %v218_v19  ;;  %v227_v27 = vmax.f32 %v211_v7, %v219_v20  ;;  %v228_v28 = vmax.f32 %v212_v10, %v220_v21  ;;  %v238_v29 = vcombine.high %v222_v17, %v222_v17  ;;  %vm1375_vm7 = vmand %vm784_vm4, %vm785_vm5 }
  0x22   : > { %v229_v30 = vmax.f32 %v213_v11, %v221_v25  ;;  %v244_v31 = vsub.s32 %v241_v18, %v243_v13  ;;  %v255_v32 = vcombine.high %v223_v22, %v223_v22  ;;  %v272_v33 = vcombine.high %v224_v23, %v224_v23 }
  0x23   : > { %v289_v34 = vcombine.high %v225_v24, %v225_v24  ;;  %v306_v35 = vcombine.high %v226_v26, %v226_v26  ;;  %v323_v36 = vcombine.high %v227_v27, %v227_v27  ;;  %v340_v37 = vcombine.high %v228_v28, %v228_v28 }
  0x24   : > { %v245_v38 = vrot.slane %v222_v17, %v244_v31  ;;  %v252_v39 = vrot.slane %v238_v29, %v244_v31  ;;  %v262_v40 = vrot.slane %v223_v22, %v244_v31  ;;  %v269_v41 = vrot.slane %v255_v32, %v244_v31 }
  0x25   : > { %v1122_v42 = vrot.slane %v224_v23, %v244_v31  ;;  %v1124_v43 = vrot.slane %v272_v33, %v244_v31  ;;  %v1126_v44 = vrot.slane %v225_v24, %v244_v31  ;;  %v1128_v45 = vrot.slane %v289_v34, %v244_v31 }
  0x26   : > { %v253_v46 = vcombine.high %v245_v38, %v245_v38  ;;  %v254_v47 = vcombine.high %v252_v39, %v252_v39  ;;  %v270_v48 = vcombine.high %v262_v40, %v262_v40  ;;  %v271_v49 = vcombine.high %v269_v41, %v269_v41 }
  0x27   : > { %v287_v50 = vcombine.high %v1122_v42, %v1122_v42  ;;  %v288_v51 = vcombine.high %v1124_v43, %v1124_v43  ;;  %v304_v52 = vcombine.high %v1126_v44, %v1126_v44  ;;  %v305_v53 = vcombine.high %v1128_v45, %v1128_v45 }
  0x28   : > { %v1138_v54 = vrot.slane %v226_v26, %v244_v31  ;;  %v1140_v55 = vrot.slane %v306_v35, %v244_v31  ;;  %v1142_v56 = vrot.slane %v227_v27, %v244_v31  ;;  %v1144_v57 = vrot.slane %v323_v36, %v244_v31 }
  0x29   : > { %v1146_v58 = vrot.slane %v228_v28, %v244_v31  ;;  %v1148_v59 = vrot.slane %v340_v37, %v244_v31  ;;  %v357_v60 = vcombine.high %v229_v30, %v229_v30  ;;  %v1150_v61 = vrot.slane %v229_v30, %v244_v31 }
  0x2a   : > { %v321_v62 = vcombine.high %v1138_v54, %v1138_v54  ;;  %v322_v63 = vcombine.high %v1140_v55, %v1140_v55  ;;  %v338_v0 = vcombine.high %v1142_v56, %v1142_v56  ;;  %v339_v1 = vcombine.high %v1144_v57, %v1144_v57 }
  0x2b   : > { %v355_v2 = vcombine.high %v1146_v58, %v1146_v58  ;;  %v356_v3 = vcombine.high %v1148_v59, %v1148_v59  ;;  %v1164_v4 = vrot.slane %v357_v60, %v244_v31  ;;  %v372_v5 = vcombine.high %v1150_v61, %v1150_v61 }
  0x2c   : > { %v407_v6 = vsel %vm406_vm0, %v245_v38, -inf  ;;  %v414_v7 = vsel %vm406_vm0, %v253_v46, -inf  ;;  %v421_v8 = vsel %vm406_vm0, %v252_v39, -inf  ;;  %v428_v9 = vsel %vm406_vm0, %v254_v47, -inf }
  0x2d   : > { %v373_v10 = vcombine.high %v1164_v4, %v1164_v4  ;;  %v408_v11 = vrot.slane %v407_v6, 4  ;;  %v415_v12 = vrot.slane %v414_v7, 4  ;;  %v422_v13 = vrot.slane %v421_v8, 4 }
  0x2e   : > { %v429_v14 = vrot.slane %v428_v9, 4  ;;  %v435_v15 = vsel %vm406_vm0, %v262_v40, -inf  ;;  %v442_v16 = vsel %vm406_vm0, %v270_v48, -inf  ;;  %v449_v17 = vsel %vm406_vm0, %v269_v41, -inf }
  0x2f   : > { %v409_v18 = vmax.f32 %v407_v6, %v408_v11  ;;  %v416_v19 = vmax.f32 %v414_v7, %v415_v12  ;;  %v423_v20 = vmax.f32 %v421_v8, %v422_v13  ;;  %v436_v21 = vrot.slane %v435_v15, 4 }
  0x30   : > { %v430_v22 = vmax.f32 %v428_v9, %v429_v14  ;;  %v443_v23 = vrot.slane %v442_v16, 4  ;;  %v450_v24 = vrot.slane %v449_v17, 4  ;;  %v456_v25 = vsel %vm406_vm0, %v271_v49, -inf }
  0x31   : > { %v410_v26 = vrot.slane %v409_v18, 2  ;;  %v417_v27 = vrot.slane %v416_v19, 2  ;;  %v424_v28 = vrot.slane %v423_v20, 2  ;;  %v437_v29 = vmax.f32 %v435_v15, %v436_v21 }
  0x32   : > { %v431_v30 = vrot.slane %v430_v22, 2  ;;  %v444_v31 = vmax.f32 %v442_v16, %v443_v23  ;;  %v451_v32 = vmax.f32 %v449_v17, %v450_v24  ;;  %v457_v33 = vrot.slane %v456_v25, 4 }
  0x33   : > { %v411_v34 = vmax.f32 %v409_v18, %v410_v26  ;;  %v418_v35 = vmax.f32 %v416_v19, %v417_v27  ;;  %v425_v36 = vmax.f32 %v423_v20, %v424_v28  ;;  %v438_v37 = vrot.slane %v437_v29, 2 }
  0x34   : > { %v432_v38 = vmax.f32 %v430_v22, %v431_v30  ;;  %v445_v39 = vrot.slane %v444_v31, 2  ;;  %v452_v40 = vrot.slane %v451_v32, 2  ;;  %v458_v41 = vmax.f32 %v456_v25, %v457_v33 }
  0x35   : > { %v412_v46 = vrot.slane %v411_v34, 1  ;;  %v419_v47 = vrot.slane %v418_v35, 1  ;;  %v426_v48 = vrot.slane %v425_v36, 1  ;;  %v439_v49 = vmax.f32 %v437_v29, %v438_v37 }
  0x36   : > { %v433_v60 = vrot.slane %v432_v38, 1  ;;  %v446_v6 = vmax.f32 %v444_v31, %v445_v39  ;;  %v453_v7 = vmax.f32 %v451_v32, %v452_v40  ;;  %v459_v8 = vrot.slane %v458_v41, 2 }
  0x37   : > { %v1178_v9 = vmax.f32 %v411_v34, %v412_v46  ;;  %v1180_v11 = vmax.f32 %v418_v35, %v419_v47  ;;  %v1182_v12 = vmax.f32 %v425_v36, %v426_v48  ;;  %v440_v13 = vrot.slane %v439_v49, 1 }
  0x38   : > { %v1184_v14 = vmax.f32 %v432_v38, %v433_v60  ;;  %v447_v15 = vrot.slane %v446_v6, 1  ;;  %v454_v16 = vrot.slane %v453_v7, 1  ;;  %v460_v17 = vmax.f32 %v458_v41, %v459_v8 }
  0x39   : > { %v1186_v18 = vmax.f32 %v439_v49, %v440_v13  ;;  %v463_v19 = vsel %vm406_vm0, %v1122_v42, -inf  ;;  %v470_v20 = vsel %vm406_vm0, %v287_v50, -inf  ;;  %v477_v21 = vsel %vm406_vm0, %v1124_v43, -inf }
  0x3a   : > { %v1196_v22 = vmax.f32 %v446_v6, %v447_v15  ;;  %v1198_v23 = vmax.f32 %v453_v7, %v454_v16  ;;  %v461_v24 = vrot.slane %v460_v17, 1  ;;  %v464_v25 = vrot.slane %v463_v19, 4 }
  0x3b   : > { %v471_v26 = vrot.slane %v470_v20, 4  ;;  %v478_v27 = vrot.slane %v477_v21, 4  ;;  %v484_v28 = vsel %vm406_vm0, %v288_v51, -inf  ;;  %v491_v42 = vsel %vm406_vm0, %v1126_v44, -inf }
  0x3c   : > { %v1206_v50 = vmax.f32 %v460_v17, %v461_v24  ;;  %v465_v29 = vmax.f32 %v463_v19, %v464_v25  ;;  %v485_v30 = vrot.slane %v484_v28, 4  ;;  %v492_v31 = vrot.slane %v491_v42, 4 }
  0x3d   : > { %v472_v32 = vmax.f32 %v470_v20, %v471_v26  ;;  %v479_v33 = vmax.f32 %v477_v21, %v478_v27  ;;  %v498_v34 = vsel %vm406_vm0, %v304_v52, -inf  ;;  %v505_v43 = vsel %vm406_vm0, %v1128_v45, -inf }
  0x3e   : > { %v466_v35 = vrot.slane %v465_v29, 2  ;;  %v486_v51 = vmax.f32 %v484_v28, %v485_v30  ;;  %v493_v36 = vmax.f32 %v491_v42, %v492_v31  ;;  %v499_v37 = vrot.slane %v498_v34, 4 }
  0x3f   : > { %v473_v38 = vrot.slane %v472_v32, 2  ;;  %v480_v39 = vrot.slane %v479_v33, 2  ;;  %v506_v40 = vrot.slane %v505_v43, 4  ;;  %v512_v41 = vsel %vm406_vm0, %v305_v53, -inf }
  0x40   : > { %v467_v46 = vmax.f32 %v465_v29, %v466_v35  ;;  %v487_v47 = vrot.slane %v486_v51, 2  ;;  %v494_v44 = vrot.slane %v493_v36, 2  ;;  %v500_v48 = vmax.f32 %v498_v34, %v499_v37 }
  0x41   : > { %v474_v52 = vmax.f32 %v472_v32, %v473_v38  ;;  %v481_v49 = vmax.f32 %v479_v33, %v480_v39  ;;  %v507_v60 = vmax.f32 %v505_v43, %v506_v40  ;;  %v513_v6 = vrot.slane %v512_v41, 4 }
  0x42   : > { %v468_v7 = vrot.slane %v467_v46, 1  ;;  %v488_v8 = vmax.f32 %v486_v51, %v487_v47  ;;  %v495_v13 = vmax.f32 %v493_v36, %v494_v44  ;;  %v501_v15 = vrot.slane %v500_v48, 2 }
  0x43   : > { %v475_v16 = vrot.slane %v474_v52, 1  ;;  %v482_v17 = vrot.slane %v481_v49, 1  ;;  %v508_v19 = vrot.slane %v507_v60, 2  ;;  %v514_v20 = vmax.f32 %v512_v41, %v513_v6 }
  0x44   : > { %v1218_v21 = vmax.f32 %v467_v46, %v468_v7  ;;  %v489_v45 = vrot.slane %v488_v8, 1  ;;  %v496_v53 = vrot.slane %v495_v13, 1  ;;  %v502_v24 = vmax.f32 %v500_v48, %v501_v15 }
  0x45   : > { %v1220_v25 = vmax.f32 %v474_v52, %v475_v16  ;;  %v1222_v26 = vmax.f32 %v481_v49, %v482_v17  ;;  %v509_v27 = vmax.f32 %v507_v60, %v508_v19  ;;  %v515_v28 = vrot.slane %v514_v20, 2 }
  0x46   : > { %v1224_v42 = vmax.f32 %v488_v8, %v489_v45  ;;  %v1226_v29 = vmax.f32 %v495_v13, %v496_v53  ;;  %v503_v30 = vrot.slane %v502_v24, 1  ;;  %v519_v31 = vsel %vm406_vm0, %v1138_v54, -inf }
  0x47   : > { %v510_v32 = vrot.slane %v509_v27, 1  ;;  %v516_v33 = vmax.f32 %v514_v20, %v515_v28  ;;  %v520_v34 = vrot.slane %v519_v31, 4  ;;  %v526_v43 = vsel %vm406_vm0, %v321_v62, -inf }
  0x48   : > { %v1234_v35 = vmax.f32 %v502_v24, %v503_v30  ;;  %v527_v51 = vrot.slane %v526_v43, 4  ;;  %v533_v36 = vsel %vm406_vm0, %v1140_v55, -inf  ;;  %v540_v37 = vsel %vm406_vm0, %v322_v63, -inf }
  0x49   : > { %v1242_v38 = vmax.f32 %v509_v27, %v510_v32  ;;  %v517_v39 = vrot.slane %v516_v33, 1  ;;  %v521_v40 = vmax.f32 %v519_v31, %v520_v34  ;;  %v534_v41 = vrot.slane %v533_v36, 4 }
  0x4a   : > { %v528_v46 = vmax.f32 %v526_v43, %v527_v51  ;;  %v541_v54 = vrot.slane %v540_v37, 4  ;;  %v547_v62 = vsel %vm406_vm0, %v1142_v56, -inf  ;;  %v554_v47 = vsel %vm406_vm0, %v338_v0, -inf }
  0x4b   : > { %v1250_v44 = vmax.f32 %v516_v33, %v517_v39  ;;  %v522_v55 = vrot.slane %v521_v40, 2  ;;  %v535_v48 = vmax.f32 %v533_v36, %v534_v41  ;;  %v548_v63 = vrot.slane %v547_v62, 4 }
  0x4c   : > { %v529_v52 = vrot.slane %v528_v46, 2  ;;  %v542_v49 = vmax.f32 %v540_v37, %v541_v54  ;;  %v555_v60 = vrot.slane %v554_v47, 4  ;;  %v561_v6 = vsel %vm406_vm0, %v1144_v57, -inf }
  0x4d   : > { %v523_v7 = vmax.f32 %v521_v40, %v522_v55  ;;  %v536_v8 = vrot.slane %v535_v48, 2  ;;  %v549_v13 = vmax.f32 %v547_v62, %v548_v63  ;;  %v562_v15 = vrot.slane %v561_v6, 4 }
  0x4e   : > { %v530_v16 = vmax.f32 %v528_v46, %v529_v52  ;;  %v543_v17 = vrot.slane %v542_v49, 2  ;;  %v556_v56 = vmax.f32 %v554_v47, %v555_v60  ;;  %v568_v0 = vsel %vm406_vm0, %v339_v1, -inf }
  0x4f   : > { %v524_v19 = vrot.slane %v523_v7, 1  ;;  %v537_v20 = vmax.f32 %v535_v48, %v536_v8  ;;  %v550_v45 = vrot.slane %v549_v13, 2  ;;  %v563_v53 = vmax.f32 %v561_v6, %v562_v15 }
  0x50   : > { %v531_v24 = vrot.slane %v530_v16, 1  ;;  %v544_v27 = vmax.f32 %v542_v49, %v543_v17  ;;  %v557_v28 = vrot.slane %v556_v56, 2  ;;  %v569_v30 = vrot.slane %v568_v0, 4 }
  0x51   : > { %v1258_v31 = vmax.f32 %v523_v7, %v524_v19  ;;  %v538_v32 = vrot.slane %v537_v20, 1  ;;  %v551_v33 = vmax.f32 %v549_v13, %v550_v45  ;;  %v564_v34 = vrot.slane %v563_v53, 2 }
  0x52   : > { %v1260_v43 = vmax.f32 %v530_v16, %v531_v24  ;;  %v545_v51 = vrot.slane %v544_v27, 1  ;;  %v558_v36 = vmax.f32 %v556_v56, %v557_v28  ;;  %v570_v57 = vmax.f32 %v568_v0, %v569_v30 }
  0x53   : > { %v1262_v37 = vmax.f32 %v537_v20, %v538_v32  ;;  %v552_v1 = vrot.slane %v551_v33, 1  ;;  %v565_v39 = vmax.f32 %v563_v53, %v564_v34  ;;  %v575_v40 = vsel %vm406_vm0, %v1146_v58, -inf }
  0x54   : > { %v1266_v41 = vmax.f32 %v544_v27, %v545_v51  ;;  %v559_v46 = vrot.slane %v558_v36, 1  ;;  %v571_v54 = vrot.slane %v570_v57, 2  ;;  %v576_v62 = vrot.slane %v575_v40, 4 }
  0x55   : > { %v1268_v47 = vmax.f32 %v551_v33, %v552_v1  ;;  %v566_v55 = vrot.slane %v565_v39, 1  ;;  %v582_v48 = vsel %vm406_vm0, %v355_v2, -inf  ;;  %v589_v63 = vsel %vm406_vm0, %v1148_v59, -inf }
  0x56   : > { %v1276_v52 = vmax.f32 %v558_v36, %v559_v46  ;;  %v572_v49 = vmax.f32 %v570_v57, %v571_v54  ;;  %v577_v60 = vmax.f32 %v575_v40, %v576_v62  ;;  %v583_v6 = vrot.slane %v582_v48, 4 }
  0x57   : > { %v1278_v7 = vmax.f32 %v565_v39, %v566_v55  ;;  %v590_v8 = vrot.slane %v589_v63, 4  ;;  %v596_v13 = vsel %vm406_vm0, %v356_v3, -inf  ;;  %v603_v58 = vsel %vm406_vm0, %v1150_v61, -inf }
  0x58   : > { %v573_v2 = vrot.slane %v572_v49, 1  ;;  %v578_v15 = vrot.slane %v577_v60, 2  ;;  %v584_v16 = vmax.f32 %v582_v48, %v583_v6  ;;  %v597_v17 = vrot.slane %v596_v13, 4 }
  0x59   : > { %v591_v56 = vmax.f32 %v589_v63, %v590_v8  ;;  %v604_v0 = vrot.slane %v603_v58, 4  ;;  %v610_v19 = vsel %vm406_vm0, %v372_v5, -inf  ;;  %v617_v20 = vsel %vm406_vm0, %v1164_v4, -inf }
  0x5a   : > { %v1292_v59 = vmax.f32 %v572_v49, %v573_v2  ;;  %v579_v3 = vmax.f32 %v577_v60, %v578_v15  ;;  %v585_v45 = vrot.slane %v584_v16, 2  ;;  %v598_v53 = vmax.f32 %v596_v13, %v597_v17 }
  0x5b   : > { %v592_v24 = vrot.slane %v591_v56, 2  ;;  %v605_v27 = vmax.f32 %v603_v58, %v604_v0  ;;  %v611_v28 = vrot.slane %v610_v19, 4  ;;  %v618_v30 = vrot.slane %v617_v20, 4 }
  0x5c   : > { %v580_v32 = vrot.slane %v579_v3, 1  ;;  %v586_v33 = vmax.f32 %v584_v16, %v585_v45  ;;  %v599_v34 = vrot.slane %v598_v53, 2  ;;  %v624_v61 = vsel %vm406_vm0, %v373_v10, -inf }
  0x5d   : > { %v593_v5 = vmax.f32 %v591_v56, %v592_v24  ;;  %v606_v51 = vrot.slane %v605_v27, 2  ;;  %v612_v36 = vmax.f32 %v610_v19, %v611_v28  ;;  %v619_v57 = vmax.f32 %v617_v20, %v618_v30 }
  0x5e   : > { %v581_v1 = vmax.f32 %v579_v3, %v580_v32  ;;  %v587_v39 = vrot.slane %v586_v33, 1  ;;  %v600_v40 = vmax.f32 %v598_v53, %v599_v34  ;;  %v625_v46 = vrot.slane %v624_v61, 4 }
  0x5f   : > { %v594_v54 = vrot.slane %v593_v5, 1  ;;  %v607_v62 = vmax.f32 %v605_v27, %v606_v51  ;;  %v613_v55 = vrot.slane %v612_v36, 2  ;;  %v620_v48 = vrot.slane %v619_v57, 2 }
  0x60   : > { %v588_v63 = vmax.f32 %v586_v33, %v587_v39  ;;  %v601_v49 = vrot.slane %v600_v40, 1  ;;  %v626_v60 = vmax.f32 %v624_v61, %v625_v46  ;;  %v632_v4 = vsel %vm631_vm1, %v1178_v9, -inf }
  0x61   : > { %v595_v6 = vmax.f32 %v593_v5, %v594_v54  ;;  %v608_v10 = vrot.slane %v607_v62, 1  ;;  %v614_v8 = vmax.f32 %v612_v36, %v613_v55  ;;  %v621_v13 = vmax.f32 %v619_v57, %v620_v48 }
  0x62   : > { %v602_v58 = vmax.f32 %v600_v40, %v601_v49  ;;  %v627_v2 = vrot.slane %v626_v60, 2  ;;  %v633_v15 = vsel %vm631_vm1, %v1186_v18, -inf  ;;  %v635_v16 = vsel %vm631_vm1, %v1180_v11, -inf }
  0x63   : > { %v609_v17 = vmax.f32 %v607_v62, %v608_v10  ;;  %v615_v56 = vrot.slane %v614_v8, 1  ;;  %v622_v0 = vrot.slane %v621_v13, 1  ;;  %v1304_v19 = vmax.f32 %v632_v4, %v633_v15 }
  0x64   : > { %v628_v20 = vmax.f32 %v626_v60, %v627_v2  ;;  %v636_v9 = vsel %vm631_vm1, %v1196_v22, -inf  ;;  %v638_v3 = vsel %vm631_vm1, %v1182_v12, -inf  ;;  %v639_v45 = vsel %vm631_vm1, %v1198_v23, -inf }
  0x65   : > { %v616_v53 = vmax.f32 %v614_v8, %v615_v56  ;;  %v623_v18 = vmax.f32 %v621_v13, %v622_v0  ;;  %v1312_v24 = vmax.f32 %v635_v16, %v636_v9  ;;  %v1314_v11 = vmax.f32 %v638_v3, %v639_v45 }
  0x66   : > { %v629_v27 = vrot.slane %v628_v20, 1  ;;  %v641_v28 = vsel %vm631_vm1, %v1184_v14, -inf  ;;  %v642_v30 = vsel %vm631_vm1, %v1206_v50, -inf  ;;  %v644_v22 = vsel %vm631_vm1, %v1218_v21, -inf }
  0x67   : > { %v643_v12 = vmax.f32 %v641_v28, %v642_v30  ;;  %v645_v23 = vsel %vm631_vm1, %v1226_v29, -inf  ;;  %v647_v32 = vsel %vm631_vm1, %v1220_v25, -inf  ;;  %v648_v33 = vsel %vm631_vm1, %v1234_v35, -inf }
  0x68   : > { %v630_v34 = vmax.f32 %v628_v20, %v629_v27  ;;  %v646_v61 = vmax.f32 %v644_v22, %v645_v23  ;;  %v649_v5 = vmax.f32 %v647_v32, %v648_v33  ;;  %v650_v14 = vsel %vm631_vm1, %v1222_v26, -inf }
  0x69   : > { %v651_v50 = vsel %vm631_vm1, %v1242_v38, -inf  ;;  %v653_v21 = vsel %vm631_vm1, %v1224_v42, -inf  ;;  %v654_v29 = vsel %vm631_vm1, %v1250_v44, -inf  ;;  %v656_v25 = vsel %vm631_vm1, %v1258_v31, -inf }
  0x6a   : > { %v652_v51 = vmax.f32 %v650_v14, %v651_v50  ;;  %v655_v35 = vmax.f32 %v653_v21, %v654_v29  ;;  %v657_v36 = vsel %vm631_vm1, %v1268_v47, -inf  ;;  %v659_v26 = vsel %vm631_vm1, %v1260_v43, -inf }
  0x6b   : > { %v658_v57 = vmax.f32 %v656_v25, %v657_v36  ;;  %v660_v38 = vsel %vm631_vm1, %v1276_v52, -inf  ;;  %v662_v42 = vsel %vm631_vm1, %v1262_v37, -inf  ;;  %v663_v44 = vsel %vm631_vm1, %v1278_v7, -inf }
  0x6c   : > { %v661_v39 = vmax.f32 %v659_v26, %v660_v38  ;;  %v664_v31 = vmax.f32 %v662_v42, %v663_v44  ;;  %v665_v40 = vsel %vm631_vm1, %v1266_v41, -inf  ;;  %v666_v47 = vsel %vm631_vm1, %v1292_v59, -inf  ;;  %v938_v38 = vld [vmem:[%s1109_s26 + $0x4] sm:$0x7]  ;;  %v940_v42 = vld [vmem:[%s1109_s26 + $0x8] sm:$0x7] }
  0x6d   : > { %v667_v46 = vmax.f32 %v665_v40, %v666_v47  ;;  %v668_v43 = vsel %vm631_vm1, %v581_v1, -inf  ;;  %v669_v54 = vsel %vm631_vm1, %v609_v17, -inf  ;;  %v671_v52 = vsel %vm631_vm1, %v588_v63, -inf  ;;  %v942_v44 = vld [vmem:[%s1109_s26 + $0xc] sm:$0x7] }
  0x6e   : > { %v670_v37 = vmax.f32 %v668_v43, %v669_v54  ;;  %v672_v62 = vsel %vm631_vm1, %v616_v53, -inf  ;;  %v674_v7 = vsel %vm631_vm1, %v595_v6, -inf  ;;  %v675_v55 = vsel %vm631_vm1, %v623_v18, -inf }
  0x6f   : > { %v673_v41 = vmax.f32 %v671_v52, %v672_v62  ;;  %v676_v59 = vmax.f32 %v674_v7, %v675_v55  ;;  %v677_v48 = vsel %vm631_vm1, %v602_v58, -inf  ;;  %v678_v1 = vsel %vm631_vm1, %v630_v34, -inf }
  0x70   : > { %v679_v49 = vmax.f32 %v677_v48, %v678_v1  ;;  %v954_v63 = vpack.c.bf16 %v1304_v19, %v1304_v19  ;;  %v955_v60 = vpack.c.bf16 %v1312_v24, %v1312_v24  ;;  %v956_v4 = vpack.c.bf16 %v1314_v11, %v1314_v11 }
  0x71   : > { %v957_v6 = vpack.c.bf16 %v643_v12, %v643_v12  ;;  %v958_v10 = vpack.c.bf16 %v646_v61, %v646_v61  ;;  %v959_v8 = vpack.c.bf16 %v649_v5, %v649_v5  ;;  %v960_v13 = vpack.c.bf16 %v652_v51, %v652_v51 }
  0x72   : > { %v961_v2 = vpack.c.bf16 %v655_v35, %v655_v35  ;;  %v962_v15 = vpack.c.bf16 %v658_v57, %v658_v57  ;;  %v963_v58 = vpack.c.bf16 %v661_v39, %v661_v39  ;;  %v964_v16 = vpack.c.bf16 %v664_v31, %v664_v31 }
  0x73   : > { %v965_v17 = vpack.c.bf16 %v667_v46, %v667_v46  ;;  %v966_v56 = vpack.c.bf16 %v670_v37, %v670_v37  ;;  %v967_v0 = vpack.c.bf16 %v673_v41, %v673_v41  ;;  %v968_v20 = vpack.c.bf16 %v676_v59, %v676_v59  ;;  %v944_v46 = vld [vmem:[%s1109_s26 + $0x10] sm:$0x7] }
  0x74   : > { %v969_v9 = vpack.c.bf16 %v679_v49, %v679_v49  ;;  %v744_v19 = vunpack.c.l.b16 %v954_v63  ;;  %v745_v3 = vunpack.c.l.b16 %v955_v60  ;;  %v746_v45 = vunpack.c.l.b16 %v956_v4 }
  0x75   : > { %v747_v53 = vunpack.c.l.b16 %v957_v6  ;;  %v748_v18 = vunpack.c.l.b16 %v958_v10  ;;  %v749_v24 = vunpack.c.l.b16 %v959_v8  ;;  %v750_v11 = vunpack.c.l.b16 %v960_v13 }
  0x76   : > { %v751_v27 = vunpack.c.l.b16 %v961_v2  ;;  %v752_v28 = vunpack.c.l.b16 %v962_v15  ;;  %v753_v30 = vunpack.c.l.b16 %v963_v58  ;;  %v754_v22 = vunpack.c.l.b16 %v964_v16 }
  0x77   : > { %v755_v12 = vunpack.c.l.b16 %v965_v17  ;;  %v756_v23 = vunpack.c.l.b16 %v966_v56  ;;  %v757_v32 = vunpack.c.l.b16 %v967_v0  ;;  %v758_v33 = vunpack.c.l.b16 %v968_v20 }
  0x78   : > { %v759_v34 = vunpack.c.l.b16 %v969_v9  ;;  %v761_v61 = vsel %vm760_vm2, %v745_v3, %v744_v19  ;;  %v766_v5 = vsel %vm760_vm2, %v749_v24, %v748_v18  ;;  %v769_v14 = vsel %vm760_vm2, %v753_v30, %v752_v28 }
  0x79   : > { %v763_v50 = vsel %vm762_vm3, %v746_v45, %v761_v61  ;;  %v767_v21 = vsel %vm762_vm3, %v750_v11, %v766_v5  ;;  %v770_v29 = vsel %vm762_vm3, %v754_v22, %v769_v14  ;;  %v772_v25 = vsel %vm760_vm2, %v757_v32, %v756_v23 }
  0x7a   : > { %v765_v35 = vsel %vm764_vm6, %v747_v53, %v763_v50  ;;  %v768_v36 = vsel %vm764_vm6, %v751_v27, %v767_v21  ;;  %v771_v26 = vsel %vm764_vm6, %v755_v12, %v770_v29  ;;  %v773_v57 = vsel %vm762_vm3, %v758_v33, %v772_v25 }
  0x7b   : > { %v774_v39 = vsel %vm764_vm6, %v759_v34, %v773_v57  ;;  %v775_v31 = vpack.c.b16 %v765_v35, %v765_v35  ;;  %v776_v40 = vpack.c.b16 %v768_v36, %v768_v36  ;;  %v777_v47 = vpack.c.b16 %v771_v26, %v771_v26 }
  0x7c   : > { %v778_v43 = vpack.c.b16 %v774_v39, %v774_v39 }
  0x7d   : > { %v788_v54 = vsel %vm1375_vm7, %v775_v31, %v938_v38  ;;  %v791_v52 = vsel %vm1375_vm7, %v776_v40, %v940_v42  ;;  %v794_v37 = vsel %vm1375_vm7, %v777_v47, %v942_v44 }
  0x7e   : > { %939 = vst [vmem:[%s1109_s26 + $0x4] sm:$0x7] %v788_v54  ;;  %941 = vst [vmem:[%s1109_s26 + $0x8] sm:$0x7] %v791_v52  ;;  %v797_v62 = vsel %vm1375_vm7, %v778_v43, %v944_v46 }
  0x7f   : > { %943 = vst [vmem:[%s1109_s26 + $0xc] sm:$0x7] %v794_v37  ;;  %945 = vst [vmem:[%s1109_s26 + $0x10] sm:$0x7] %v797_v62 }
  0x80 PF: > { %s11_s10 = sadd.s32 1, %s1052_s10   ;;  %s1420_s6 = smov %s1044_s8 }
  0x81   : > { %p8_p12 = scmp.ge.s32.totalorder %s11_s10, 14   ;;  %s1421_s7 = smov %s1048_s9 }
  0x82   : > { %s1422_s8 = smov %s1425_s11  ;;  %s1423_s9 = smov %s1429_s12 }
  0x83   :  { %10 = sbr.rel (!%p8_p12) target bundleno = 3 (0x3), region = 59 }

// kernel: down_conv_forward.7
= control target key start
LH: loop header
LB: loop body
LE: loop exit
PB: predicated region body
PF: predicated region fallthrough
CT: control target
= control target key end

     0   :  { %s605_s12 = smov 0   ;;  %s607_s13 = smov 0   ;;  %s702_s0 = inlined_call_operand.vmem [shape: bf16[2,4,16,128], index: 0, kind: input, shape index: {}]   ;;  %s703_s1 = inlined_call_operand.vmem [shape: f32[1,128], index: 1, kind: input, shape index: {}]   ;;  %s704_s2 = inlined_call_operand.vmem [shape: f32[1,128], index: 2, kind: input, shape index: {}]   ;;  %s705_s3 = inlined_call_operand.vmem [shape: bf16[2,6,6,6,128], index: 3, kind: output, shape index: {}]  }
   0x1   :  { %s609_s14 = smov 0   ;;  %s611_s15 = smov 0  }
   0x2   :  { %s613_s16 = smov 0  }
   0x3 LB: > { %s22_s17 = sadd.s32 1, %s574_s14  ;;  %s25_s18 = sadd.s32 1, %s578_s15  ;;  %s582_s16 = sphi %s613_s16, %s13_s16   ;;  %s578_s15 = sphi %s611_s15, %s712_s15   ;;  %s574_s14 = sphi %s609_s14, %s711_s14   ;;  %s570_s13 = sphi %s607_s13, %s710_s13   ;;  %s566_s12 = sphi %s605_s12, %s709_s12  }
   0x4   : > { %p23_p0 = scmp.ge.s32.totalorder %s22_s17, 6  ;;  %p460_p1 = scmp.ge.s32.totalorder %s582_s16, 1 }
   0x5   : > { %p177_p2 = scmp.lt.s32.totalorder %s582_s16, 13 }
   0x6   : > { %s714_s17 = smov (%p23_p0, %s22_s17), 0  ;;  %s716_s18 = smov (!%p23_p0, %s25_s18), %s578_s15 }
   0x7   : > { %p178_p3 = pnand %p460_p1, %p177_p2  ;;  %p27_p4 = scmp.ge.s32.totalorder %s716_s18, 2 }
   0x8   : > { %s461_s19 = sadd.s32 (!%p178_p3), 4294967295, %s566_s12  ;;  %p219_p5 = scmp.lt.s32.totalorder (!%p178_p3), %s570_s13, 1 }
   0x9   : > { %s718_s18 = smov (%p27_p4, %s716_s18), 0  ;;  %181 = sbr.rel (%p178_p3) target bundleno = 50 (0x32), region = 32 }
   0xa   : > { %p215_p6 = scmp.gt.s32.totalorder (!%p178_p3), %s461_s19, 0  ;;  %p462_p7 = scmp.lt.s32.totalorder (!%p178_p3), %s461_s19, 3 }
   0xb   : > { %p235_p8 = scmp.lt.s32.totalorder (!%p178_p3), %s566_s12, 5  ;;  %p249_p10 = scmp.gt.s32.totalorder (!%p178_p3), %s566_s12, 0 }
   0xd   : > { %p641_p11 = pnand (!%p178_p3), %p249_p10, %p235_p8 }
   0xe   : > { %s720_s13 = smov (!%p219_p5, %s570_s13), 1  ;;  %s722_s19 = smov (!%p215_p6, %s461_s19), 0  ;;  %v584_v0 = vmov 0  }
   0xf   : > { %s468_s20 = sshll.u32 %s720_s13, 3  ;;  %s724_s19 = smov (!%p462_p7, %s722_s19), 3 }
  0x10   : > { %s236_s21 = scalar_select %p235_p8, %s566_s12, 5 }
  0x11   : > { %p221_p9 = scmp.lt.s32.totalorder %s724_s19, 3  ;;  %s502_s22 = smul.u32 36, %s720_s13 }
  0x12   : > { %s501_s23 = smul.u32 6, %s236_s21 }
  0x13   : > { %s726_s19 = smov (!%p221_p9, %s724_s19), 3 }
  0x14   : > { %s239_s24 = sadd.s32 %s502_s22, %s501_s23  ;;  %s467_s26 = sshll.u32 %s726_s19, 1 }
  0x15   : > { %s470_s27 = sshll.u32 %s239_s24, 2  ;;  %s225_s28 = sadd.s32 %s468_s20, %s467_s26 }
  0x16   : > { %s648_s4 = scalar_lea.vmem %s705_s3, %s470_s27  ;;  %s469_s5 = sshll.u32 %s225_s28, 2 }
  0x17   : > { %243 = vst [vmem:[%s648_s4] sm:$0x7] %v584_v0  ;;  %244 = vst [vmem:[%s648_s4 + $0x4] sm:$0x7] %v584_v0  ;;  %s227_s8 = scalar_lea.vmem %s702_s0, %s469_s5  ;;  %254 = sbr.rel (%p641_p11) target bundleno = 50 (0x32), region = 36 }
  0x18   : > { %245 = vst [vmem:[%s648_s4 + $0x8] sm:$0x7] %v584_v0  ;;  %246 = vst [vmem:[%s648_s4 + $0xc] sm:$0x7] %v584_v0 }
  0x19   : > { %247 = vst [vmem:[%s648_s4 + $0x10] sm:$0x7] %v584_v0  ;;  %248 = vst [vmem:[%s648_s4 + $0x14] sm:$0x7] %v584_v0 }
  0x1c   : > { %v498_v1 = vld [vmem:[%s227_s8] sm:$0xff]   ;;  %vm334_vm0 = vcmask 1042432   ;;  %vm335_vm1 = vsmask.f32 2306 }
  0x1d   : > { %v471_v2 = vld [vmem:[%s703_s1] ss:$0 sm:$0xff]  ;;  %v499_v3 = vunpack.c.l.bf16 %v498_v1  ;;  %v500_v4 = vunpack.c.h.bf16 %v498_v1  ;;  %vm667_vm2 = vmand %vm334_vm0, %vm335_vm1 }
  0x1e   : > { %v472_v5 = vld [vmem:[%s704_s2] ss:$0 sm:$0xff]  ;;  %v477_v27 = vld [vmem:[%s648_s4 + $0x4] sm:$0x7] }
  0x1f   : > { %v266_v6 = vmul.f32 %v499_v3, %v471_v2  ;;  %v267_v7 = vmul.f32 %v500_v4, %v471_v2  ;;  %v481_v28 = vld [vmem:[%s648_s4 + $0xc] sm:$0x7]  ;;  %v479_v34 = vld [vmem:[%s648_s4 + $0x8] sm:$0x7] }
  0x20   : > { %v483_v39 = vld [vmem:[%s648_s4 + $0x10] sm:$0x7] }
  0x21   : > { %v275_v8 = vadd.f32 %v472_v5, %v266_v6  ;;  %v276_v9 = vadd.f32 %v472_v5, %v267_v7 }
  0x23   : > { %v277_v10 = vmax.f32 %v275_v8, 0.0  ;;  %v278_v11 = vmax.f32 %v276_v9, 0.0 }
  0x25   : > { %v493_v12 = vpack.c.bf16 %v277_v10, %v277_v10  ;;  %v281_v13 = vcombine.high %v277_v10, %v277_v10  ;;  %v495_v14 = vpack.c.bf16 %v278_v11, %v278_v11  ;;  %v282_v15 = vcombine.high %v278_v11, %v278_v11 }
  0x27   : > { %v302_v16 = vshrl.u32 %v493_v12, 16  ;;  %v305_v17 = vshll.u32 %v493_v12, 16  ;;  %v494_v18 = vpack.c.bf16 %v281_v13, %v281_v13  ;;  %v316_v19 = vshrl.u32 %v495_v14, 16 }
  0x28   : > { %v319_v20 = vshll.u32 %v495_v14, 16  ;;  %v496_v21 = vpack.c.bf16 %v282_v15, %v282_v15 }
  0x29   : > { %v304_v22 = vrot.slane %v302_v16, 7  ;;  %v309_v23 = vshrl.u32 %v494_v18, 16  ;;  %v312_v24 = vshll.u32 %v494_v18, 16  ;;  %v318_v25 = vrot.slane %v316_v19, 7 }
  0x2a   : > { %v323_v29 = vshrl.u32 %v496_v21, 16  ;;  %v326_v30 = vshll.u32 %v496_v21, 16 }
  0x2b   : > { %v307_v31 = vor.u32 %v305_v17, %v304_v22  ;;  %v311_v32 = vrot.slane %v309_v23, 7  ;;  %v321_v33 = vor.u32 %v319_v20, %v318_v25 }
  0x2c   : > { %v325_v35 = vrot.slane %v323_v29, 7 }
  0x2d   : > { %v338_v36 = vsel %vm667_vm2, %v307_v31, %v477_v27  ;;  %v314_v37 = vor.u32 %v312_v24, %v311_v32  ;;  %v344_v38 = vsel %vm667_vm2, %v321_v33, %v481_v28 }
  0x2e   : > { %478 = vst [vmem:[%s648_s4 + $0x4] sm:$0x7] %v338_v36  ;;  %482 = vst [vmem:[%s648_s4 + $0xc] sm:$0x7] %v344_v38  ;;  %v328_v40 = vor.u32 %v326_v30, %v325_v35 }
  0x2f   : > { %v341_v41 = vsel %vm667_vm2, %v314_v37, %v479_v34 }
  0x30   : > { %480 = vst [vmem:[%s648_s4 + $0x8] sm:$0x7] %v341_v41  ;;  %v347_v42 = vsel %vm667_vm2, %v328_v40, %v483_v39 }
  0x31   : > { %484 = vst [vmem:[%s648_s4 + $0x10] sm:$0x7] %v347_v42 }
  0x32 PF: > { %s13_s16 = sadd.s32 1, %s582_s16   ;;  %s709_s12 = smov %s574_s14 }
  0x33   : > { %p10_p12 = scmp.ge.s32.totalorder %s13_s16, 14   ;;  %s710_s13 = smov %s578_s15 }
  0x34   : > { %s711_s14 = smov %s714_s17  ;;  %s712_s15 = smov %s718_s18 }
  0x35   :  { %12 = sbr.rel (!%p10_p12) target bundleno = 3 (0x3), region = 67 }

// kernel: down_conv_forward.9
= control target key start
LH: loop header
LB: loop body
LE: loop exit
PB: predicated region body
PF: predicated region fallthrough
CT: control target
= control target key end

     0   :  { %s303_s0 = inlined_call_operand.vmem [shape: bf16[128,128], index: 0, kind: input, shape index: {}]   ;;  %s304_s1 = inlined_call_operand.vmem [shape: f32[1,128], index: 1, kind: input, shape index: {}]   ;;  %s305_s2 = inlined_call_operand.vmem [shape: f32[1,128], index: 2, kind: input, shape index: {}]   ;;  %s306_s3 = inlined_call_operand.vmem [shape: f32[128,128], index: 3, kind: output, shape index: {}]  }
   0x1   :  { %v131_v0 = vld [vmem:[%s303_s0] sm:$0xff]   ;;  %v162_v4 = vld [vmem:[%s303_s0 + $0x8] sm:$0xff]   ;;  %v163_v5 = vld [vmem:[%s303_s0 + $0x10] sm:$0xff]  }
   0x2   :  { %v195_v1 = vld [vmem:[%s304_s1] ss:$0 sm:$0xff]  ;;  %v132_v2 = vunpack.c.l.bf16 %v131_v0  ;;  %v133_v3 = vunpack.c.h.bf16 %v131_v0  ;;  %v164_v6 = vld [vmem:[%s303_s0 + $0x18] sm:$0xff]   ;;  %v136_v8 = vunpack.c.l.bf16 %v162_v4  ;;  %v137_v9 = vunpack.c.h.bf16 %v162_v4  ;;  %v166_v33 = vld [vmem:[%s303_s0 + $0x28] sm:$0xff]  }
   0x3   :  { %v209_v7 = vld [vmem:[%s305_s2] ss:$0 sm:$0xff]  ;;  %v140_v10 = vunpack.c.l.bf16 %v163_v5  ;;  %v141_v11 = vunpack.c.h.bf16 %v163_v5  ;;  %v144_v14 = vunpack.c.l.bf16 %v164_v6  ;;  %v145_v15 = vunpack.c.h.bf16 %v164_v6  ;;  %v167_v34 = vld [vmem:[%s303_s0 + $0x30] sm:$0xff]   ;;  %v168_v39 = vld [vmem:[%s303_s0 + $0x38] sm:$0xff]  }
   0x4   :  { %v53_v12 = vmul.f32 %v132_v2, %v195_v1  ;;  %v54_v13 = vmul.f32 %v133_v3, %v195_v1  ;;  %v55_v16 = vmul.f32 %v136_v8, %v195_v1  ;;  %v56_v17 = vmul.f32 %v137_v9, %v195_v1  ;;  %v165_v28 = vld [vmem:[%s303_s0 + $0x20] sm:$0xff]  }
   0x5   :  { %v57_v18 = vmul.f32 %v140_v10, %v195_v1  ;;  %v58_v19 = vmul.f32 %v141_v11, %v195_v1  ;;  %v59_v22 = vmul.f32 %v144_v14, %v195_v1  ;;  %v60_v23 = vmul.f32 %v145_v15, %v195_v1 }
   0x6   :  { %v76_v20 = vadd.f32 %v209_v7, %v53_v12  ;;  %v77_v21 = vadd.f32 %v209_v7, %v54_v13  ;;  %v78_v24 = vadd.f32 %v209_v7, %v55_v16  ;;  %v79_v25 = vadd.f32 %v209_v7, %v56_v17 }
   0x7   :  { %v80_v26 = vadd.f32 %v209_v7, %v57_v18  ;;  %v81_v27 = vadd.f32 %v209_v7, %v58_v19  ;;  %v82_v31 = vadd.f32 %v209_v7, %v59_v22  ;;  %v83_v32 = vadd.f32 %v209_v7, %v60_v23 }
   0x8   :  { %v92_v29 = vmax.f32 %v76_v20, 0.0  ;;  %v93_v30 = vmax.f32 %v77_v21, 0.0  ;;  %v94_v35 = vmax.f32 %v78_v24, 0.0  ;;  %v95_v36 = vmax.f32 %v79_v25, 0.0 }
   0x9   :  { %v96_v37 = vmax.f32 %v80_v26, 0.0  ;;  %v97_v38 = vmax.f32 %v81_v27, 0.0  ;;  %v98_v40 = vmax.f32 %v82_v31, 0.0  ;;  %v99_v41 = vmax.f32 %v83_v32, 0.0 }
   0xa   :  { %108 = vst [vmem:[%s306_s3] sm:$0xff] %v92_v29  ;;  %109 = vst [vmem:[%s306_s3 + $0x8] sm:$0xff] %v93_v30  ;;  %v148_v42 = vunpack.c.l.bf16 %v165_v28  ;;  %v149_v43 = vunpack.c.h.bf16 %v165_v28  ;;  %v152_v44 = vunpack.c.l.bf16 %v166_v33  ;;  %v153_v45 = vunpack.c.h.bf16 %v166_v33 }
   0xb   :  { %110 = vst [vmem:[%s306_s3 + $0x10] sm:$0xff] %v94_v35  ;;  %111 = vst [vmem:[%s306_s3 + $0x18] sm:$0xff] %v95_v36  ;;  %v156_v46 = vunpack.c.l.bf16 %v167_v34  ;;  %v157_v47 = vunpack.c.h.bf16 %v167_v34  ;;  %v160_v50 = vunpack.c.l.bf16 %v168_v39  ;;  %v161_v51 = vunpack.c.h.bf16 %v168_v39 }
   0xc   :  { %112 = vst [vmem:[%s306_s3 + $0x20] sm:$0xff] %v96_v37  ;;  %113 = vst [vmem:[%s306_s3 + $0x28] sm:$0xff] %v97_v38  ;;  %v61_v48 = vmul.f32 %v148_v42, %v195_v1  ;;  %v62_v49 = vmul.f32 %v149_v43, %v195_v1  ;;  %v63_v52 = vmul.f32 %v152_v44, %v195_v1 }
   0xd   :  { %114 = vst [vmem:[%s306_s3 + $0x30] sm:$0xff] %v98_v40  ;;  %115 = vst [vmem:[%s306_s3 + $0x38] sm:$0xff] %v99_v41  ;;  %v64_v53 = vmul.f32 %v153_v45, %v195_v1  ;;  %v65_v54 = vmul.f32 %v156_v46, %v195_v1  ;;  %v66_v55 = vmul.f32 %v157_v47, %v195_v1 }
   0xe   :  { %v84_v56 = vadd.f32 %v209_v7, %v61_v48  ;;  %v85_v57 = vadd.f32 %v209_v7, %v62_v49  ;;  %v67_v58 = vmul.f32 %v160_v50, %v195_v1  ;;  %v68_v59 = vmul.f32 %v161_v51, %v195_v1 }
   0xf   :  { %v86_v60 = vadd.f32 %v209_v7, %v63_v52  ;;  %v87_v61 = vadd.f32 %v209_v7, %v64_v53  ;;  %v88_v62 = vadd.f32 %v209_v7, %v65_v54  ;;  %v89_v63 = vadd.f32 %v209_v7, %v66_v55 }
  0x10   :  { %v100_v0 = vmax.f32 %v84_v56, 0.0  ;;  %v101_v2 = vmax.f32 %v85_v57, 0.0  ;;  %v90_v3 = vadd.f32 %v209_v7, %v67_v58  ;;  %v91_v4 = vadd.f32 %v209_v7, %v68_v59 }
  0x11   :  { %v102_v5 = vmax.f32 %v86_v60, 0.0  ;;  %v103_v6 = vmax.f32 %v87_v61, 0.0  ;;  %v104_v8 = vmax.f32 %v88_v62, 0.0  ;;  %v105_v9 = vmax.f32 %v89_v63, 0.0 }
  0x12   :  { %116 = vst [vmem:[%s306_s3 + $0x40] sm:$0xff] %v100_v0  ;;  %117 = vst [vmem:[%s306_s3 + $0x48] sm:$0xff] %v101_v2  ;;  %v106_v1 = vmax.f32 %v90_v3, 0.0  ;;  %v107_v10 = vmax.f32 %v91_v4, 0.0 }
  0x13   :  { %118 = vst [vmem:[%s306_s3 + $0x50] sm:$0xff] %v102_v5  ;;  %119 = vst [vmem:[%s306_s3 + $0x58] sm:$0xff] %v103_v6 }
  0x14   :  { %120 = vst [vmem:[%s306_s3 + $0x60] sm:$0xff] %v104_v8  ;;  %121 = vst [vmem:[%s306_s3 + $0x68] sm:$0xff] %v105_v9 }
  0x15   :  { %122 = vst [vmem:[%s306_s3 + $0x70] sm:$0xff] %v106_v1  ;;  %123 = vst [vmem:[%s306_s3 + $0x78] sm:$0xff] %v107_v10 }

// kernel: down_conv_forward.6
= control target key start
LH: loop header
LB: loop body
LE: loop exit
PB: predicated region body
PF: predicated region fallthrough
CT: control target
= control target key end

     0   :  { %s5187_s21 = smov 0   ;;  %s5189_s22 = smov 0   ;;  %s6506_s0 = inlined_call_operand.vmem [shape: bf16[2,6,6,6,128], index: 0, kind: input, shape index: {}, may-alias: {0,1,2}]   ;;  %s6507_s1 = inlined_call_operand.vmem [shape: bf16[2,6,6,6,128], index: 1, kind: input, shape index: {}, may-alias: {0,1,2}]   ;;  %s6508_s2 = inlined_call_operand.vmem [shape: bf16[2,6,6,6,128], index: 2, kind: input, shape index: {}, may-alias: {0,1,2}]   ;;  %s6509_s3 = inlined_call_operand.vmem [shape: bf16[3,1152,128], index: 3, kind: input, shape index: {}]   ;;  %s6510_s4 = inlined_call_operand.vmem [shape: bf16[2,4,16,128], index: 4, kind: output, shape index: {0}]   ;;  %s6511_s5 = inlined_call_operand.vmem [shape: f32[2,4,1,128], index: 5, kind: output, shape index: {1}]   ;;  %s6512_s6 = inlined_call_operand.vmem [shape: f32[2,4,1,128], index: 6, kind: output, shape index: {2}]  }
   0x1   :  { %s5191_s23 = smov 0   ;;  %s5193_s24 = smov 0  }
   0x2   :  { %s5195_s25 = smov 0  }
   0x3 LB: > { %s26_s26 = sadd.s32 1, %s5139_s23  ;;  %s29_s27 = sadd.s32 1, %s5143_s24  ;;  %s5147_s25 = sphi %s5195_s25, %s17_s25   ;;  %s5143_s24 = sphi %s5193_s24, %s6522_s24   ;;  %s5139_s23 = sphi %s5191_s23, %s6521_s23   ;;  %s5135_s22 = sphi %s5189_s22, %s6520_s22   ;;  %s5131_s21 = sphi %s5187_s21, %s6519_s21  }
   0x4   : > { %p27_p0 = scmp.ge.s32.totalorder %s26_s26, 4  ;;  %p3938_p1 = scmp.ge.s32.totalorder %s5147_s25, 1 }
   0x5   : > { %p281_p2 = scmp.lt.s32.totalorder %s5147_s25, 9 }
   0x6   : > { %s6524_s26 = smov (%p27_p0, %s26_s26), 0  ;;  %s6526_s27 = smov (!%p27_p0, %s29_s27), %s5143_s24 }
   0x7   : > { %p282_p3 = pnand %p3938_p1, %p281_p2  ;;  %p31_p4 = scmp.ge.s32.totalorder %s6526_s27, 2 }
   0x8   : > { %s362_s11 = sadd.s32 (!%p282_p3), 1, %s5131_s21  ;;  %p353_p5 = scmp.lt.s32.totalorder (!%p282_p3), %s5135_s22, 1 }
   0x9   : > { %s6528_s27 = smov (%p31_p4, %s6526_s27), 0  ;;  %285 = sbr.rel (%p282_p3) target bundleno = 496 (0x1f0), region = 36 }
   0xa   : > { %p365_p6 = scmp.lt.s32.totalorder (!%p282_p3), %s362_s11, 5  ;;  %p355_p7 = scmp.lt.s32.totalorder (!%p282_p3), %s5131_s21, 5 }
   0xb   : > { %s373_s15 = sadd.s32 (!%p282_p3), 2, %s5131_s21  ;;  %p386_p9 = scmp.lt.s32.totalorder (!%p282_p3), %s5131_s21, 3 }
   0xc   : > { %p376_p8 = scmp.lt.s32.totalorder (!%p282_p3), %s373_s15, 5 }
   0xe   : > { %v4878_v0 = vld [vmem:[%s6509_s3 + $0x2b8] sm:$0xff]   ;;  %v4882_v4 = vld [vmem:[%s6509_s3 + $0x2b0] sm:$0xff]   ;;  %v4886_v8 = vld [vmem:[%s6509_s3 + $0x2a8] sm:$0xff]   ;;  %s6530_s22 = smov (!%p353_p5, %s5135_s22), 1  ;;  %s6532_s11 = smov (!%p365_p6, %s362_s11), 5  ;;  %v421_v30 = vlaneseq  ;;  %vm513_vm3 = vcmask 1040384  }
   0xf   : > { %v4879_v1 = vld [vmem:[%s6509_s3 + $0x338] sm:$0xff]   ;;  %4480 = vmatprep.subr.bf16.mxu0 %v4878_v0  ;;  %v4883_v5 = vld [vmem:[%s6509_s3 + $0x330] sm:$0xff]   ;;  %v4887_v9 = vld [vmem:[%s6509_s3 + $0x328] sm:$0xff]   ;;  %s5293_s16 = smul.u32 36, %s6530_s22  ;;  %v5149_v33 = vmov 1983009808  }
  0x10   : > { %v4880_v2 = vld [vmem:[%s6509_s3 + $0x278] sm:$0xff]   ;;  %4502 = vmatprep.subr.bf16.mxu1 %v4879_v1  ;;  %v4884_v6 = vld [vmem:[%s6509_s3 + $0x270] sm:$0xff]   ;;  %v4888_v10 = vld [vmem:[%s6509_s3 + $0x268] sm:$0xff]   ;;  %s4833_s19 = smul.u32 6, %s6532_s11  ;;  %v419_v34 = vunpack.c.l.s4 %v5149_v33  ;;  %v422_v35 = vshrl.u32 %v421_v30, 7  ;;  %vm514_vm4 = vcmask 1042434  }
  0x11   : > { %v4881_v3 = vld [vmem:[%s6509_s3 + $0x2f8] sm:$0xff]   ;;  %4481 = vmatpush3.bf16.msra.mxu0 %v4880_v2  ;;  %v4885_v7 = vld [vmem:[%s6509_s3 + $0x2f0] sm:$0xff]   ;;  %v4889_v11 = vld [vmem:[%s6509_s3 + $0x2e8] sm:$0xff]   ;;  %vm450_vm0 = vsmask.f32 1280  ;;  %vm516_vm5 = vcmask 1044484  }
  0x12   : > { %4503 = vmatpush3.bf16.msra.mxu1 %v4881_v3  ;;  %4482 = vmatprep.subr.bf16.mxu0 %v4882_v4  ;;  %v4890_v12 = vld [vmem:[%s6509_s3 + $0x2a0] sm:$0xff]   ;;  %v4894_v16 = vld [vmem:[%s6509_s3 + $0x298] sm:$0xff]   ;;  %v4898_v20 = vld [vmem:[%s6509_s3 + $0x290] sm:$0xff]   ;;  %s369_s11 = sadd.s32 %s4833_s19, %s5293_s16  ;;  %vm451_vm1 = vsmask.f32 3336  ;;  %v420_v36 = vunpack.c.0.s8 %v419_v34  ;;  %vm518_vm12 = vcmask 1046534  }
  0x13   : > { %4504 = vmatprep.subr.bf16.mxu1 %v4883_v5  ;;  %v4891_v13 = vld [vmem:[%s6509_s3 + $0x320] sm:$0xff]   ;;  %v4895_v17 = vld [vmem:[%s6509_s3 + $0x318] sm:$0xff]   ;;  %v4899_v21 = vld [vmem:[%s6509_s3 + $0x310] sm:$0xff]   ;;  %s3940_s20 = sshll.u32 %s369_s11, 2  ;;  %vm453_vm2 = vsmask.f32 5392 }
  0x14   : > { %v4892_v14 = vld [vmem:[%s6509_s3 + $0x260] sm:$0xff]   ;;  %v4896_v18 = vld [vmem:[%s6509_s3 + $0x258] sm:$0xff]   ;;  %v4900_v22 = vld [vmem:[%s6509_s3 + $0x250] sm:$0xff]   ;;  %s5329_s9 = scalar_lea.vmem %s6507_s1, %s3940_s20  ;;  %v5343_v41 = vsub.s32 %v420_v36, %v422_v35  ;;  %vm455_vm6 = vsmask.f32 7448  ;;  %vm5151_vm14 = vmmov 0  }
  0x15   : > { %4483 = vmatpush3.bf16.msra.mxu0 %v4884_v6  ;;  %v4893_v15 = vld [vmem:[%s6509_s3 + $0x2e0] sm:$0xff]   ;;  %v4897_v19 = vld [vmem:[%s6509_s3 + $0x2d8] sm:$0xff]   ;;  %v4901_v23 = vld [vmem:[%s6509_s3 + $0x2d0] sm:$0xff]   ;;  %s5576_s14 = scalar_select %p355_p7, %s5131_s21, 5 }
  0x16   : > { %4505 = vmatpush3.bf16.msra.mxu1 %v4885_v7  ;;  %4484 = vmatprep.subr.bf16.mxu0 %v4886_v8  ;;  %v4902_v24 = vld [vmem:[%s6509_s3 + $0x288] sm:$0xff]   ;;  %v4906_v28 = vld [vmem:[%s6509_s3 + $0x280] sm:$0xff]   ;;  %v5346_v42 = vld [vmem:[%s5329_s9 + $0x10] sm:$0x7]  ;;  %s6534_s15 = smov (!%p376_p8, %s373_s15), 5  ;;  %s6536_s21 = smov (!%p386_p9, %s5131_s21), 3 }
  0x17   : > { %4506 = vmatprep.subr.bf16.mxu1 %v4887_v9  ;;  %v4903_v25 = vld [vmem:[%s6509_s3 + $0x308] sm:$0xff]   ;;  %v4907_v29 = vld [vmem:[%s6509_s3 + $0x300] sm:$0xff]   ;;  %v4914_v43 = vld [vmem:[%s6509_s3 + $0x3b8] sm:$0xff]   ;;  %v993_v30 = vrot.slane %v5346_v42, %v5343_v41  ;;  %s4831_s30 = smul.u32 6, %s5576_s14  ;;  %s3942_s10 = sshll.u32 %s6536_s21, 1 }
  0x18   : > { %v4904_v26 = vld [vmem:[%s6509_s3 + $0x248] sm:$0xff]   ;;  %v4908_v31 = vld [vmem:[%s6509_s3 + $0x240] sm:$0xff]   ;;  %v4915_v44 = vld [vmem:[%s6509_s3 + $0x438] sm:$0xff]   ;;  %s4834_s18 = smul.u32 6, %s6534_s15  ;;  %s3945_s17 = sshll.u32 %s6530_s22, 2 }
  0x19   : > { %4485 = vmatpush3.bf16.msra.mxu0 %v4888_v10  ;;  %v4905_v27 = vld [vmem:[%s6509_s3 + $0x2c8] sm:$0xff]   ;;  %v4909_v32 = vld [vmem:[%s6509_s3 + $0x2c0] sm:$0xff]   ;;  %vm452_vm7 = vmor %vm450_vm0, %vm451_vm1  ;;  %s359_s14 = sadd.s32 %s5293_s16, %s4831_s30 }
  0x1a   : > { %4507 = vmatpush3.bf16.msra.mxu1 %v4889_v11  ;;  %4486 = vmatprep.subr.bf16.mxu0 %v4890_v12  ;;  %v5332_v37 = vld [vmem:[%s5329_s9] sm:$0x7]  ;;  %v5335_v38 = vld [vmem:[%s5329_s9 + $0x4] sm:$0x7]  ;;  %v5338_v39 = vld [vmem:[%s5329_s9 + $0x8] sm:$0x7]  ;;  %s380_s15 = sadd.s32 %s4834_s18, %s5293_s16  ;;  %s398_s18 = sadd.s32 %s3945_s17, %s6536_s21 }
  0x1b   : > { %4508 = vmatprep.subr.bf16.mxu1 %v4891_v13  ;;  %v5341_v40 = vld [vmem:[%s5329_s9 + $0xc] sm:$0x7]  ;;  %v5356_v45 = vrot.slane %v5332_v37, %v5343_v41  ;;  %v5360_v46 = vrot.slane %v5335_v38, %v5343_v41  ;;  %v5364_v47 = vrot.slane %v5338_v39, %v5343_v41  ;;  %v1094_v49 = vcombine.low %v5335_v38, %v5338_v39  ;;  %vm454_vm8 = vmor %vm452_vm7, %vm453_vm2  ;;  %s3939_s28 = sshll.u32 %s359_s14, 2  ;;  %s3941_s14 = sshll.u32 %s380_s15, 2  ;;  %v5108_v35 = vld [vmem:[%s6509_s3 + $0x680] sm:$0xff]  }
  0x1c   : > { %v5368_v48 = vrot.slane %v5341_v40, %v5343_v41  ;;  %v1095_v50 = vcombine.low %v5341_v40, %v5346_v42  ;;  %vm5405_vm9 = vmor %vm513_vm3, %vm514_vm4  ;;  %v999_v11 = vshll.u32 %v993_v30, 16  ;;  %s5632_s12 = scalar_lea.vmem %s6506_s0, %s3939_s28  ;;  %s6092_s30 = scalar_lea.vmem %s6508_s2, %s3941_s14  ;;  %v5094_v12 = vld [vmem:[%s6509_s3 + $0x648] sm:$0xff]  }
  0x1d   : > { %4487 = vmatpush3.bf16.msra.mxu0 %v4892_v14  ;;  %v5378_v51 = vcombine.high %v5356_v45, %v5356_v45  ;;  %v5382_v52 = vcombine.high %v5360_v46, %v5360_v46  ;;  %v5386_v53 = vcombine.high %v5364_v47, %v5364_v47  ;;  %v915_v55 = vshrl.u32 %v5356_v45, 16  ;;  %vm5410_vm10 = vmor %vm454_vm8, %vm455_vm6  ;;  %s406_s15 = scalar_lea.vmem %s6512_s6, %s398_s18 }
  0x1e   : > { %4509 = vmatpush3.bf16.msra.mxu1 %v4893_v15  ;;  %4488 = vmatprep.subr.bf16.mxu0 %v4894_v16  ;;  %v5390_v54 = vcombine.high %v5368_v48, %v5368_v48  ;;  %v918_v56 = vshll.u32 %v5356_v45, 16  ;;  %v929_v57 = vshrl.u32 %v5360_v46, 16  ;;  %v932_v58 = vshll.u32 %v5360_v46, 16  ;;  %vm517_vm11 = vmor %vm5405_vm9, %vm516_vm5 }
  0x1f   : > { %4510 = vmatprep.subr.bf16.mxu1 %v4895_v17  ;;  %v924_v59 = vshll.u32 %v5378_v51, 16  ;;  %v938_v60 = vshll.u32 %v5382_v52, 16  ;;  %v943_v61 = vshrl.u32 %v5364_v47, 16  ;;  %v946_v62 = vshll.u32 %v5364_v47, 16  ;;  %vm5438_vm13 = vmor %vm517_vm11, %vm518_vm12 }
  0x20   : > { %v917_v63 = vrot.slane %v915_v55, 6  ;;  %v920_v0 = vrot.slane %v918_v56, 7  ;;  %v931_v1 = vrot.slane %v929_v57, 6  ;;  %v934_v2 = vrot.slane %v932_v58, 7 }
  0x21   : > { %4489 = vmatpush3.bf16.msra.mxu0 %v4896_v18  ;;  %v926_v3 = vrot.slane %v924_v59, 7  ;;  %v940_v4 = vrot.slane %v938_v60, 7  ;;  %v945_v5 = vrot.slane %v943_v61, 6  ;;  %v948_v6 = vrot.slane %v946_v62, 7 }
  0x22   : > { %4511 = vmatpush3.bf16.msra.mxu1 %v4897_v19  ;;  %4490 = vmatprep.subr.bf16.mxu0 %v4898_v20  ;;  %v921_v7 = vor.u32 %v920_v0, %v917_v63  ;;  %v935_v8 = vor.u32 %v934_v2, %v931_v1  ;;  %v952_v9 = vshll.u32 %v5386_v53, 16  ;;  %v957_v10 = vshrl.u32 %v5368_v48, 16  ;;  %v4917_v2 = vld [vmem:[%s6509_s3 + $0x3f8] sm:$0xff]  }
  0x23   : > { %4512 = vmatprep.subr.bf16.mxu1 %v4899_v21  ;;  %v949_v13 = vor.u32 %v948_v6, %v945_v5  ;;  %v960_v14 = vshll.u32 %v5368_v48, 16  ;;  %v966_v15 = vshll.u32 %v5390_v54, 16  ;;  %v1102_v16 = vrot.slane %v1094_v49, %v5343_v41  ;;  %v4919_v5 = vld [vmem:[%s6509_s3 + $0x430] sm:$0xff]  }
  0x24   : > { %v922_v17 = vrot.slane %v921_v7, 2  ;;  %v936_v18 = vrot.slane %v935_v8, 2  ;;  %v959_v19 = vrot.slane %v957_v10, 6  ;;  %v1109_v20 = vrot.slane %v1095_v50, %v5343_v41  ;;  %v4920_v7 = vld [vmem:[%s6509_s3 + $0x370] sm:$0xff]  }
  0x25   : > { %4491 = vmatpush3.bf16.msra.mxu0 %v4900_v22  ;;  %v950_v21 = vrot.slane %v949_v13, 2  ;;  %v954_v22 = vrot.slane %v952_v9, 7  ;;  %v3953_v36 = vrot.slane %v5356_v45, 9  ;;  %v976_v49 = vrot.slane %v5382_v52, 7 }
  0x26   : > { %4513 = vmatpush3.bf16.msra.mxu1 %v4901_v23  ;;  %4492 = vmatprep.subr.bf16.mxu0 %v4902_v24  ;;  %v962_v23 = vrot.slane %v960_v14, 7  ;;  %v927_v24 = vsel %vm5410_vm10, %v922_v17, %v926_v3  ;;  %v3955_v45 = vrot.slane %v5364_v47, 9  ;;  %v3956_v57 = vrot.slane %v5368_v48, 9  ;;  %v4918_v3 = vld [vmem:[%s6509_s3 + $0x3b0] sm:$0xff]   ;;  %v4923_v17 = vld [vmem:[%s6509_s3 + $0x428] sm:$0xff]  }
  0x27   : > { %4514 = vmatprep.subr.bf16.mxu1 %v4903_v25  ;;  %v5422_v25 = vsel %vm5410_vm10, %v936_v18, %v940_v4  ;;  %v5436_v33 = vsel %vm5410_vm10, %v950_v21, %v954_v22  ;;  %v984_v58 = vrot.slane %v5390_v54, 7  ;;  %v4916_v54 = vld [vmem:[%s6509_s3 + $0x378] sm:$0xff]   ;;  %v996_v10 = vshrl.u32 %v993_v30, 16  ;;  %v4921_v14 = vld [vmem:[%s6509_s3 + $0x3f0] sm:$0xff]   ;;  %v4924_v18 = vld [vmem:[%s6509_s3 + $0x368] sm:$0xff]  }
  0x28   : > { %v1001_v21 = vrot.slane %v999_v11, 7  ;;  %v4926_v22 = vld [vmem:[%s6509_s3 + $0x3a0] sm:$0xff]  }
  0x29   : > { %4493 = vmatpush3.bf16.msra.mxu0 %v4904_v26  ;;  %v1040_v26 = vcombine.low %v5332_v37, %v5335_v38  ;;  %v5443_v37 = vcombine.high %v993_v30, %v993_v30  ;;  %v985_v61 = vsel %vm5438_vm13, %v3956_v57, %v984_v58  ;;  %v4936_v58 = vld [vmem:[%s6509_s3 + $0x350] sm:$0xff]  }
  0x2a   : > { %4515 = vmatpush3.bf16.msra.mxu1 %v4905_v27  ;;  %4494 = vmatprep.subr.bf16.mxu0 %v4906_v28  ;;  %v963_v27 = vor.u32 %v962_v23, %v959_v19  ;;  %v968_v28 = vrot.slane %v966_v15, 7  ;;  %v4922_v15 = vld [vmem:[%s6509_s3 + $0x3a8] sm:$0xff]  }
  0x2b   : > { %4516 = vmatprep.subr.bf16.mxu1 %v4907_v29  ;;  %v1041_v29 = vcombine.low %v5338_v39, %v5341_v40  ;;  %v1048_v38 = vrot.slane %v1040_v26, %v5343_v41  ;;  %v972_v39 = vrot.slane %v5378_v51, 7  ;;  %v3954_v40 = vrot.slane %v5360_v46, 9  ;;  %v4925_v23 = vld [vmem:[%s6509_s3 + $0x3e8] sm:$0xff]   ;;  %v4927_v26 = vld [vmem:[%s6509_s3 + $0x420] sm:$0xff]  }
  0x2c   : > { %v964_v34 = vrot.slane %v963_v27, 2  ;;  %v980_v46 = vrot.slane %v5386_v53, 7  ;;  %v3957_v53 = vrot.slane %v993_v30, 9  ;;  %v1011_v1 = vrot.slane %v5443_v37, 7  ;;  %v4930_v30 = vld [vmem:[%s6509_s3 + $0x398] sm:$0xff]  }
  0x2d   : > { %4495 = vmatpush3.bf16.msra.mxu0 %v4908_v31  ;;  %v1058_v31 = vcombine.low %v927_v24, %v5422_v25  ;;  %v973_v51 = vsel %vm5438_vm13, %v3953_v36, %v972_v39  ;;  %v977_v56 = vsel %vm5438_vm13, %v3954_v40, %v976_v49  ;;  %v1005_v24 = vshll.u32 %v5443_v37, 16  ;;  %v4934_v39 = vld [vmem:[%s6509_s3 + $0x390] sm:$0xff]  }
  0x2e   : > { %4517 = vmatpush3.bf16.msra.mxu1 %v4909_v32  ;;  %4524 = vmatprep.subr.bf16.mxu0 %v4914_v43  ;;  %v1110_v32 = vcombine.low %v1102_v16, %v1109_v20  ;;  %v5450_v43 = vsel %vm5410_vm10, %v964_v34, %v968_v28  ;;  %v981_v47 = vsel %vm5438_vm13, %v3955_v45, %v980_v46  ;;  %v998_v20 = vrot.slane %v996_v10, 6  ;;  %v4928_v28 = vld [vmem:[%s6509_s3 + $0x360] sm:$0xff]   ;;  %v4931_v34 = vld [vmem:[%s6509_s3 + $0x418] sm:$0xff]  }
  0x2f   : > { %4546 = vmatprep.subr.bf16.mxu1 %v4915_v44  ;;  %v5453_v44 = vrot.slane %v1041_v29, %v5343_v41  ;;  %v1059_v50 = vcombine.low %v5436_v33, %v5450_v43  ;;  %v1066_v55 = vrot.slane %v1058_v31, %v5343_v41  ;;  %v1076_v59 = vcombine.low %v973_v51, %v977_v56  ;;  %v4929_v29 = vld [vmem:[%s6509_s3 + $0x3e0] sm:$0xff]   ;;  %v877_v31 = vld [vmem:[%s5329_s9 + $0x14] sm:$0x7]  ;;  %s399_s9 = scalar_lea.vmem %s6511_s5, %s398_s18 }
  0x30   : > { %1828 = vmatprep.mubr.bf16.mxu1 %v1110_v32  ;;  %v1130_v62 = vcombine.low %v977_v56, %v981_v47  ;;  %v1077_v0 = vcombine.low %v981_v47, %v985_v61  ;;  %v5495_v6 = vsel %vm5438_vm13, %v3957_v53, %v1011_v1  ;;  %v1002_v27 = vor.u32 %v1001_v21, %v998_v20  ;;  %v4938_v47 = vld [vmem:[%s6509_s3 + $0x388] sm:$0xff]   ;;  %v5644_v20 = vld [vmem:[%s5632_s12] sm:$0x7]  ;;  %v5647_v21 = vld [vmem:[%s5632_s12 + $0x4] sm:$0x7] }
  0x31   : > { %v5468_v52 = vrot.slane %v1059_v50, %v5343_v41  ;;  %v1056_v60 = vcombine.low %v1048_v38, %v5453_v44  ;;  %v1084_v48 = vrot.slane %v1076_v59, %v5343_v41  ;;  %v1131_v8 = vcombine.low %v985_v61, %v5495_v6  ;;  %v4932_v38 = vld [vmem:[%s6509_s3 + $0x358] sm:$0xff]   ;;  %v4937_v61 = vld [vmem:[%s6509_s3 + $0x3d0] sm:$0xff]  }
  0x32   : > { %v5488_v4 = vrot.slane %v1077_v0, %v5343_v41  ;;  %v1138_v9 = vrot.slane %v1130_v62, %v5343_v41  ;;  %v1007_v32 = vrot.slane %v1005_v24, 7  ;;  %v5540_v36 = vrot.slane %v877_v31, %v5343_v41  ;;  %v4933_v50 = vld [vmem:[%s6509_s3 + $0x3d8] sm:$0xff]   ;;  %v5654_v24 = vld [vmem:[%s5632_s12 + $0x8] sm:$0x7] }
  0x33   : > { %v1074_v63 = vcombine.low %v1066_v55, %v5468_v52  ;;  %v1145_v16 = vrot.slane %v1131_v8, %v5343_v41  ;;  %v1003_v37 = vrot.slane %v1002_v27, 2  ;;  %v4935_v55 = vld [vmem:[%s6509_s3 + $0x410] sm:$0xff]   ;;  %v1112_v53 = vcombine.low %v5422_v25, %v5436_v33  ;;  %v4941_v33 = vld [vmem:[%s6509_s3 + $0x3c8] sm:$0xff]  }
  0x34   : > { %v1092_v13 = vcombine.low %v1084_v48, %v5488_v4  ;;  %v5550_v40 = vcombine.high %v5540_v36, %v5540_v36  ;;  %v1023_v49 = vshrl.u32 %v5540_v36, 16  ;;  %v1026_v45 = vshll.u32 %v5540_v36, 16  ;;  %v4940_v48 = vld [vmem:[%s6509_s3 + $0x348] sm:$0xff]  }
  0x35   : > { %1787 = vmatprep.mubr.bf16.mxu0 %v1074_v63  ;;  %v1146_v19 = vcombine.low %v1138_v9, %v1145_v16  ;;  %v1008_v57 = vsel %vm5410_vm10, %v1003_v37, %v1007_v32  ;;  %v4939_v63 = vld [vmem:[%s6509_s3 + $0x408] sm:$0xff]   ;;  %v1148_v1 = vcombine.low %v5346_v42, %v877_v31  ;;  %v4945_v42 = vld [vmem:[%s6509_s3 + $0x3c0] sm:$0xff]   ;;  %v4949_v16 = vld [vmem:[%s6509_s3 + $0x38] sm:$0xff]   ;;  %v5661_v27 = vrot.slane %v5644_v20, %v5343_v41 }
  0x36   : > { %1788 = vmatmul.mubr.bf16.vlgmr.msra.gmra.mxu0 %v1056_v60  ;;  %1829 = vmatmul.mubr.bf16.vlgmr.msra.gmra.mxu1 %v1092_v13  ;;  %v1025_v51 = vrot.slane %v1023_v49, 6  ;;  %v1028_v46 = vrot.slane %v1026_v45, 7  ;;  %v1032_v56 = vshll.u32 %v5550_v40, 16  ;;  %v1113_v62 = vcombine.low %v5450_v43, %v1008_v57  ;;  %v4946_v13 = vld [vmem:[%s6509_s3 + $0x78] sm:$0xff]   ;;  %v4957_v49 = vld [vmem:[%s6509_s3 + $0x460] sm:$0xff]  }
  0x37   : > { %4525 = vmatpush3.bf16.msra.mxu0 %v4916_v54  ;;  %4547 = vmatpush3.bf16.msra.mxu1 %v4917_v2  ;;  %v4942_v54 = vld [vmem:[%s6509_s3 + $0x380] sm:$0xff]   ;;  %v1120_v2 = vrot.slane %v1112_v53, %v5343_v41  ;;  %v1155_v10 = vrot.slane %v1148_v1, %v5343_v41  ;;  %v5674_v31 = vrot.slane %v5654_v24, %v5343_v41 }
  0x38   : > { %4526 = vmatprep.subr.bf16.mxu0 %v4918_v3  ;;  %4548 = vmatprep.subr.bf16.mxu1 %v4919_v5  ;;  %v1029_v59 = vor.u32 %v1028_v46, %v1025_v51  ;;  %v1034_v60 = vrot.slane %v1032_v56, 7  ;;  %v1127_v3 = vrot.slane %v1113_v62, %v5343_v41  ;;  %v4943_v5 = vld [vmem:[%s6509_s3 + $0x400] sm:$0xff]  }
  0x39   : > { %1869 = vmatprep.mubr.bf16.mxu0 %v1146_v19  ;;  %v4953_v19 = vld [vmem:[%s6509_s3 + $0x68] sm:$0xff]   ;;  %v5698_v45 = vcombine.high %v5674_v31, %v5674_v31  ;;  %v4958_v53 = vld [vmem:[%s6509_s3 + $0x20] sm:$0xff]  }
  0x3a   : > { %v1030_v0 = vrot.slane %v1029_v59, 2  ;;  %v1128_v11 = vcombine.low %v1120_v2, %v1127_v3  ;;  %v4960_v2 = vld [vmem:[%s6509_s3 + $0x458] sm:$0xff]  }
  0x3b   : > { %4527 = vmatpush3.bf16.msra.mxu0 %v4920_v7  ;;  %4549 = vmatpush3.bf16.msra.mxu1 %v4921_v14  ;;  %v4944_v7 = vld [vmem:[%s6509_s3 + $0x340] sm:$0xff]   ;;  %v4948_v14 = vld [vmem:[%s6509_s3 + $0x478] sm:$0xff]  }
  0x3c   : > { %4528 = vmatprep.subr.bf16.mxu0 %v4922_v15  ;;  %4550 = vmatprep.subr.bf16.mxu1 %v4923_v17  ;;  %v1035_v25 = vsel %vm5410_vm10, %v1030_v0, %v1034_v60  ;;  %v5150_v15 = vmov 0.0   ;;  %v4950_v17 = vld [vmem:[%s6509_s3 + $0x70] sm:$0xff]   ;;  %v486_v60 = vshrl.u32 %v5674_v31, 16 }
  0x3d   : > { %v1158_v43 = vcombine.low %v1008_v57, %v1035_v25 }
  0x3f   : > { %4529 = vmatpush3.bf16.msra.mxu0 %v4924_v18  ;;  %4551 = vmatpush3.bf16.msra.mxu1 %v4925_v23  ;;  %v1165_v8 = vrot.slane %v1158_v43, %v5343_v41  ;;  %v4951_v18 = vld [vmem:[%s6509_s3 + $0x470] sm:$0xff]   ;;  %v4954_v23 = vld [vmem:[%s6509_s3 + $0x468] sm:$0xff]  }
  0x40   : > { %4530 = vmatprep.subr.bf16.mxu0 %v4926_v22  ;;  %4552 = vmatprep.subr.bf16.mxu1 %v4927_v26  ;;  %v3958_v22 = vrot.slane %v5540_v36, 9  ;;  %v5657_v26 = vld [vmem:[%s5632_s12 + $0xc] sm:$0x7] }
  0x41   : > { %v1166_v9 = vcombine.low %v5468_v52, %v1165_v8  ;;  %v1156_v52 = vcombine.low %v5453_v44, %v1155_v10  ;;  %v4952_v44 = vld [vmem:[%s6509_s3 + $0x30] sm:$0xff]   ;;  %v5678_v32 = vrot.slane %v5657_v26, %v5343_v41  ;;  %v4965_v36 = vld [vmem:[%s6509_s3 + $0x48] sm:$0xff]  }
  0x43   : > { %4531 = vmatpush3.bf16.msra.mxu0 %v4928_v28  ;;  %4553 = vmatpush3.bf16.msra.mxu1 %v4929_v29  ;;  %v5665_v28 = vrot.slane %v5647_v21, %v5343_v41  ;;  %v1038_v29 = vrot.slane %v5550_v40, 7  ;;  %v4956_v40 = vld [vmem:[%s6509_s3 + $0x60] sm:$0xff]   ;;  %v500_v1 = vshrl.u32 %v5678_v32, 16 }
  0x44   : > { %4532 = vmatprep.subr.bf16.mxu0 %v4930_v30  ;;  %4554 = vmatprep.subr.bf16.mxu1 %v4931_v34  ;;  %v4955_v30 = vld [vmem:[%s6509_s3 + $0x28] sm:$0xff]   ;;  %v5682_v34 = vcombine.high %v5661_v27, %v5661_v27 }
  0x45   : > { %1910 = vmatprep.mubr.bf16.mxu1 %v1166_v9  ;;  %v5686_v37 = vcombine.high %v5665_v28, %v5665_v28  ;;  %v475_v51 = vshll.u32 %v5665_v28, 16  ;;  %v502_v9 = vrot.slane %v500_v1, 6 }
  0x46   : > { %v467_v57 = vshll.u32 %v5682_v34, 16 }
  0x47   : > { %4533 = vmatpush3.bf16.msra.mxu0 %v4932_v38  ;;  %4555 = vmatpush3.bf16.msra.mxu1 %v4933_v50  ;;  %v458_v38 = vshrl.u32 %v5661_v27, 16  ;;  %v5702_v50 = vcombine.high %v5678_v32, %v5678_v32  ;;  %v477_v59 = vrot.slane %v475_v51, 7  ;;  %v644_v51 = vcombine.low %v5647_v21, %v5654_v24 }
  0x48   : > { %4534 = vmatprep.subr.bf16.mxu0 %v4934_v39  ;;  %4556 = vmatprep.subr.bf16.mxu1 %v4935_v55  ;;  %v461_v39 = vshll.u32 %v5661_v27, 16  ;;  %v472_v55 = vshrl.u32 %v5665_v28, 16 }
  0x49   : > { %v460_v46 = vrot.slane %v458_v38, 6 }
  0x4a   : > { %v463_v56 = vrot.slane %v461_v39, 7 }
  0x4b   : > { %4535 = vmatpush3.bf16.msra.mxu0 %v4936_v58  ;;  %4557 = vmatpush3.bf16.msra.mxu1 %v4937_v61  ;;  %v481_v58 = vshll.u32 %v5686_v37, 16  ;;  %v489_v61 = vshll.u32 %v5674_v31, 16 }
  0x4c   : > { %4536 = vmatprep.subr.bf16.mxu0 %v4938_v47  ;;  %4558 = vmatprep.subr.bf16.mxu1 %v4939_v63  ;;  %v474_v47 = vrot.slane %v472_v55, 6  ;;  %v464_v62 = vor.u32 %v463_v56, %v460_v46  ;;  %v469_v63 = vrot.slane %v467_v57, 7  ;;  %v4967_v57 = vld [vmem:[%s6509_s3 + $0x8] sm:$0xff]  }
  0x4d   : > { %v483_v0 = vrot.slane %v481_v58, 7  ;;  %v491_v43 = vrot.slane %v489_v61, 7  ;;  %v4968_v61 = vld [vmem:[%s6509_s3 + $0x40] sm:$0xff]  }
  0x4e   : > { %v478_v25 = vor.u32 %v477_v59, %v474_v47  ;;  %v465_v3 = vrot.slane %v464_v62, 2  ;;  %v590_v47 = vcombine.low %v5644_v20, %v5647_v21  ;;  %v591_v59 = vcombine.low %v5654_v24, %v5657_v26  ;;  %v4969_v20 = vld [vmem:[%s6509_s3 + $0x440] sm:$0xff]  }
  0x4f   : > { %4537 = vmatpush3.bf16.msra.mxu0 %v4940_v48  ;;  %4559 = vmatpush3.bf16.msra.mxu1 %v4941_v33  ;;  %v495_v48 = vshll.u32 %v5698_v45, 16  ;;  %v488_v33 = vrot.slane %v486_v60, 6  ;;  %v3948_v60 = vrot.slane %v5665_v28, 9  ;;  %v652_v24 = vrot.slane %v644_v51, %v5343_v41  ;;  %v4984_v51 = vld [vmem:[%s6509_s3 + $0x128] sm:$0xff]  }
  0x50   : > { %4538 = vmatprep.subr.bf16.mxu0 %v4942_v54  ;;  %4560 = vmatprep.subr.bf16.mxu1 %v4943_v5  ;;  %v4959_v54 = vld [vmem:[%s6509_s3 + $0x58] sm:$0xff]   ;;  %v503_v5 = vshll.u32 %v5678_v32, 16  ;;  %v479_v8 = vrot.slane %v478_v25, 2  ;;  %v470_v10 = vsel %vm5410_vm10, %v465_v3, %v469_v63  ;;  %v526_v63 = vrot.slane %v5686_v37, 7 }
  0x51   : > { %v4973_v37 = vld [vmem:[%s6509_s3 + $0xf8] sm:$0xff]   ;;  %v598_v25 = vrot.slane %v590_v47, %v5343_v41  ;;  %v534_v3 = vrot.slane %v5702_v50, 7 }
  0x53   : > { %4539 = vmatpush3.bf16.msra.mxu0 %v4944_v7  ;;  %4561 = vmatpush3.bf16.msra.mxu1 %v4945_v42  ;;  %v509_v7 = vshll.u32 %v5702_v50, 16  ;;  %v492_v42 = vor.u32 %v491_v43, %v488_v33  ;;  %v5820_v33 = vrot.slane %v591_v59, %v5343_v41  ;;  %v3950_v43 = vrot.slane %v5678_v32, 9  ;;  %v4975_v32 = vld [vmem:[%s6509_s3 + $0xb8] sm:$0xff]   ;;  %v4988_v59 = vld [vmem:[%s6509_s3 + $0x120] sm:$0xff]  }
  0x54   : > { %4771 = vmatprep.subr.bf16.mxu0 %v5150_v15  ;;  %4577 = vmatprep.subr.bf16.mxu1 %v4946_v13  ;;  %v505_v13 = vrot.slane %v503_v5, 7 }
  0x55   : > { %v5843_v50 = vsel %vm5438_vm13, %v3950_v43, %v534_v3  ;;  %v4996_v3 = vld [vmem:[%s6509_s3 + $0x110] sm:$0xff]  }
  0x56   : > { %1870 = vmatmul.mubr.bf16.vlgmr.msra.gmra.mxu0 %v1128_v11  ;;  %1911 = vmatmul.mubr.bf16.vlgmr.msra.gmra.mxu1 %v1156_v52  ;;  %v497_v11 = vrot.slane %v495_v48, 7  ;;  %v4962_v52 = vld [vmem:[%s6509_s3 + $0x50] sm:$0xff]   ;;  %v5812_v48 = vsel %vm5438_vm13, %v3948_v60, %v526_v63  ;;  %v3947_v63 = vrot.slane %v5661_v27, 9 }
  0x57   : > { %4772 = vmatpush3.bf16.msra.mxu0 %v4948_v14  ;;  %4787 = vmatprep.mubr.msk.bf16.mxu0 %vm5151_vm14, %v5150_v15  ;;  %v4961_v14 = vld [vmem:[%s6509_s3 + $0x18] sm:$0xff]  }
  0x58   : > { %4773 = vmatprep.subr.bf16.mxu0 %v5150_v15  ;;  %4578 = vmatpush3.bf16.msra.mxu1 %v4949_v16  ;;  %v5735_v16 = vsel %vm5410_vm10, %v479_v8, %v483_v0 }
  0x59   : > { %4579 = vmatprep.subr.bf16.mxu1 %v4950_v17  ;;  %v493_v17 = vrot.slane %v492_v42, 2  ;;  %v608_v38 = vcombine.low %v470_v10, %v5735_v16  ;;  %v4976_v10 = vld [vmem:[%s6509_s3 + $0x138] sm:$0xff]  }
  0x5b   : > { %4774 = vmatpush3.bf16.msra.mxu0 %v4951_v18  ;;  %v1039_v18 = vsel %vm5438_vm13, %v3958_v22, %v1038_v29  ;;  %v5754_v22 = vsel %vm5410_vm10, %v493_v17, %v497_v11  ;;  %v616_v46 = vrot.slane %v608_v38, %v5343_v41  ;;  %v4978_v11 = vld [vmem:[%s6509_s3 + $0x170] sm:$0xff]   ;;  %v4982_v38 = vld [vmem:[%s6509_s3 + $0x168] sm:$0xff]  }
  0x5c   : > { %4775 = vmatprep.subr.bf16.mxu0 %v5150_v15  ;;  %4580 = vmatpush3.bf16.msra.mxu1 %v4952_v44  ;;  %v4963_v44 = vld [vmem:[%s6509_s3 + $0x450] sm:$0xff]   ;;  %v1168_v39 = vcombine.low %v5495_v6, %v1039_v18  ;;  %v4981_v18 = vld [vmem:[%s6509_s3 + $0xe8] sm:$0xff]  }
  0x5d   : > { %4581 = vmatprep.subr.bf16.mxu1 %v4953_v19  ;;  %v506_v19 = vor.u32 %v505_v13, %v502_v9  ;;  %v606_v9 = vcombine.low %v598_v25, %v5820_v33 }
  0x5e   : > { %v1175_v62 = vrot.slane %v1168_v39, %v5343_v41  ;;  %v4985_v39 = vld [vmem:[%s6509_s3 + $0xe0] sm:$0xff]  }
  0x5f   : > { %4776 = vmatpush3.bf16.msra.mxu0 %v4954_v23  ;;  %v511_v23 = vrot.slane %v509_v7, 7  ;;  %v507_v29 = vrot.slane %v506_v19, 2  ;;  %v4977_v7 = vld [vmem:[%s6509_s3 + $0xf0] sm:$0xff]  }
  0x60   : > { %4777 = vmatprep.subr.bf16.mxu0 %v5150_v15  ;;  %4582 = vmatpush3.bf16.msra.mxu1 %v4955_v30  ;;  %v4964_v30 = vld [vmem:[%s6509_s3 + $0x10] sm:$0xff]   ;;  %v1176_v1 = vcombine.low %v5488_v4, %v1175_v62  ;;  %v4990_v62 = vld [vmem:[%s6509_s3 + $0x158] sm:$0xff]  }
  0x61   : > { %4583 = vmatprep.subr.bf16.mxu1 %v4956_v40  ;;  %v5758_v40 = vld [vmem:[%s5632_s12 + $0x10] sm:$0x7]  ;;  %v5765_v55 = vsel %vm5410_vm10, %v507_v29, %v511_v23 }
  0x62   : > { %v609_v6 = vcombine.low %v5754_v22, %v5765_v55  ;;  %v645_v56 = vcombine.low %v5657_v26, %v5758_v40  ;;  %v5780_v58 = vrot.slane %v5758_v40, %v5343_v41  ;;  %v3949_v26 = vrot.slane %v5674_v31, 9  ;;  %v4970_v31 = vld [vmem:[%s6509_s3] sm:$0xff]   ;;  %v4980_v19 = vld [vmem:[%s6509_s3 + $0x130] sm:$0xff]  }
  0x63   : > { %4778 = vmatpush3.bf16.msra.mxu0 %v4957_v49  ;;  %v4966_v49 = vld [vmem:[%s6509_s3 + $0x448] sm:$0xff]  }
  0x64   : > { %4779 = vmatprep.subr.bf16.mxu0 %v5150_v15  ;;  %4584 = vmatpush3.bf16.msra.mxu1 %v4958_v53  ;;  %v5791_v53 = vrot.slane %v609_v6, %v5343_v41  ;;  %v5800_v21 = vcombine.high %v5780_v58, %v5780_v58  ;;  %v659_v0 = vrot.slane %v645_v56, %v5343_v41  ;;  %v3951_v5 = vrot.slane %v5780_v58, 9  ;;  %v4987_v56 = vld [vmem:[%s6509_s3 + $0xa0] sm:$0xff]  }
  0x65   : > { %4585 = vmatprep.subr.bf16.mxu1 %v4959_v54  ;;  %v530_v54 = vrot.slane %v5698_v45, 7 }
  0x66   : > { %v624_v28 = vcombine.low %v616_v46, %v5791_v53  ;;  %v660_v8 = vcombine.low %v652_v24, %v659_v0  ;;  %v561_v42 = vrot.slane %v5800_v21, 7  ;;  %v4986_v46 = vld [vmem:[%s6509_s3 + $0x160] sm:$0xff]   ;;  %v555_v47 = vshll.u32 %v5800_v21, 16  ;;  %v4992_v24 = vld [vmem:[%s6509_s3 + $0x118] sm:$0xff]  }
  0x67   : > { %4780 = vmatpush3.bf16.msra.mxu0 %v4960_v2  ;;  %v4974_v2 = vld [vmem:[%s6509_s3 + $0x178] sm:$0xff]   ;;  %v5829_v45 = vsel %vm5438_vm13, %v3949_v26, %v530_v54  ;;  %v522_v21 = vrot.slane %v5682_v34, 7  ;;  %v4993_v26 = vld [vmem:[%s6509_s3 + $0xd0] sm:$0xff]  }
  0x68   : > { %4781 = vmatprep.subr.bf16.mxu0 %v5150_v15  ;;  %4586 = vmatpush3.bf16.msra.mxu1 %v4961_v14  ;;  %v680_v4 = vcombine.low %v5812_v48, %v5829_v45  ;;  %v5855_v13 = vsel %vm5438_vm13, %v3951_v5, %v561_v42  ;;  %v4979_v14 = vld [vmem:[%s6509_s3 + $0xb0] sm:$0xff]   ;;  %v4999_v42 = vld [vmem:[%s6509_s3 + $0x88] sm:$0xff]  }
  0x69   : > { %4587 = vmatprep.subr.bf16.mxu1 %v4962_v52  ;;  %2424 = vmatprep.mubr.bf16.mxu1 %v624_v28  ;;  %v681_v52 = vcombine.low %v5843_v50, %v5855_v13  ;;  %v4994_v34 = vld [vmem:[%s6509_s3 + $0x150] sm:$0xff]  }
  0x6a   : > { %v688_v17 = vrot.slane %v680_v4, %v5343_v41  ;;  %v4995_v54 = vld [vmem:[%s6509_s3 + $0x90] sm:$0xff]   ;;  %v4998_v4 = vld [vmem:[%s6509_s3 + $0x148] sm:$0xff]  }
  0x6b   : > { %4782 = vmatpush3.bf16.msra.mxu0 %v4963_v44  ;;  %v546_v44 = vshrl.u32 %v5780_v58, 16  ;;  %v695_v23 = vrot.slane %v681_v52, %v5343_v41  ;;  %v5002_v52 = vld [vmem:[%s6509_s3 + $0x140] sm:$0xff]  }
  0x6c   : > { %4783 = vmatprep.subr.bf16.mxu0 %v5150_v15  ;;  %4588 = vmatpush3.bf16.msra.mxu1 %v4964_v30  ;;  %v549_v30 = vshll.u32 %v5780_v58, 16  ;;  %v5894_v58 = vld [vmem:[%s5632_s12 + $0x14] sm:$0x7]  ;;  %s3943_s12 = sshll.u32 %s6530_s22, 3 }
  0x6d   : > { %4589 = vmatprep.subr.bf16.mxu1 %v4965_v36  ;;  %v4983_v36 = vld [vmem:[%s6509_s3 + $0xa8] sm:$0xff]   ;;  %v696_v29 = vcombine.low %v688_v17, %v695_v23  ;;  %v5902_v60 = vrot.slane %v5894_v58, %v5343_v41  ;;  %s390_s11 = sadd.s32 %s3943_s12, %s3942_s10 }
  0x6e   : > { %v551_v6 = vrot.slane %v549_v30, 7  ;;  %v5004_v30 = vld [vmem:[%s6509_s3 + $0x100] sm:$0xff]   ;;  %s3944_s13 = sshll.u32 %s390_s11, 2 }
  0x6f   : > { %4784 = vmatpush3.bf16.msra.mxu0 %v4966_v49  ;;  %v548_v49 = vrot.slane %v546_v44, 6  ;;  %v5920_v27 = vcombine.high %v5902_v60, %v5902_v60  ;;  %v573_v28 = vshrl.u32 %v5902_v60, 16  ;;  %v576_v43 = vshll.u32 %v5902_v60, 16  ;;  %s392_s16 = scalar_lea.vmem %s6510_s4, %s3944_s13 }
  0x70   : > { %4785 = vmatprep.subr.bf16.mxu0 %v5150_v15  ;;  %4590 = vmatpush3.bf16.msra.mxu1 %v4967_v57  ;;  %v4989_v57 = vld [vmem:[%s6509_s3 + $0xd8] sm:$0xff]  }
  0x71   : > { %4591 = vmatprep.subr.bf16.mxu1 %v4968_v61  ;;  %v552_v61 = vor.u32 %v551_v6, %v548_v49  ;;  %v575_v25 = vrot.slane %v573_v28, 6  ;;  %v5009_v6 = vld [vmem:[%s6509_s3 + $0x238] sm:$0xff]  }
  0x72   : > { %v5021_v28 = vld [vmem:[%s6509_s3 + $0x218] sm:$0xff]  }
  0x73   : > { %4786 = vmatpush3.bf16.msra.mxu0 %v4969_v20  ;;  %v4991_v20 = vld [vmem:[%s6509_s3 + $0x98] sm:$0xff]   ;;  %v553_v0 = vrot.slane %v552_v61, 2  ;;  %v5017_v61 = vld [vmem:[%s6509_s3 + $0x1a0] sm:$0xff]  }
  0x74   : > { %4599 = vmatprep.subr.bf16.mxu0 %v4973_v37  ;;  %4592 = vmatpush3.bf16.msra.mxu1 %v4970_v31  ;;  %v557_v37 = vrot.slane %v555_v47, 7  ;;  %v523_v31 = vsel %vm5438_vm13, %v3947_v63, %v522_v21  ;;  %v5016_v47 = vld [vmem:[%s6509_s3 + $0x1e0] sm:$0xff]   ;;  %v5022_v21 = vld [vmem:[%s6509_s3 + $0x1d0] sm:$0xff]  }
  0x75   : > { %4621 = vmatprep.subr.bf16.mxu1 %v4974_v2  ;;  %v582_v2 = vshll.u32 %v5920_v27, 16  ;;  %v5018_v63 = vld [vmem:[%s6509_s3 + $0x220] sm:$0xff]  }
  0x76   : > { %4788 = vmatmul.mubr.bf16.vlgmr.msra.gmra.mxu0 %v1176_v1  ;;  %v4997_v1 = vld [vmem:[%s6509_s3 + $0xc8] sm:$0xff]   ;;  %v558_v5 = vsel %vm5410_vm10, %v553_v0, %v557_v37  ;;  %v5023_v37 = vld [vmem:[%s6509_s3 + $0x190] sm:$0xff]   ;;  %v698_v0 = vcombine.low %v5758_v40, %v5894_v58 }
  0x77   : > { %4600 = vmatpush3.bf16.msra.mxu0 %v4975_v32  ;;  %2465 = vmatprep.mubr.bf16.mxu0 %v660_v8  ;;  %v578_v32 = vrot.slane %v576_v43, 7  ;;  %v627_v8 = vcombine.low %v5829_v45, %v5843_v50  ;;  %v5000_v45 = vld [vmem:[%s6509_s3 + $0x108] sm:$0xff]   ;;  %v5029_v43 = vld [vmem:[%s6509_s3 + $0x180] sm:$0xff]  }
  0x78   : > { %4601 = vmatprep.subr.bf16.mxu0 %v4977_v7  ;;  %2425 = vmatmul.mubr.bf16.vlgmr.msra.gmra.mxu1 %v606_v9  ;;  %v626_v7 = vcombine.low %v523_v31, %v5812_v48  ;;  %v663_v48 = vcombine.low %v5765_v55, %v558_v5  ;;  %v5007_v55 = vld [vmem:[%s6509_s3 + $0x1f8] sm:$0xff]   ;;  %v5028_v31 = vld [vmem:[%s6509_s3 + $0x1c0] sm:$0xff]   ;;  %v5027_v40 = vld [vmem:[%s6509_s3 + $0x208] sm:$0xff]   ;;  %v705_v58 = vrot.slane %v698_v0, %v5343_v41 }
  0x79   : > { %4622 = vmatpush3.bf16.msra.mxu1 %v4976_v10  ;;  %2506 = vmatprep.mubr.bf16.mxu1 %v696_v29  ;;  %v579_v9 = vor.u32 %v578_v32, %v575_v25  ;;  %v584_v10 = vrot.slane %v582_v2, 7  ;;  %v5008_v29 = vld [vmem:[%s6509_s3 + $0x1b8] sm:$0xff]  }
  0x7a   : > { %4623 = vmatprep.subr.bf16.mxu1 %v4978_v11  ;;  %v5001_v11 = vld [vmem:[%s6509_s3 + $0xc0] sm:$0xff]   ;;  %v634_v17 = vrot.slane %v626_v7, %v5343_v41  ;;  %v677_v23 = vrot.slane %v663_v48, %v5343_v41  ;;  %v5033_v32 = vld [vmem:[%s6509_s3 + $0x578] sm:$0xff]   ;;  %v6113_v48 = vld [vmem:[%s6092_s30 + $0xc] sm:$0x7] }
  0x7b   : > { %4602 = vmatpush3.bf16.msra.mxu0 %v4979_v14  ;;  %v662_v14 = vcombine.low %v5735_v16, %v5754_v22  ;;  %v580_v50 = vrot.slane %v579_v9, 2  ;;  %v5003_v16 = vld [vmem:[%s6509_s3 + $0x80] sm:$0xff]   ;;  %v5040_v9 = vld [vmem:[%s6509_s3 + $0x4e8] sm:$0xff]  }
  0x7c   : > { %4603 = vmatprep.subr.bf16.mxu0 %v4981_v18  ;;  %v5964_v18 = vrot.slane %v627_v8, %v5343_v41  ;;  %v5037_v8 = vld [vmem:[%s6509_s3 + $0x570] sm:$0xff]  }
  0x7d   : > { %4624 = vmatpush3.bf16.msra.mxu1 %v4980_v19  ;;  %v585_v22 = vsel %vm5410_vm10, %v580_v50, %v584_v10  ;;  %v670_v19 = vrot.slane %v662_v14, %v5343_v41  ;;  %v6104_v10 = vld [vmem:[%s6092_s30] sm:$0x7]  ;;  %v6110_v14 = vld [vmem:[%s6092_s30 + $0x8] sm:$0x7]  ;;  %v5039_v50 = vld [vmem:[%s6509_s3 + $0x530] sm:$0xff]  }
  0x7e   : > { %4625 = vmatprep.subr.bf16.mxu1 %v4982_v38  ;;  %v708_v44 = vcombine.low %v558_v5, %v585_v22  ;;  %v642_v38 = vcombine.low %v634_v17, %v5964_v18  ;;  %v5034_v5 = vld [vmem:[%s6509_s3 + $0x4b8] sm:$0xff]   ;;  %v6128_v17 = vrot.slane %v6110_v14, %v5343_v41  ;;  %v5042_v22 = vld [vmem:[%s6509_s3 + $0x4a8] sm:$0xff]  }
  0x7f   : > { %4604 = vmatpush3.bf16.msra.mxu0 %v4983_v36 }
  0x80   : > { %4605 = vmatprep.subr.bf16.mxu0 %v4985_v39  ;;  %v715_v36 = vrot.slane %v708_v44, %v5343_v41  ;;  %v5010_v39 = vld [vmem:[%s6509_s3 + $0x1f0] sm:$0xff]  }
  0x81   : > { %4626 = vmatpush3.bf16.msra.mxu1 %v4984_v51  ;;  %v678_v51 = vcombine.low %v670_v19, %v677_v23  ;;  %v5043_v23 = vld [vmem:[%s6509_s3 + $0x528] sm:$0xff]  }
  0x82   : > { %4627 = vmatprep.subr.bf16.mxu1 %v4986_v46  ;;  %v716_v49 = vcombine.low %v5791_v53, %v715_v36  ;;  %v5011_v46 = vld [vmem:[%s6509_s3 + $0x1b0] sm:$0xff]   ;;  %v6158_v36 = vcombine.high %v6128_v17, %v6128_v17 }
  0x83   : > { %4606 = vmatpush3.bf16.msra.mxu0 %v4987_v56  ;;  %v5013_v56 = vld [vmem:[%s6509_s3 + $0x1e8] sm:$0xff]   ;;  %v5012_v53 = vld [vmem:[%s6509_s3 + $0x230] sm:$0xff]  }
  0x84   : > { %4607 = vmatprep.subr.bf16.mxu0 %v4989_v57  ;;  %v5014_v57 = vld [vmem:[%s6509_s3 + $0x1a8] sm:$0xff]  }
  0x85   : > { %4628 = vmatpush3.bf16.msra.mxu1 %v4988_v59  ;;  %v5015_v59 = vld [vmem:[%s6509_s3 + $0x228] sm:$0xff]  }
  0x86   : > { %4629 = vmatprep.subr.bf16.mxu1 %v4990_v62  ;;  %v5019_v62 = vld [vmem:[%s6509_s3 + $0x1d8] sm:$0xff]  }
  0x87   : > { %4608 = vmatpush3.bf16.msra.mxu0 %v4991_v20  ;;  %v5020_v20 = vld [vmem:[%s6509_s3 + $0x198] sm:$0xff]  }
  0x88   : > { %4609 = vmatprep.subr.bf16.mxu0 %v4993_v26  ;;  %v588_v26 = vrot.slane %v5920_v27, 7 }
  0x89   : > { %4630 = vmatpush3.bf16.msra.mxu1 %v4992_v24  ;;  %v3952_v24 = vrot.slane %v5902_v60, 9  ;;  %v5025_v60 = vld [vmem:[%s6509_s3 + $0x1c8] sm:$0xff]  }
  0x8a   : > { %4631 = vmatprep.subr.bf16.mxu1 %v4994_v34  ;;  %v5024_v34 = vld [vmem:[%s6509_s3 + $0x210] sm:$0xff]  }
  0x8b   : > { %4610 = vmatpush3.bf16.msra.mxu0 %v4995_v54  ;;  %v589_v27 = vsel %vm5438_vm13, %v3952_v24, %v588_v26  ;;  %v5026_v54 = vld [vmem:[%s6509_s3 + $0x188] sm:$0xff]   ;;  %v5047_v24 = vld [vmem:[%s6509_s3 + $0x520] sm:$0xff]   ;;  %v5048_v26 = vld [vmem:[%s6509_s3 + $0x4d8] sm:$0xff]  }
  0x8c   : > { %4611 = vmatprep.subr.bf16.mxu0 %v4997_v1  ;;  %v718_v25 = vcombine.low %v5855_v13, %v589_v27  ;;  %v5032_v13 = vld [vmem:[%s6509_s3 + $0x4f8] sm:$0xff]   ;;  %v5030_v1 = vld [vmem:[%s6509_s3 + $0x200] sm:$0xff]  }
  0x8d   : > { %4632 = vmatpush3.bf16.msra.mxu1 %v4996_v3  ;;  %v706_v3 = vcombine.low %v5820_v33, %v705_v58  ;;  %v5035_v33 = vld [vmem:[%s6509_s3 + $0x538] sm:$0xff]  }
  0x8e   : > { %4633 = vmatprep.subr.bf16.mxu1 %v4998_v4  ;;  %v725_v2 = vrot.slane %v718_v25, %v5343_v41  ;;  %v5036_v4 = vld [vmem:[%s6509_s3 + $0x4f0] sm:$0xff]  }
  0x8f   : > { %4612 = vmatpush3.bf16.msra.mxu0 %v4999_v42  ;;  %v5038_v42 = vld [vmem:[%s6509_s3 + $0x4b0] sm:$0xff]  }
  0x90   : > { %4613 = vmatprep.subr.bf16.mxu0 %v5001_v11  ;;  %v726_v7 = vcombine.low %v5964_v18, %v725_v2  ;;  %v6107_v11 = vld [vmem:[%s6092_s30 + $0x4] sm:$0x7]  ;;  %v6132_v18 = vrot.slane %v6113_v48, %v5343_v41 }
  0x91   : > { %4634 = vmatpush3.bf16.msra.mxu1 %v5000_v45  ;;  %v6117_v45 = vrot.slane %v6104_v10, %v5343_v41 }
  0x92   : > { %4635 = vmatprep.subr.bf16.mxu1 %v5002_v52  ;;  %v6124_v52 = vrot.slane %v6107_v11, %v5343_v41  ;;  %v2682_v27 = vshrl.u32 %v6132_v18, 16  ;;  %v2685_v25 = vshll.u32 %v6132_v18, 16 }
  0x93   : > { %4614 = vmatpush3.bf16.msra.mxu0 %v5003_v16  ;;  %v5041_v16 = vld [vmem:[%s6509_s3 + $0x568] sm:$0xff]   ;;  %v2640_v44 = vshrl.u32 %v6117_v45, 16  ;;  %v2643_v19 = vshll.u32 %v6117_v45, 16 }
  0x94   : > { %4643 = vmatprep.subr.bf16.mxu0 %v5007_v55  ;;  %v6142_v55 = vcombine.high %v6117_v45, %v6117_v45  ;;  %v2684_v58 = vrot.slane %v2682_v27, 6  ;;  %v5061_v27 = vld [vmem:[%s6509_s3 + $0x540] sm:$0xff]  }
  0x95   : > { %4636 = vmatpush3.bf16.msra.mxu1 %v5004_v30  ;;  %v5044_v30 = vld [vmem:[%s6509_s3 + $0x4e0] sm:$0xff]  }
  0x96   : > { %2466 = vmatmul.mubr.bf16.vlgmr.msra.gmra.mxu0 %v642_v38  ;;  %4791 = vmatprep.subr.bf16.mxu1 %v5150_v15  ;;  %v6154_v38 = vcombine.high %v6124_v52, %v6124_v52 }
  0x97   : > { %4644 = vmatpush3.bf16.msra.mxu0 %v5008_v29  ;;  %2547 = vmatprep.mubr.bf16.mxu0 %v716_v49  ;;  %v6162_v29 = vcombine.high %v6132_v18, %v6132_v18  ;;  %v5045_v49 = vld [vmem:[%s6509_s3 + $0x560] sm:$0xff]  }
  0x98   : > { %4645 = vmatprep.subr.bf16.mxu0 %v5010_v39  ;;  %2507 = vmatmul.mubr.bf16.vlgmr.msra.gmra.mxu1 %v678_v51  ;;  %v2654_v39 = vshrl.u32 %v6124_v52, 16  ;;  %v2642_v51 = vrot.slane %v2640_v44, 6 }
  0x99   : > { %4792 = vmatpush3.bf16.msra.mxu1 %v5009_v6  ;;  %4807 = vmatprep.mubr.msk.bf16.mxu1 %vm5151_vm14, %v5150_v15  ;;  %v2645_v6 = vrot.slane %v2643_v19, 7  ;;  %v5056_v19 = vld [vmem:[%s6509_s3 + $0x4c8] sm:$0xff]  }
  0x9a   : > { %4793 = vmatprep.subr.bf16.mxu1 %v5150_v15 }
  0x9b   : > { %4646 = vmatpush3.bf16.msra.mxu0 %v5011_v46  ;;  %v2649_v46 = vshll.u32 %v6142_v55, 16 }
  0x9c   : > { %4647 = vmatprep.subr.bf16.mxu0 %v5013_v56  ;;  %v2657_v56 = vshll.u32 %v6124_v52, 16 }
  0x9d   : > { %4794 = vmatpush3.bf16.msra.mxu1 %v5012_v53  ;;  %v2656_v53 = vrot.slane %v2654_v39, 6 }
  0x9e   : > { %4795 = vmatprep.subr.bf16.mxu1 %v5150_v15 }
  0x9f   : > { %4648 = vmatpush3.bf16.msra.mxu0 %v5014_v57  ;;  %v2663_v57 = vshll.u32 %v6154_v38, 16 }
  0xa0   : > { %4649 = vmatprep.subr.bf16.mxu0 %v5016_v47  ;;  %v2668_v47 = vshrl.u32 %v6128_v17, 16 }
  0xa1   : > { %4796 = vmatpush3.bf16.msra.mxu1 %v5015_v59  ;;  %v2671_v59 = vshll.u32 %v6128_v17, 16 }
  0xa2   : > { %4797 = vmatprep.subr.bf16.mxu1 %v5150_v15 }
  0xa3   : > { %4650 = vmatpush3.bf16.msra.mxu0 %v5017_v61  ;;  %v5046_v61 = vld [vmem:[%s6509_s3 + $0x4a0] sm:$0xff]  }
  0xa4   : > { %4651 = vmatprep.subr.bf16.mxu0 %v5019_v62  ;;  %v2646_v62 = vor.u32 %v2645_v6, %v2642_v51  ;;  %v2765_v6 = vcombine.low %v6104_v10, %v6107_v11  ;;  %v5057_v10 = vld [vmem:[%s6509_s3 + $0x548] sm:$0xff]  }
  0xa5   : > { %4798 = vmatpush3.bf16.msra.mxu1 %v5018_v63  ;;  %v2651_v63 = vrot.slane %v2649_v46, 7  ;;  %v2766_v46 = vcombine.low %v6110_v14, %v6113_v48 }
  0xa6   : > { %4799 = vmatprep.subr.bf16.mxu1 %v5150_v15  ;;  %v2647_v0 = vrot.slane %v2646_v62, 2  ;;  %v2701_v62 = vrot.slane %v6154_v38, 7 }
  0xa7   : > { %4652 = vmatpush3.bf16.msra.mxu0 %v5020_v20  ;;  %v2659_v20 = vrot.slane %v2657_v56, 7  ;;  %v5055_v56 = vld [vmem:[%s6509_s3 + $0x510] sm:$0xff]   ;;  %v6274_v38 = vrot.slane %v2766_v46, %v5343_v41  ;;  %v5077_v46 = vld [vmem:[%s6509_s3 + $0x5a8] sm:$0xff]  }
  0xa8   : > { %4653 = vmatprep.subr.bf16.mxu0 %v5022_v21  ;;  %v2677_v21 = vshll.u32 %v6158_v36, 16  ;;  %v2652_v2 = vsel %vm5410_vm10, %v2647_v0, %v2651_v63  ;;  %v4249_v63 = vrot.slane %v6128_v17, 9 }
  0xa9   : > { %4800 = vmatpush3.bf16.msra.mxu1 %v5021_v28  ;;  %v6184_v28 = vld [vmem:[%s6092_s30 + $0x10] sm:$0x7] }
  0xaa   : > { %4801 = vmatprep.subr.bf16.mxu1 %v5150_v15  ;;  %v6229_v51 = vrot.slane %v6184_v28, %v5343_v41 }
  0xab   : > { %4654 = vmatpush3.bf16.msra.mxu0 %v5023_v37  ;;  %v2670_v37 = vrot.slane %v2668_v47, 6  ;;  %v4247_v47 = vrot.slane %v6117_v45, 9  ;;  %v5058_v45 = vld [vmem:[%s6509_s3 + $0x488] sm:$0xff]  }
  0xac   : > { %4655 = vmatprep.subr.bf16.mxu0 %v5025_v60  ;;  %v2673_v60 = vrot.slane %v2671_v59, 7  ;;  %v2697_v59 = vrot.slane %v6142_v55, 7 }
  0xad   : > { %4802 = vmatpush3.bf16.msra.mxu1 %v5024_v34  ;;  %v5049_v34 = vld [vmem:[%s6509_s3 + $0x558] sm:$0xff]  }
  0xae   : > { %4803 = vmatprep.subr.bf16.mxu1 %v5150_v15  ;;  %v2698_v55 = vsel %vm5438_vm13, %v4247_v47, %v2697_v59  ;;  %v5080_v47 = vld [vmem:[%s6509_s3 + $0x5e0] sm:$0xff]  }
  0xaf   : > { %4656 = vmatpush3.bf16.msra.mxu0 %v5026_v54  ;;  %v2660_v54 = vor.u32 %v2659_v20, %v2656_v53  ;;  %v5059_v20 = vld [vmem:[%s6509_s3 + $0x508] sm:$0xff]  }
  0xb0   : > { %4657 = vmatprep.subr.bf16.mxu0 %v5028_v31  ;;  %v2665_v31 = vrot.slane %v2663_v57, 7 }
  0xb1   : > { %4804 = vmatpush3.bf16.msra.mxu1 %v5027_v40  ;;  %v2674_v40 = vor.u32 %v2673_v60, %v2670_v37  ;;  %v4250_v37 = vrot.slane %v6132_v18, 9  ;;  %v2709_v60 = vrot.slane %v6162_v29, 7  ;;  %v5062_v18 = vld [vmem:[%s6509_s3 + $0x480] sm:$0xff]  }
  0xb2   : > { %4805 = vmatprep.subr.bf16.mxu1 %v5150_v15 }
  0xb3   : > { %4658 = vmatpush3.bf16.msra.mxu0 %v5029_v43  ;;  %v2691_v43 = vshll.u32 %v6162_v29, 16  ;;  %v2710_v29 = vsel %vm5438_vm13, %v4250_v37, %v2709_v60 }
  0xb4   : > { %4674 = vmatprep.subr.bf16.mxu0 %v5032_v13  ;;  %v2819_v13 = vcombine.low %v6107_v11, %v6110_v14  ;;  %v6249_v11 = vcombine.high %v6229_v51, %v6229_v51 }
  0xb5   : > { %4806 = vmatpush3.bf16.msra.mxu1 %v5030_v1  ;;  %v5050_v1 = vld [vmem:[%s6509_s3 + $0x498] sm:$0xff]  }
  0xb6   : > { %2548 = vmatmul.mubr.bf16.vlgmr.msra.gmra.mxu0 %v706_v3  ;;  %4696 = vmatprep.subr.bf16.mxu1 %v5033_v32  ;;  %v2661_v3 = vrot.slane %v2660_v54, 2  ;;  %v2679_v32 = vrot.slane %v2677_v21, 7  ;;  %v2827_v39 = vrot.slane %v2819_v13, %v5343_v41  ;;  %v5060_v21 = vld [vmem:[%s6509_s3 + $0x4c0] sm:$0xff]   ;;  %v4251_v54 = vrot.slane %v6229_v51, 9 }
  0xb7   : > { %4675 = vmatpush3.bf16.msra.mxu0 %v5034_v5  ;;  %v2687_v5 = vrot.slane %v2685_v25, 7  ;;  %v2730_v59 = vshll.u32 %v6249_v11, 16 }
  0xb8   : > { %4676 = vmatprep.subr.bf16.mxu0 %v5036_v4  ;;  %4808 = vmatmul.mubr.bf16.vlgmr.msra.gmra.mxu1 %v726_v7  ;;  %v5052_v4 = vld [vmem:[%s6509_s3 + $0x4d0] sm:$0xff]   ;;  %v2675_v7 = vrot.slane %v2674_v40, 2 }
  0xb9   : > { %4697 = vmatpush3.bf16.msra.mxu1 %v5035_v33  ;;  %v5051_v33 = vld [vmem:[%s6509_s3 + $0x518] sm:$0xff]  }
  0xba   : > { %4698 = vmatprep.subr.bf16.mxu1 %v5037_v8  ;;  %v6207_v8 = vsel %vm5410_vm10, %v2661_v3, %v2665_v31  ;;  %v2736_v31 = vrot.slane %v6249_v11, 7  ;;  %v5084_v11 = vld [vmem:[%s6509_s3 + $0x5d8] sm:$0xff]  }
  0xbb   : > { %4677 = vmatpush3.bf16.msra.mxu0 %v5038_v42  ;;  %v2688_v42 = vor.u32 %v2687_v5, %v2684_v58  ;;  %v2783_v44 = vcombine.low %v2652_v2, %v6207_v8  ;;  %v5068_v58 = vld [vmem:[%s6509_s3 + $0x5f8] sm:$0xff]  }
  0xbc   : > { %4678 = vmatprep.subr.bf16.mxu0 %v5040_v9  ;;  %v2693_v9 = vrot.slane %v2691_v43, 7  ;;  %v5063_v43 = vld [vmem:[%s6509_s3 + $0x500] sm:$0xff]  }
  0xbd   : > { %4699 = vmatpush3.bf16.msra.mxu1 %v5039_v50  ;;  %v2820_v50 = vcombine.low %v6113_v48, %v6184_v28  ;;  %v2791_v48 = vrot.slane %v2783_v44, %v5343_v41  ;;  %v5073_v44 = vld [vmem:[%s6509_s3 + $0x5b0] sm:$0xff]  }
  0xbe   : > { %4700 = vmatprep.subr.bf16.mxu1 %v5041_v16  ;;  %v5053_v16 = vld [vmem:[%s6509_s3 + $0x550] sm:$0xff]  }
  0xbf   : > { %4679 = vmatpush3.bf16.msra.mxu0 %v5042_v22  ;;  %v5054_v22 = vld [vmem:[%s6509_s3 + $0x490] sm:$0xff]  }
  0xc0   : > { %4680 = vmatprep.subr.bf16.mxu0 %v5044_v30  ;;  %v2689_v30 = vrot.slane %v2688_v42, 2 }
  0xc1   : > { %4701 = vmatpush3.bf16.msra.mxu1 %v5043_v23  ;;  %v6223_v23 = vsel %vm5410_vm10, %v2675_v7, %v2679_v32  ;;  %v5069_v32 = vld [vmem:[%s6509_s3 + $0x5b8] sm:$0xff]  }
  0xc2   : > { %4702 = vmatprep.subr.bf16.mxu1 %v5045_v49  ;;  %v2834_v49 = vrot.slane %v2820_v50, %v5343_v41  ;;  %v6240_v53 = vsel %vm5410_vm10, %v2689_v30, %v2693_v9  ;;  %v5070_v7 = vld [vmem:[%s6509_s3 + $0x678] sm:$0xff]   ;;  %v2721_v9 = vshrl.u32 %v6229_v51, 16  ;;  %v5074_v30 = vld [vmem:[%s6509_s3 + $0x670] sm:$0xff]  }
  0xc3   : > { %4681 = vmatpush3.bf16.msra.mxu0 %v5046_v61  ;;  %v2784_v14 = vcombine.low %v6223_v23, %v6240_v53  ;;  %v4248_v61 = vrot.slane %v6124_v52, 9  ;;  %v2705_v52 = vrot.slane %v6158_v36, 7 }
  0xc4   : > { %4682 = vmatprep.subr.bf16.mxu0 %v5048_v26  ;;  %v2835_v57 = vcombine.low %v2827_v39, %v2834_v49  ;;  %v2773_v26 = vrot.slane %v2765_v6, %v5343_v41  ;;  %v5076_v39 = vld [vmem:[%s6509_s3 + $0x5e8] sm:$0xff]   ;;  %v2723_v49 = vrot.slane %v2721_v9, 6  ;;  %v5097_v9 = vld [vmem:[%s6509_s3 + $0x580] sm:$0xff]  }
  0xc5   : > { %4703 = vmatpush3.bf16.msra.mxu1 %v5047_v24  ;;  %v6269_v24 = vrot.slane %v2784_v14, %v5343_v41  ;;  %v2702_v17 = vsel %vm5438_vm13, %v4248_v61, %v2701_v62  ;;  %v2706_v36 = vsel %vm5438_vm13, %v4249_v63, %v2705_v52  ;;  %v2732_v61 = vrot.slane %v2730_v59, 7  ;;  %v5083_v62 = vld [vmem:[%s6509_s3 + $0x620] sm:$0xff]   ;;  %v5085_v52 = vld [vmem:[%s6509_s3 + $0x598] sm:$0xff]  }
  0xc6   : > { %4704 = vmatprep.subr.bf16.mxu1 %v5049_v34  ;;  %3553 = vmatprep.mubr.bf16.mxu1 %v2835_v57  ;;  %v2801_v0 = vcombine.low %v2698_v55, %v2702_v17  ;;  %v2855_v25 = vcombine.low %v2702_v17, %v2706_v36  ;;  %v2802_v40 = vcombine.low %v2706_v36, %v2710_v29  ;;  %v5079_v57 = vld [vmem:[%s6509_s3 + $0x628] sm:$0xff]   ;;  %v5086_v17 = vld [vmem:[%s6509_s3 + $0x658] sm:$0xff]  }
  0xc7   : > { %4683 = vmatpush3.bf16.msra.mxu0 %v5050_v1  ;;  %v2799_v34 = vcombine.low %v2791_v48, %v6269_v24  ;;  %v6302_v1 = vsel %vm5438_vm13, %v4251_v54, %v2736_v31  ;;  %v2781_v2 = vcombine.low %v2773_v26, %v6274_v38  ;;  %v2602_v48 = vld [vmem:[%s6092_s30 + $0x14] sm:$0x7]  ;;  %v5087_v36 = vld [vmem:[%s6509_s3 + $0x618] sm:$0xff]  }
  0xc8   : > { %4684 = vmatprep.subr.bf16.mxu0 %v5052_v4  ;;  %v2809_v13 = vrot.slane %v2801_v0, %v5343_v41  ;;  %v6306_v3 = vrot.slane %v2802_v40, %v5343_v41  ;;  %v2856_v5 = vcombine.low %v2710_v29, %v6302_v1  ;;  %v2863_v4 = vrot.slane %v2855_v25, %v5343_v41  ;;  %v5090_v31 = vld [vmem:[%s6509_s3 + $0x650] sm:$0xff]   ;;  %v5092_v40 = vld [vmem:[%s6509_s3 + $0x5c8] sm:$0xff]  }
  0xc9   : > { %4705 = vmatpush3.bf16.msra.mxu1 %v5051_v33  ;;  %3512 = vmatprep.mubr.bf16.mxu0 %v2799_v34  ;;  %v5072_v33 = vld [vmem:[%s6509_s3 + $0x5f0] sm:$0xff]   ;;  %v6359_v55 = vrot.slane %v2602_v48, %v5343_v41 }
  0xca   : > { %4706 = vmatprep.subr.bf16.mxu1 %v5053_v16  ;;  %v2870_v42 = vrot.slane %v2856_v5, %v5343_v41  ;;  %v2817_v50 = vcombine.low %v2809_v13, %v6306_v3  ;;  %v5071_v16 = vld [vmem:[%s6509_s3 + $0x638] sm:$0xff]   ;;  %v5088_v34 = vld [vmem:[%s6509_s3 + $0x5d0] sm:$0xff]   ;;  %v5093_v5 = vld [vmem:[%s6509_s3 + $0x588] sm:$0xff]  }
  0xcb   : > { %4685 = vmatpush3.bf16.msra.mxu0 %v5054_v22  ;;  %v2724_v22 = vshll.u32 %v6229_v51, 16  ;;  %v5075_v51 = vld [vmem:[%s6509_s3 + $0x630] sm:$0xff]   ;;  %v6369_v63 = vcombine.high %v6359_v55, %v6359_v55 }
  0xcc   : > { %4686 = vmatprep.subr.bf16.mxu0 %v5056_v19  ;;  %v2871_v19 = vcombine.low %v2863_v4, %v2870_v42  ;;  %v5095_v4 = vld [vmem:[%s6509_s3 + $0x608] sm:$0xff]  }
  0xcd   : > { %4707 = vmatpush3.bf16.msra.mxu1 %v5055_v56  ;;  %v2726_v6 = vrot.slane %v2724_v22, 7  ;;  %v5078_v56 = vld [vmem:[%s6509_s3 + $0x668] sm:$0xff]   ;;  %v5100_v22 = vld [vmem:[%s6509_s3 + $0x6b8] sm:$0xff]  }
  0xce   : > { %4708 = vmatprep.subr.bf16.mxu1 %v5057_v10  ;;  %v5081_v10 = vld [vmem:[%s6509_s3 + $0x5a0] sm:$0xff]  }
  0xcf   : > { %4687 = vmatpush3.bf16.msra.mxu0 %v5058_v45  ;;  %v2727_v14 = vor.u32 %v2726_v6, %v2723_v49  ;;  %v5082_v45 = vld [vmem:[%s6509_s3 + $0x660] sm:$0xff]  }
  0xd0   : > { %4688 = vmatprep.subr.bf16.mxu0 %v5060_v21  ;;  %v2751_v21 = vshll.u32 %v6359_v55, 16 }
  0xd1   : > { %4709 = vmatpush3.bf16.msra.mxu1 %v5059_v20  ;;  %v2748_v20 = vshrl.u32 %v6359_v55, 16  ;;  %v2728_v26 = vrot.slane %v2727_v14, 2 }
  0xd2   : > { %4710 = vmatprep.subr.bf16.mxu1 %v5061_v27  ;;  %v2753_v60 = vrot.slane %v2751_v21, 7  ;;  %v2757_v27 = vshll.u32 %v6369_v63, 16 }
  0xd3   : > { %4689 = vmatpush3.bf16.msra.mxu0 %v5062_v18  ;;  %v2750_v37 = vrot.slane %v2748_v20, 6  ;;  %v5089_v18 = vld [vmem:[%s6509_s3 + $0x590] sm:$0xff]   ;;  %v2733_v29 = vsel %vm5410_vm10, %v2728_v26, %v2732_v61  ;;  %v4252_v61 = vrot.slane %v6359_v55, 9  ;;  %v5105_v20 = vld [vmem:[%s6509_s3 + $0x698] sm:$0xff]  }
  0xd4   : > { %4718 = vmatprep.subr.bf16.mxu0 %v5068_v58  ;;  %v2759_v54 = vrot.slane %v2757_v27, 7  ;;  %v2838_v13 = vcombine.low %v6240_v53, %v2733_v29  ;;  %v2873_v53 = vcombine.low %v6184_v28, %v2602_v48  ;;  %v5098_v28 = vld [vmem:[%s6509_s3 + $0x640] sm:$0xff]   ;;  %v5106_v26 = vld [vmem:[%s6509_s3 + $0x690] sm:$0xff]  }
  0xd5   : > { %4711 = vmatpush3.bf16.msra.mxu1 %v5063_v43  ;;  %v2754_v0 = vor.u32 %v2753_v60, %v2750_v37  ;;  %v2837_v43 = vcombine.low %v6207_v8, %v6223_v23  ;;  %v5096_v8 = vld [vmem:[%s6509_s3 + $0x5c0] sm:$0xff]  }
  0xd6   : > { %3513 = vmatmul.mubr.bf16.vlgmr.msra.gmra.mxu0 %v2781_v2  ;;  %4740 = vmatprep.subr.bf16.mxu1 %v5070_v7  ;;  %v5091_v2 = vld [vmem:[%s6509_s3 + $0x610] sm:$0xff]   ;;  %v5104_v48 = vld [vmem:[%s6509_s3 + $0x6a0] sm:$0xff]  }
  0xd7   : > { %4719 = vmatpush3.bf16.msra.mxu0 %v5069_v32  ;;  %3594 = vmatprep.mubr.bf16.mxu0 %v2871_v19  ;;  %v2755_v25 = vrot.slane %v2754_v0, 2  ;;  %v2845_v7 = vrot.slane %v2837_v43, %v5343_v41 }
  0xd8   : > { %4720 = vmatprep.subr.bf16.mxu0 %v5072_v33  ;;  %3554 = vmatmul.mubr.bf16.vlgmr.msra.gmra.mxu1 %v2817_v50  ;;  %v2852_v33 = vrot.slane %v2838_v13, %v5343_v41  ;;  %v2880_v50 = vrot.slane %v2873_v53, %v5343_v41 }
  0xd9   : > { %4741 = vmatpush3.bf16.msra.mxu1 %v5071_v16  ;;  %v2760_v58 = vsel %vm5410_vm10, %v2755_v25, %v2759_v54  ;;  %v5099_v16 = vld [vmem:[%s6509_s3 + $0x600] sm:$0xff]  }
  0xda   : > { %4742 = vmatprep.subr.bf16.mxu1 %v5074_v30  ;;  %v2883_v32 = vcombine.low %v2733_v29, %v2760_v58  ;;  %v5102_v30 = vld [vmem:[%s6509_s3 + $0x6b0] sm:$0xff]  }
  0xdb   : > { %4721 = vmatpush3.bf16.msra.mxu0 %v5073_v44  ;;  %v2881_v44 = vcombine.low %v6274_v38, %v2880_v50  ;;  %v5103_v38 = vld [vmem:[%s6509_s3 + $0x6a8] sm:$0xff]  }
  0xdc   : > { %4722 = vmatprep.subr.bf16.mxu0 %v5076_v39  ;;  %v2890_v23 = vrot.slane %v2883_v32, %v5343_v41 }
  0xdd   : > { %4743 = vmatpush3.bf16.msra.mxu1 %v5075_v51 }
  0xde   : > { %4744 = vmatprep.subr.bf16.mxu1 %v5078_v56  ;;  %v2891_v42 = vcombine.low %v6269_v24, %v2890_v23  ;;  %v2853_v24 = vcombine.low %v2845_v7, %v2852_v33 }
  0xdf   : > { %4723 = vmatpush3.bf16.msra.mxu0 %v5077_v46 }
  0xe0   : > { %4724 = vmatprep.subr.bf16.mxu0 %v5080_v47  ;;  %3635 = vmatprep.mubr.bf16.mxu1 %v2891_v42 }
  0xe1   : > { %4745 = vmatpush3.bf16.msra.mxu1 %v5079_v57 }
  0xe2   : > { %4746 = vmatprep.subr.bf16.mxu1 %v5082_v45 }
  0xe3   : > { %4725 = vmatpush3.bf16.msra.mxu0 %v5081_v10 }
  0xe4   : > { %4726 = vmatprep.subr.bf16.mxu0 %v5084_v11 }
  0xe5   : > { %4747 = vmatpush3.bf16.msra.mxu1 %v5083_v62  ;;  %v2763_v62 = vrot.slane %v6369_v63, 7  ;;  %v5107_v63 = vld [vmem:[%s6509_s3 + $0x688] sm:$0xff]  }
  0xe6   : > { %4748 = vmatprep.subr.bf16.mxu1 %v5086_v17 }
  0xe7   : > { %4727 = vmatpush3.bf16.msra.mxu0 %v5085_v52  ;;  %v2764_v21 = vsel %vm5438_vm13, %v4252_v61, %v2763_v62 }
  0xe8   : > { %4728 = vmatprep.subr.bf16.mxu0 %v5088_v34  ;;  %v2893_v55 = vcombine.low %v6302_v1, %v2764_v21 }
  0xe9   : > { %4749 = vmatpush3.bf16.msra.mxu1 %v5087_v36 }
  0xea   : > { %4750 = vmatprep.subr.bf16.mxu1 %v5090_v31  ;;  %v2900_v52 = vrot.slane %v2893_v55, %v5343_v41 }
  0xeb   : > { %4729 = vmatpush3.bf16.msra.mxu0 %v5089_v18 }
  0xec   : > { %4730 = vmatprep.subr.bf16.mxu0 %v5092_v40  ;;  %v2901_v17 = vcombine.low %v6306_v3, %v2900_v52 }
  0xed   : > { %4751 = vmatpush3.bf16.msra.mxu1 %v5091_v2 }
  0xee   : > { %4752 = vmatprep.subr.bf16.mxu1 %v5094_v12 }
  0xef   : > { %4731 = vmatpush3.bf16.msra.mxu0 %v5093_v5 }
  0xf0   : > { %4732 = vmatprep.subr.bf16.mxu0 %v5096_v8 }
  0xf1   : > { %4753 = vmatpush3.bf16.msra.mxu1 %v5095_v4 }
  0xf2   : > { %4754 = vmatprep.subr.bf16.mxu1 %v5098_v28 }
  0xf3   : > { %4733 = vmatpush3.bf16.msra.mxu0 %v5097_v9 }
  0xf4   : > { %4811 = vmatprep.subr.bf16.mxu0 %v5150_v15 }
  0xf5   : > { %4755 = vmatpush3.bf16.msra.mxu1 %v5099_v16 }
  0xf6   : > { %v4496_v19 = vpop.f32.mrf.mxu0  ;;  %3595 = vmatmul.mubr.bf16.vlgmr.msra.gmra.mxu0 %v2853_v24  ;;  %v4518_v49 = vpop.f32.mrf.mxu1 }
  0xf7   : > { %4812 = vmatpush3.bf16.msra.mxu0 %v5100_v22  ;;  %4827 = vmatprep.mubr.msk.bf16.mxu0 %vm5151_vm14, %v5150_v15 }
  0xf8   : > { %v4497_v39 = vpop.f32.mrf.mxu0  ;;  %4813 = vmatprep.subr.bf16.mxu0 %v5150_v15  ;;  %3636 = vmatmul.mubr.bf16.vlgmr.msra.gmra.mxu1 %v2881_v44  ;;  %v4519_v46 = vpop.f32.mrf.mxu1 }
  0xf9   : > { %v4498_v51 = vadd.f32 %v4497_v39, %v4496_v19  ;;  %v4520_v56 = vadd.f32 %v4519_v46, %v4518_v49 }
  0xfa   : > { %v4499_v6 = vpop.f32.mrf.mxu0  ;;  %v4521_v47 = vpop.f32.mrf.mxu1 }
  0xfb   : > { %4814 = vmatpush3.bf16.msra.mxu0 %v5102_v30  ;;  %v1831_v10 = vadd.f32 %v4520_v56, %v4498_v51 }
  0xfc   : > { %v4500_v57 = vpop.f32.mrf.mxu0  ;;  %4815 = vmatprep.subr.bf16.mxu0 %v5150_v15  ;;  %v4522_v14 = vpop.f32.mrf.mxu1 }
  0xfd   : > { %v4501_v59 = vadd.f32 %v4500_v57, %v4499_v6  ;;  %v4523_v45 = vadd.f32 %v4522_v14, %v4521_v47 }
  0xff   : > { %4816 = vmatpush3.bf16.msra.mxu0 %v5103_v38  ;;  %v1834_v11 = vadd.f32 %v4523_v45, %v4501_v59 }
 0x100   : > { %4817 = vmatprep.subr.bf16.mxu0 %v5150_v15 }
 0x103   : > { %4818 = vmatpush3.bf16.msra.mxu0 %v5104_v48 }
 0x104   : > { %4819 = vmatprep.subr.bf16.mxu0 %v5150_v15 }
 0x107   : > { %4820 = vmatpush3.bf16.msra.mxu0 %v5105_v20 }
 0x108   : > { %4821 = vmatprep.subr.bf16.mxu0 %v5150_v15 }
 0x10b   : > { %4822 = vmatpush3.bf16.msra.mxu0 %v5106_v26 }
 0x10c   : > { %4823 = vmatprep.subr.bf16.mxu0 %v5150_v15 }
 0x10f   : > { %4824 = vmatpush3.bf16.msra.mxu0 %v5107_v63 }
 0x110   : > { %4825 = vmatprep.subr.bf16.mxu0 %v5150_v15 }
 0x113   : > { %4826 = vmatpush3.bf16.msra.mxu0 %v5108_v35 }
 0x116   : > { %v4540_v1 = vpop.f32.mrf.mxu0  ;;  %4828 = vmatmul.mubr.bf16.vlgmr.msra.gmra.mxu0 %v2901_v17  ;;  %v4562_v27 = vpop.f32.mrf.mxu1 }
 0x118   : > { %v4541_v37 = vpop.f32.mrf.mxu0  ;;  %v4563_v0 = vpop.f32.mrf.mxu1 }
 0x119   : > { %v4542_v60 = vadd.f32 %v4541_v37, %v4540_v1  ;;  %v4564_v54 = vadd.f32 %v4563_v0, %v4562_v27 }
 0x11a   : > { %v4543_v34 = vpop.f32.mrf.mxu0  ;;  %v4565_v29 = vpop.f32.mrf.mxu1 }
 0x11b   : > { %v1872_v36 = vadd.f32 %v4542_v60, %v1831_v10 }
 0x11c   : > { %v4544_v41 = vpop.f32.mrf.mxu0  ;;  %v4566_v40 = vpop.f32.mrf.mxu1 }
 0x11d   : > { %v4545_v18 = vadd.f32 %v4544_v41, %v4543_v34  ;;  %v1913_v31 = vadd.f32 %v4564_v54, %v1872_v36  ;;  %v4567_v58 = vadd.f32 %v4566_v40, %v4565_v29 }
 0x11f   : > { %v1875_v25 = vadd.f32 %v4545_v18, %v1834_v11 }
 0x121   : > { %v1916_v15 = vadd.f32 %v4567_v58, %v1875_v25 }
 0x136   : > { %v1953_v43 = vpop.f32.mrf.mxu0 }
 0x137   : > { %v1954_v3 = vadd.f32 %v1953_v43, %v1913_v31 }
 0x138   : > { %v4789_v13 = vpop.f32.mrf.mxu0  ;;  %v4593_v2 = vpop.f32.mrf.mxu1 }
 0x13a   : > { %v1956_v32 = vpop.f32.mrf.mxu0  ;;  %v4594_v5 = vpop.f32.mrf.mxu1 }
 0x13b   : > { %v1957_v12 = vadd.f32 %v1956_v32, %v1916_v15  ;;  %v4595_v8 = vadd.f32 %v4594_v5, %v4593_v2 }
 0x13c   : > { %v4790_v23 = vpop.f32.mrf.mxu0  ;;  %v4596_v53 = vpop.f32.mrf.mxu1 }
 0x13d   : > { %v2427_v4 = vadd.f32 %v4595_v8, %v1954_v3 }
 0x13e   : > { %v4597_v7 = vpop.f32.mrf.mxu1 }
 0x13f   : > { %v4598_v33 = vadd.f32 %v4597_v7, %v4596_v53 }
 0x141   : > { %v2430_v42 = vadd.f32 %v4598_v33, %v1957_v12 }
 0x156   : > { %v4615_v9 = vpop.f32.mrf.mxu0 }
 0x158   : > { %v4616_v28 = vpop.f32.mrf.mxu0  ;;  %v4637_v16 = vpop.f32.mrf.mxu1 }
 0x159   : > { %v4617_v50 = vadd.f32 %v4616_v28, %v4615_v9 }
 0x15a   : > { %v4618_v24 = vpop.f32.mrf.mxu0  ;;  %v4638_v44 = vpop.f32.mrf.mxu1 }
 0x15b   : > { %v2468_v22 = vadd.f32 %v4617_v50, %v2427_v4  ;;  %v4639_v19 = vadd.f32 %v4638_v44, %v4637_v16 }
 0x15c   : > { %v4619_v30 = vpop.f32.mrf.mxu0  ;;  %v4640_v49 = vpop.f32.mrf.mxu1 }
 0x15d   : > { %v4620_v39 = vadd.f32 %v4619_v30, %v4618_v24  ;;  %v2509_v51 = vadd.f32 %v4639_v19, %v2468_v22 }
 0x15e   : > { %v4641_v46 = vpop.f32.mrf.mxu1 }
 0x15f   : > { %v2471_v6 = vadd.f32 %v4620_v39, %v2430_v42  ;;  %v4642_v38 = vadd.f32 %v4641_v46, %v4640_v49 }
 0x161   : > { %v2512_v56 = vadd.f32 %v4642_v38, %v2471_v6 }
 0x176   : > { %v4659_v57 = vpop.f32.mrf.mxu0 }
 0x178   : > { %v4660_v47 = vpop.f32.mrf.mxu0  ;;  %v2590_v10 = vpop.f32.mrf.mxu1 }
 0x179   : > { %v4661_v59 = vadd.f32 %v4660_v47, %v4659_v57 }
 0x17a   : > { %v4662_v14 = vpop.f32.mrf.mxu0  ;;  %v4809_v45 = vpop.f32.mrf.mxu1 }
 0x17b   : > { %v2550_v48 = vadd.f32 %v4661_v59, %v2509_v51 }
 0x17c   : > { %v4663_v11 = vpop.f32.mrf.mxu0  ;;  %v2593_v20 = vpop.f32.mrf.mxu1 }
 0x17d   : > { %v4664_v61 = vadd.f32 %v4663_v11, %v4662_v14  ;;  %v2591_v62 = vadd.f32 %v2590_v10, %v2550_v48 }
 0x17e   : > { %v4810_v26 = vpop.f32.mrf.mxu1 }
 0x17f   : > { %v2553_v21 = vadd.f32 %v4664_v61, %v2512_v56 }
 0x181   : > { %v2594_v55 = vadd.f32 %v2593_v20, %v2553_v21 }
 0x196   : > { %v4690_v63 = vpop.f32.mrf.mxu0 }
 0x198   : > { %v4712_v52 = vpop.f32.mrf.mxu1  ;;  %v4691_v35 = vpop.f32.mrf.mxu0 }
 0x199   : > { %v4692_v18 = vadd.f32 %v4691_v35, %v4690_v63 }
 0x19a   : > { %v4713_v17 = vpop.f32.mrf.mxu1  ;;  %v4693_v1 = vpop.f32.mrf.mxu0 }
 0x19b   : > { %v4714_v29 = vadd.f32 %v4713_v17, %v4712_v52 }
 0x19c   : > { %v4715_v37 = vpop.f32.mrf.mxu1  ;;  %v4694_v60 = vpop.f32.mrf.mxu0 }
 0x19d   : > { %v3556_v58 = vadd.f32 %v4714_v29, %v4692_v18  ;;  %v4695_v15 = vadd.f32 %v4694_v60, %v4693_v1 }
 0x19e   : > { %v4716_v34 = vpop.f32.mrf.mxu1 }
 0x19f   : > { %v4717_v43 = vadd.f32 %v4716_v34, %v4715_v37 }
 0x1a1   : > { %v3559_v5 = vadd.f32 %v4717_v43, %v4695_v15 }
 0x1b6   : > { %v4734_v27 = vpop.f32.mrf.mxu0 }
 0x1b8   : > { %v4735_v36 = vpop.f32.mrf.mxu0  ;;  %v4756_v0 = vpop.f32.mrf.mxu1 }
 0x1b9   : > { %v4736_v31 = vadd.f32 %v4735_v36, %v4734_v27 }
 0x1ba   : > { %v4737_v54 = vpop.f32.mrf.mxu0  ;;  %v4757_v41 = vpop.f32.mrf.mxu1 }
 0x1bb   : > { %v3597_v3 = vadd.f32 %v4736_v31, %v3556_v58  ;;  %v4758_v13 = vadd.f32 %v4757_v41, %v4756_v0 }
 0x1bc   : > { %v4738_v25 = vpop.f32.mrf.mxu0  ;;  %v4759_v40 = vpop.f32.mrf.mxu1 }
 0x1bd   : > { %v4739_v2 = vadd.f32 %v4738_v25, %v4737_v54  ;;  %v3638_v23 = vadd.f32 %v4758_v13, %v3597_v3 }
 0x1be   : > { %v4760_v32 = vpop.f32.mrf.mxu1 }
 0x1bf   : > { %v3600_v12 = vadd.f32 %v4739_v2, %v3559_v5  ;;  %v4761_v8 = vadd.f32 %v4760_v32, %v4759_v40 }
 0x1c1   : > { %v3641_v33 = vadd.f32 %v4761_v8, %v3600_v12 }
 0x1d6   : > { %v3678_v53 = vpop.f32.mrf.mxu0 }
 0x1d7   : > { %v3679_v4 = vadd.f32 %v3678_v53, %v3638_v23 }
 0x1d8   : > { %v4829_v7 = vpop.f32.mrf.mxu0 }
 0x1d9   : > { %v3685_v9 = vadd.f32 %v3679_v4, %v2591_v62 }
 0x1da   : > { %v3681_v42 = vpop.f32.mrf.mxu0 }
 0x1db   : > { %v3682_v28 = vadd.f32 %v3681_v42, %v3641_v33  ;;  %v3705_v24 = vmul.f32 %v3685_v9, %v3685_v9 }
 0x1dc   : > { %v4830_v50 = vpop.f32.mrf.mxu0 }
 0x1dd   : > { %v3686_v16 = vadd.f32 %v3682_v28, %v2594_v55 }
 0x1df   : > { %v4478_v22 = vpack.c.bf16 %v3686_v16, %v3685_v9  ;;  %v3697_v44 = vadd.f32 %v3686_v16, %v3685_v9  ;;  %v3706_v19 = vmul.f32 %v3686_v16, %v3686_v16 }
 0x1e1   : > { %4479 = vst [vmem:[%s392_s16] sm:$0xff] %v4478_v22   ;;  %v3698_v30 = vrot.slane %v3697_v44, 4  ;;  %v3707_v39 = vadd.f32 %v3706_v19, %v3705_v24 }
 0x1e3   : > { %v3699_v49 = vadd.f32 %v3698_v30, %v3697_v44  ;;  %v3708_v51 = vrot.slane %v3707_v39, 4 }
 0x1e5   : > { %v3700_v6 = vrot.slane %v3699_v49, 2  ;;  %v3709_v46 = vadd.f32 %v3708_v51, %v3707_v39 }
 0x1e7   : > { %v3701_v38 = vadd.f32 %v3700_v6, %v3699_v49  ;;  %v3710_v56 = vrot.slane %v3709_v46, 2 }
 0x1e9   : > { %v3702_v57 = vrot.slane %v3701_v38, 1  ;;  %v3711_v47 = vadd.f32 %v3710_v56, %v3709_v46 }
 0x1eb   : > { %v3703_v59 = vadd.f32 %v3702_v57, %v3701_v38  ;;  %v3712_v10 = vrot.slane %v3711_v47, 1 }
 0x1ed   : > { %3704 = vst [vmem:[%s399_s9] sm:$0x1] %v3703_v59  ;;  %v3713_v14 = vadd.f32 %v3712_v10, %v3711_v47 }
 0x1ef   : > { %3714 = vst [vmem:[%s406_s15] sm:$0x1] %v3713_v14 }
 0x1f0 PF: > { %s17_s25 = sadd.s32 1, %s5147_s25   ;;  %s6519_s21 = smov %s5139_s23 }
 0x1f1   : > { %p14_p10 = scmp.ge.s32.totalorder %s17_s25, 10   ;;  %s6520_s22 = smov %s5143_s24 }
 0x1f2   : > { %s6521_s23 = smov %s6524_s26  ;;  %s6522_s24 = smov %s6528_s27 }
 0x1f3   :  { %16 = sbr.rel (!%p14_p10) target bundleno = 3 (0x3), region = 98 }

</bundles_post_ra>
